<compile_context>
chip_gen: v5e
topology: v5e:2x2
jax: 0.10.0
libtpu: 0.0.40
codegen_flags: <defaults>
</compile_context>

<pallas_src>
import jax
import jax.numpy as jnp
from jax.experimental import pallas as pl
from jax.experimental.pallas import tpu as pltpu

C_IN, C_MID, C_OUT = 225, 257, 225
# lane-dense (multiple-of-128) padded channel sizes
C_IN_P, C_MID_P, C_OUT_P = 256, 384, 256


def make_fused_kernel(tile_h, W):
    TH = tile_h
    R_BODY = TH * W          # pixels in the body rows
    R_ALL = (TH + 1) * W     # body + 1-row halo

    def kernel(xb_ref, xh_ref, w0_ref, b0_ref, w1_ref, b1_ref, w2_ref, b2_ref,
               o_ref, xbuf):
        # Stitch body rows + halo row into one (R_ALL, C_IN_P) bf16 slab.
        xbuf[0:R_BODY, :] = xb_ref[...].reshape(R_BODY, C_IN_P)
        xbuf[R_BODY:R_ALL, :] = xh_ref[...].reshape(W, C_IN_P)
        x = xbuf[...]

        # v1 = relu (zero-padded input lanes stay zero)
        h = jnp.maximum(x, 0.0)
        # v2 = conv0 (1x1 transpose conv == per-pixel matmul), v3 = tanh
        h = jnp.dot(h, w0_ref[...],
                    preferred_element_type=jnp.float32) + b0_ref[...]
        h = jnp.tanh(h)
        # v4 = conv1 (dilation irrelevant for a 1x1 kernel), v5 = sigmoid
        h = jnp.dot(h.astype(jnp.bfloat16), w1_ref[...],
                    preferred_element_type=jnp.float32) + b1_ref[...]
        h = 0.5 * (jnp.tanh(0.5 * h) + 1.0)   # exact sigmoid, single EUP op
        # v6 = conv2, v7 = tanh
        # (padded lanes are 0.5 after the sigmoid; w2's padded rows are zero,
        #  so they contribute nothing -- see prepare_params assert)
        h = jnp.dot(h.astype(jnp.bfloat16), w2_ref[...],
                    preferred_element_type=jnp.float32) + b2_ref[...]
        y = jnp.tanh(h).astype(jnp.bfloat16)
        y = y.reshape(TH + 1, W, C_OUT_P)

        # v8 = max_pool2d(2, stride=1): H-direction max first (leading-dim
        # slices, no tile crossing), then W-direction max on the halved tensor.
        hmax = jnp.maximum(y[:-1], y[1:])                    # (TH, W, C)
        out = jnp.maximum(hmax[:, :-1, :], hmax[:, 1:, :])   # (TH, W-1, C)
        o_ref[...] = out.reshape(1, TH, W - 1, C_OUT_P)

    return kernel


def model_forward(x_nchw, padded_params, target_rows=1024):
    w0, b0, w1, b1, w2, b2 = padded_params
    N, C, H, W = x_nchw.shape
    assert C == C_IN and H >= 2 and W >= 2

    # Row tile over the pooled-H axis; ~target_rows pixels of matmul per step.
    tile_h = max(1, min(H - 1, max(1, target_rows // W)))
    n_ht = (H - 1 + tile_h - 1) // tile_h
    H_out = n_ht * tile_h            # padded pooled-H extent
    H_pad = H_out + 1                # padded input-H extent

    # NCHW -> NHWC, zero-pad H and channels, cast to bf16 (halves input DMA).
    x = jnp.transpose(x_nchw, (0, 2, 3, 1))
    x = jnp.pad(x, ((0, 0), (0, H_pad - H), (0, 0), (0, C_IN_P - C)))
    x = x.astype(jnp.bfloat16)

    kernel = make_fused_kernel(tile_h, W)
    const = lambda n, h: (0, 0)

    pooled = pl.pallas_call(
        kernel,
        out_shape=jax.ShapeDtypeStruct((N, H_out, W - 1, C_OUT_P),
                                       jnp.bfloat16),
        grid_spec=pltpu.PrefetchScalarGridSpec(
            num_scalar_prefetch=0,
            grid=(N, n_ht),
            in_specs=[
                # body rows of this tile
                pl.BlockSpec((1, tile_h, W, C_IN_P),
                             lambda n, h: (n, h, 0, 0)),
                # 1-row halo (block size 1 along H => block index == row index)
                pl.BlockSpec((1, 1, W, C_IN_P),
                             lambda n, h: (n, (h + 1) * tile_h, 0, 0)),
                pl.BlockSpec((C_IN_P, C_MID_P), const),
                pl.BlockSpec((1, C_MID_P), const),
                pl.BlockSpec((C_MID_P, C_OUT_P), const),
                pl.BlockSpec((1, C_OUT_P), const),
                pl.BlockSpec((C_OUT_P, C_OUT_P), const),
                pl.BlockSpec((1, C_OUT_P), const),
            ],
            out_specs=pl.BlockSpec((1, tile_h, W - 1, C_OUT_P),
                                   lambda n, h: (n, h, 0, 0)),
            scratch_shapes=[
                pltpu.VMEM(((tile_h + 1) * W, C_IN_P), jnp.bfloat16),
            ],
        ),
        compiler_params=pltpu.CompilerParams(
            dimension_semantics=("parallel", "parallel")),
    )(x, x, w0, b0, w1, b1, w2, b2)

    # drop padded pooled rows / padded channels, return NCHW f32 like PyTorch
    pooled = pooled[:, :H - 1, :, :C_OUT].astype(jnp.float32)
    return jnp.transpose(pooled, (0, 3, 1, 2))


def reference_forward(x_nchw, params):
    w0, b0, w1, b1, w2, b2 = params
    N, C, H, W = x_nchw.shape
    x = jnp.transpose(x_nchw, (0, 2, 3, 1)).reshape(N * H * W, C)
    h = jnp.maximum(x, 0.0)
    h = jnp.tanh(h @ w0 + b0)
    h = jax.nn.sigmoid(h @ w1 + b1)
    h = jnp.tanh(h @ w2 + b2)
    h = h.reshape(N, H, W, C_OUT)
    p = jnp.maximum(jnp.maximum(h[:, :-1, :-1], h[:, :-1, 1:]),
                    jnp.maximum(h[:, 1:, :-1], h[:, 1:, 1:]))
    return jnp.transpose(p, (0, 3, 1, 2))


def make_params(key):
    # ConvTranspose2d(Cin, Cout, 1) weight is (Cin, Cout, 1, 1) -> (Cin, Cout).
    def init_w(k, cin, cout):
        bound = 1.0 / (cin ** 0.5)
        return jax.random.uniform(k, (cin, cout), jnp.float32, -bound, bound)

    def init_b(k, cin, cout):
        bound = 1.0 / (cin ** 0.5)
        return jax.random.uniform(k, (cout,), jnp.float32, -bound, bound)

    ks = jax.random.split(key, 6)
    return (init_w(ks[0], C_IN, C_MID), init_b(ks[1], C_IN, C_MID),
            init_w(ks[2], C_MID, C_OUT), init_b(ks[3], C_MID, C_OUT),
            init_w(ks[4], C_OUT, C_OUT), init_b(ks[5], C_OUT, C_OUT))


def prepare_params(params):
    """Zero-pad channels to lane multiples; cast weights to bf16 (once)."""
    w0, b0, w1, b1, w2, b2 = params

    def pad_w(w, kp, npad):
        k, n = w.shape
        return jnp.pad(w, ((0, kp - k), (0, npad - n))).astype(jnp.bfloat16)

    def pad_b(b, npad):
        return jnp.pad(b.reshape(1, -1), ((0, 0), (0, npad - b.shape[-1])))

    w0p, b0p = pad_w(w0, C_IN_P, C_MID_P), pad_b(b0, C_MID_P)
    w1p, b1p = pad_w(w1, C_MID_P, C_OUT_P), pad_b(b1, C_OUT_P)
    w2p, b2p = pad_w(w2, C_OUT_P, C_OUT_P), pad_b(b2, C_OUT_P)

    # Invariant the kernel relies on: after the sigmoid the padded lanes hold
    # 0.5 (not 0); they must hit all-zero rows in w2 to contribute nothing.
    assert bool(jnp.all(w2p[C_OUT:, :] == 0))
    return (w0p, b0p, w1p, b1p, w2p, b2p)


if __name__ == "__main__":
    key = jax.random.PRNGKey(0)
    kp, kx = jax.random.split(key)
    params = make_params(kp)
    padded_params = prepare_params(params)

    # channels must be 225; small valid spatial extent (the original 16384x1
    # input makes max_pool2d(2, stride=1) ill-defined: output width 0)
    x = jax.random.normal(kx, (2, C_IN, 32, 8), dtype=jnp.float32)

    out = jax.block_until_ready(model_forward(x, padded_params))
    ref = reference_forward(x, params)

    assert out.shape == (2, C_OUT, 31, 7), out.shape
    # bf16 matmuls / bf16 activation storage -> slightly relaxed tolerance
    assert jnp.allclose(out, ref, atol=2e-2, rtol=2e-2), float(
        jnp.max(jnp.abs(out - ref)))
    print("KERNEL_OK")
</pallas_src>

<mosaic_0001>
module attributes {stable_mosaic.version = 11 : i64} {
  func.func @kernel(%arg0: i32, %arg1: i32, %arg2: memref<1x31x8x256xbf16, #tpu.memory_space<vmem>>, %arg3: memref<1x1x8x256xbf16, #tpu.memory_space<vmem>>, %arg4: memref<256x384xbf16, #tpu.memory_space<vmem>>, %arg5: memref<1x384xf32, #tpu.memory_space<vmem>>, %arg6: memref<384x256xbf16, #tpu.memory_space<vmem>>, %arg7: memref<1x256xf32, #tpu.memory_space<vmem>>, %arg8: memref<256x256xbf16, #tpu.memory_space<vmem>>, %arg9: memref<1x256xf32, #tpu.memory_space<vmem>>, %arg10: memref<1x31x7x256xbf16, #tpu.memory_space<vmem>>, %arg11: memref<256x256xbf16, #tpu.memory_space<vmem>>) attributes {dimension_semantics = [#tpu.dimension_semantics<parallel>, #tpu.dimension_semantics<parallel>], iteration_bounds = array<i64: 2, 1>, scalar_prefetch = 0 : i64, scratch_operands = 1 : i64, tpu.core_type = #tpu.core_type<tc>, window_params = [{transform_indices = @transform_0, window_bounds = array<i64: 1, 31, 8, 256>}, {transform_indices = @transform_1, window_bounds = array<i64: 1, 1, 8, 256>}, {pipeline_mode = #tpu.pipeline_mode<synchronous>, transform_indices = @transform_2, window_bounds = array<i64: 256, 384>}, {pipeline_mode = #tpu.pipeline_mode<synchronous>, transform_indices = @transform_3, window_bounds = array<i64: 1, 384>}, {pipeline_mode = #tpu.pipeline_mode<synchronous>, transform_indices = @transform_4, window_bounds = array<i64: 384, 256>}, {pipeline_mode = #tpu.pipeline_mode<synchronous>, transform_indices = @transform_5, window_bounds = array<i64: 1, 256>}, {pipeline_mode = #tpu.pipeline_mode<synchronous>, transform_indices = @transform_6, window_bounds = array<i64: 256, 256>}, {pipeline_mode = #tpu.pipeline_mode<synchronous>, transform_indices = @transform_7, window_bounds = array<i64: 1, 256>}, {transform_indices = @transform_8, window_bounds = array<i64: 1, 31, 7, 256>}]} {
    %c0 = arith.constant 0 : index
    %c0_0 = arith.constant 0 : index
    %c0_1 = arith.constant 0 : index
    %c0_2 = arith.constant 0 : index
    %0 = vector.load %arg2[%c0, %c0_0, %c0_1, %c0_2] : memref<1x31x8x256xbf16, #tpu.memory_space<vmem>>, vector<1x31x8x256xbf16>
    %1 = vector.shape_cast %0 : vector<1x31x8x256xbf16> to vector<248x256xbf16>
    %c0_3 = arith.constant 0 : index
    %c0_4 = arith.constant 0 : index
    %2 = vector.load %arg11[%c0_3, %c0_4] : memref<256x256xbf16, #tpu.memory_space<vmem>>, vector<248x256xbf16>
    tpu.vector_store %arg11[%c0_3, %c0_4], %1 {strides = array<i32>} : memref<256x256xbf16, #tpu.memory_space<vmem>>, vector<248x256xbf16>,
    %c0_5 = arith.constant 0 : index
    %c0_6 = arith.constant 0 : index
    %c0_7 = arith.constant 0 : index
    %c0_8 = arith.constant 0 : index
    %3 = vector.load %arg3[%c0_5, %c0_6, %c0_7, %c0_8] : memref<1x1x8x256xbf16, #tpu.memory_space<vmem>>, vector<1x1x8x256xbf16>
    %4 = vector.shape_cast %3 : vector<1x1x8x256xbf16> to vector<8x256xbf16>
    %c248 = arith.constant 248 : index
    %c0_9 = arith.constant 0 : index
    %5 = vector.load %arg11[%c248, %c0_9] : memref<256x256xbf16, #tpu.memory_space<vmem>>, vector<8x256xbf16>
    tpu.vector_store %arg11[%c248, %c0_9], %4 {strides = array<i32>} : memref<256x256xbf16, #tpu.memory_space<vmem>>, vector<8x256xbf16>,
    %c0_10 = arith.constant 0 : index
    %c0_11 = arith.constant 0 : index
    %6 = vector.load %arg11[%c0_10, %c0_11] : memref<256x256xbf16, #tpu.memory_space<vmem>>, vector<256x256xbf16>
    %cst = arith.constant 0.000000e+00 : bf16
    %7 = vector.broadcast %cst : bf16 to vector<256x256xbf16>
    %8 = arith.maximumf %6, %7 : vector<256x256xbf16>
    %c0_12 = arith.constant 0 : index
    %c0_13 = arith.constant 0 : index
    %9 = vector.load %arg4[%c0_12, %c0_13] : memref<256x384xbf16, #tpu.memory_space<vmem>>, vector<256x384xbf16>
    %cst_14 = arith.constant dense<0.000000e+00> : vector<256x384xf32>
    %10 = tpu.matmul %8, %9, %cst_14 {dimension_numbers = #tpu.dot_dimension_numbers<[1], [0], [0], [1], [0, 0, 1, 1], [], []>} : vector<256x256xbf16>, vector<256x384xbf16>, vector<256x384xf32> -> vector<256x384xf32>
    %c0_15 = arith.constant 0 : index
    %c0_16 = arith.constant 0 : index
    %11 = vector.load %arg5[%c0_15, %c0_16] : memref<1x384xf32, #tpu.memory_space<vmem>>, vector<1x384xf32>
    %12 = vector.broadcast %11 : vector<1x384xf32> to vector<256x384xf32>
    %13 = arith.addf %10, %12 : vector<256x384xf32>
    %14 = math.tanh %13 : vector<256x384xf32>
    %15 = arith.truncf %14 : vector<256x384xf32> to vector<256x384xbf16>
    %c0_17 = arith.constant 0 : index
    %c0_18 = arith.constant 0 : index
    %16 = vector.load %arg6[%c0_17, %c0_18] : memref<384x256xbf16, #tpu.memory_space<vmem>>, vector<384x256xbf16>
    %cst_19 = arith.constant dense<0.000000e+00> : vector<256x256xf32>
    %17 = tpu.matmul %15, %16, %cst_19 {dimension_numbers = #tpu.dot_dimension_numbers<[1], [0], [0], [1], [0, 0, 1, 1], [], []>} : vector<256x384xbf16>, vector<384x256xbf16>, vector<256x256xf32> -> vector<256x256xf32>
    %c0_20 = arith.constant 0 : index
    %c0_21 = arith.constant 0 : index
    %18 = vector.load %arg7[%c0_20, %c0_21] : memref<1x256xf32, #tpu.memory_space<vmem>>, vector<1x256xf32>
    %19 = vector.broadcast %18 : vector<1x256xf32> to vector<256x256xf32>
    %20 = arith.addf %17, %19 : vector<256x256xf32>
    %cst_22 = arith.constant 5.000000e-01 : f32
    %21 = vector.broadcast %cst_22 : f32 to vector<256x256xf32>
    %22 = arith.mulf %21, %20 : vector<256x256xf32>
    %23 = math.tanh %22 : vector<256x256xf32>
    %cst_23 = arith.constant 1.000000e+00 : f32
    %24 = vector.broadcast %cst_23 : f32 to vector<256x256xf32>
    %25 = arith.addf %23, %24 : vector<256x256xf32>
    %cst_24 = arith.constant 5.000000e-01 : f32
    %26 = vector.broadcast %cst_24 : f32 to vector<256x256xf32>
    %27 = arith.mulf %26, %25 : vector<256x256xf32>
    %28 = arith.truncf %27 : vector<256x256xf32> to vector<256x256xbf16>
    %c0_25 = arith.constant 0 : index
    %c0_26 = arith.constant 0 : index
    %29 = vector.load %arg8[%c0_25, %c0_26] : memref<256x256xbf16, #tpu.memory_space<vmem>>, vector<256x256xbf16>
    %cst_27 = arith.constant dense<0.000000e+00> : vector<256x256xf32>
    %30 = tpu.matmul %28, %29, %cst_27 {dimension_numbers = #tpu.dot_dimension_numbers<[1], [0], [0], [1], [0, 0, 1, 1], [], []>} : vector<256x256xbf16>, vector<256x256xbf16>, vector<256x256xf32> -> vector<256x256xf32>
    %c0_28 = arith.constant 0 : index
    %c0_29 = arith.constant 0 : index
    %31 = vector.load %arg9[%c0_28, %c0_29] : memref<1x256xf32, #tpu.memory_space<vmem>>, vector<1x256xf32>
    %32 = vector.broadcast %31 : vector<1x256xf32> to vector<256x256xf32>
    %33 = arith.addf %30, %32 : vector<256x256xf32>
    %34 = math.tanh %33 : vector<256x256xf32>
    %35 = arith.truncf %34 : vector<256x256xf32> to vector<256x256xbf16>
    %36 = vector.shape_cast %35 : vector<256x256xbf16> to vector<32x8x256xbf16>
    %37 = vector.extract_strided_slice %36 {offsets = [0, 0, 0], sizes = [31, 8, 256], strides = [1, 1, 1]} : vector<32x8x256xbf16> to vector<31x8x256xbf16>
    %38 = vector.extract_strided_slice %36 {offsets = [1, 0, 0], sizes = [31, 8, 256], strides = [1, 1, 1]} : vector<32x8x256xbf16> to vector<31x8x256xbf16>
    %39 = arith.maximumf %37, %38 : vector<31x8x256xbf16>
    %40 = vector.extract_strided_slice %39 {offsets = [0, 0, 0], sizes = [31, 7, 256], strides = [1, 1, 1]} : vector<31x8x256xbf16> to vector<31x7x256xbf16>
    %41 = vector.extract_strided_slice %39 {offsets = [0, 1, 0], sizes = [31, 7, 256], strides = [1, 1, 1]} : vector<31x8x256xbf16> to vector<31x7x256xbf16>
    %42 = arith.maximumf %40, %41 : vector<31x7x256xbf16>
    %43 = vector.shape_cast %42 : vector<31x7x256xbf16> to vector<1x31x7x256xbf16>
    %c0_30 = arith.constant 0 : index
    %c0_31 = arith.constant 0 : index
    %c0_32 = arith.constant 0 : index
    %c0_33 = arith.constant 0 : index
    %44 = vector.load %arg10[%c0_30, %c0_31, %c0_32, %c0_33] : memref<1x31x7x256xbf16, #tpu.memory_space<vmem>>, vector<1x31x7x256xbf16>
    tpu.vector_store %arg10[%c0_30, %c0_31, %c0_32, %c0_33], %43 {strides = array<i32>} : memref<1x31x7x256xbf16, #tpu.memory_space<vmem>>, vector<1x31x7x256xbf16>,
    return
  }
  func.func @transform_0(%arg0: i32, %arg1: i32) -> (i32, i32, i32, i32) {
    %c0_i32 = arith.constant 0 : i32
    %c0_i32_0 = arith.constant 0 : i32
    %c0_i32_1 = arith.constant 0 : i32
    return %arg0, %arg1, %c0_i32, %c0_i32_0 : i32, i32, i32, i32
  }
  func.func @transform_1(%arg0: i32, %arg1: i32) -> (i32, i32, i32, i32) {
    %c1_i32 = arith.constant 1 : i32
    %0 = arith.addi %arg1, %c1_i32 : i32
    %c31_i32 = arith.constant 31 : i32
    %1 = arith.muli %0, %c31_i32 : i32
    %c0_i32 = arith.constant 0 : i32
    %c0_i32_0 = arith.constant 0 : i32
    %c0_i32_1 = arith.constant 0 : i32
    return %arg0, %1, %c0_i32, %c0_i32_0 : i32, i32, i32, i32
  }
  func.func @transform_2(%arg0: i32, %arg1: i32) -> (i32, i32) {
    %c0_i32 = arith.constant 0 : i32
    %c0_i32_0 = arith.constant 0 : i32
    %c0_i32_1 = arith.constant 0 : i32
    return %c0_i32, %c0_i32_0 : i32, i32
  }
  func.func @transform_3(%arg0: i32, %arg1: i32) -> (i32, i32) {
    %c0_i32 = arith.constant 0 : i32
    %c0_i32_0 = arith.constant 0 : i32
    %c0_i32_1 = arith.constant 0 : i32
    return %c0_i32, %c0_i32_0 : i32, i32
  }
  func.func @transform_4(%arg0: i32, %arg1: i32) -> (i32, i32) {
    %c0_i32 = arith.constant 0 : i32
    %c0_i32_0 = arith.constant 0 : i32
    %c0_i32_1 = arith.constant 0 : i32
    return %c0_i32, %c0_i32_0 : i32, i32
  }
  func.func @transform_5(%arg0: i32, %arg1: i32) -> (i32, i32) {
    %c0_i32 = arith.constant 0 : i32
    %c0_i32_0 = arith.constant 0 : i32
    %c0_i32_1 = arith.constant 0 : i32
    return %c0_i32, %c0_i32_0 : i32, i32
  }
  func.func @transform_6(%arg0: i32, %arg1: i32) -> (i32, i32) {
    %c0_i32 = arith.constant 0 : i32
    %c0_i32_0 = arith.constant 0 : i32
    %c0_i32_1 = arith.constant 0 : i32
    return %c0_i32, %c0_i32_0 : i32, i32
  }
  func.func @transform_7(%arg0: i32, %arg1: i32) -> (i32, i32) {
    %c0_i32 = arith.constant 0 : i32
    %c0_i32_0 = arith.constant 0 : i32
    %c0_i32_1 = arith.constant 0 : i32
    return %c0_i32, %c0_i32_0 : i32, i32
  }
  func.func @transform_8(%arg0: i32, %arg1: i32) -> (i32, i32, i32, i32) {
    %c0_i32 = arith.constant 0 : i32
    %c0_i32_0 = arith.constant 0 : i32
    %c0_i32_1 = arith.constant 0 : i32
    return %arg0, %arg1, %c0_i32, %c0_i32_0 : i32, i32, i32, i32
  }
}

</mosaic_0001>

<bundles_post_ra>
// kernel: tpu_custom_call.1
= control target key start
LH: loop header
LB: loop body
LE: loop exit
PB: predicated region body
PF: predicated region fallthrough
CT: control target
= control target key end

     0   :  { %s6955_s0 = inlined_call_operand.hbm [shape: bf16[2,32,8,256], index: 0, kind: input, shape index: {}]   ;;  %s6956_s1 = inlined_call_operand.hbm [shape: bf16[2,32,8,256], index: 1, kind: input, shape index: {}]   ;;  %s6957_s2 = inlined_call_operand.hbm [shape: bf16[256,384], index: 2, kind: input, shape index: {}]   ;;  %s6958_s3 = inlined_call_operand.hbm [shape: f32[1,384], index: 3, kind: input, shape index: {}]   ;;  %s6959_s4 = inlined_call_operand.hbm [shape: bf16[384,256], index: 4, kind: input, shape index: {}]   ;;  %s6960_s5 = inlined_call_operand.vmem [shape: f32[1,256], index: 5, kind: input, shape index: {}]   ;;  %s6961_s6 = inlined_call_operand.hbm [shape: bf16[256,256], index: 6, kind: input, shape index: {}]   ;;  %s6962_s7 = inlined_call_operand.vmem [shape: f32[1,256], index: 7, kind: input, shape index: {}]   ;;  %s6963_s8 = inlined_call_operand.vmem [shape: bf16[2,31,7,256], index: 8, kind: output, shape index: {}]  }
   0x1   :  { %6980 = sst [smem:[#allocation32_spill]] %s6957_s2 }
   0x2   :  { %6981 = sst [smem:[#allocation33_spill]] %s6958_s3 }
   0x3   :  { %6982 = sst [smem:[#allocation34_spill]] %s6959_s4 }
   0x4   :  { %6983 = sst [smem:[#allocation35_spill]] %s6961_s6 }
   0x5   :  { %13 = vsyncpa [#allocation4], 0 }
   0x6   :  { %15 = vsyncpa [#allocation4 + $0x1], 0 }
   0x7   :  { %16 = vsyncpa [#allocation6], 0 }
   0x8   :  { %18 = vsyncpa [#allocation6 + $0x1], 0 }
   0x9   :  { %19 = vsyncpa [#allocation9], 0 }
   0xa   :  { %20 = vsyncpa [#allocation12], 0  ;;  %s5803_s27 = smov 0   ;;  %s5805_s28 = smov 0  }
   0xb   :  { %s5807_s29 = smov 0   ;;  %s5809_s30 = smov 0  }
   0xc   :  { %s5811_s9 = smov 0   ;;  %s5813_s10 = smov 0  }
   0xd LB: > { %6984 = sst [smem:[#allocation18_spill]] %s5744_s9  ;;  %s6964_s11 = sadd.s32 4294967295, %s5748_s10   ;;  %s5748_s10 = sphi %s5813_s10, %s26_s10   ;;  %s5744_s9 = sphi %s5811_s9, %s7033_s9   ;;  %s5740_s30 = sphi %s5809_s30, %s7032_s30   ;;  %s5736_s29 = sphi %s5807_s29, %s7036_s29   ;;  %s5732_s28 = sphi %s5805_s28, %s7035_s28   ;;  %s5728_s27 = sphi %s5803_s27, %s7034_s27  }
   0xe   : > { %p60_p0 = scmp.ne.s32.totalorder %s5732_s28, %s5728_s27  ;;  %p5835_p1 = scmp.eq.s32.totalorder %s6964_s11, 0 }
   0xf   : > { %p4282_p2 = scmp.ge.s32.totalorder %s5748_s10, 1  ;;  %p257_p3 = scmp.lt.s32.totalorder %s5748_s10, 3 }
  0x10   : > { %p5843_p4 = por %p5835_p1, %p60_p0  ;;  %s6987_s2 = sld [smem:[#allocation32_spill]] }
  0x11   : > { %p5850_p5 = pnand %p4282_p2, %p257_p3  ;;  %s5750_s18 = smov [#allocation7]  }
  0x12   : > { %s270_s19 = sshll.u32 %s5750_s18, 4  ;;  %s6990_s3 = sld [smem:[#allocation33_spill]]  ;;  %s271_s19 = int_to_ptr.vmem [resolvable:$true] %s270_s19 }
  0x13   : > { %p4967_p6 = pneg %p5850_p5  ;;  %s5751_s24 = smov 192  }
  0x14   : > { %s5752_s25 = smov 12   ;;  %s5753_s26 = smov [#allocation8]  }
  0x15   : > { %p5858_p7 = pnand %p4967_p6, %p5835_p1  ;;  %s285_s27 = sshll.u32 %s5753_s26, 4  ;;  %s286_s27 = int_to_ptr.vmem [resolvable:$true] %s285_s27 }
  0x16   : > { %s268_s16 = sshll.u32 %s6987_s2, 4  ;;  %s6991_s4 = sld [smem:[#allocation34_spill]]  ;;  %s269_s16 = int_to_ptr.hbm [resolvable:$true] %s268_s16 }
  0x17   : > { %4970 = dma.hbm_to_vmem [thread:$0]  (!%p5858_p7), %s269_s16, 6144, %s271_s19, [#allocation6], %s5751_s24, %s5751_s24, %s5752_s25  }
  0x18   : > { %s283_s23 = sshll.u32 %s6990_s3, 4  ;;  %s5754_s21 = smov [#allocation10]   ;;  %s284_s23 = int_to_ptr.hbm [resolvable:$true] %s283_s23 }
  0x19   : > { %4973 = dma.hbm_to_vmem [thread:$0]  (!%p5858_p7), %s284_s23, 48, %s286_s27, [#allocation9]  }
  0x1a   : > { %s296_s22 = sshll.u32 %s5754_s21, 4  ;;  %s6992_s6 = sld [smem:[#allocation35_spill]]  ;;  %s297_s22 = int_to_ptr.vmem [resolvable:$true] %s296_s22 }
  0x1b   : > { %s6965_s25 = smov 128   ;;  %s6966_s26 = smov 8  }
  0x1c   : > { %s294_s18 = sshll.u32 %s6991_s4, 4  ;;  %s5757_s23 = smov [#allocation11]   ;;  %s295_s18 = int_to_ptr.hbm [resolvable:$true] %s294_s18 }
  0x1d   : > { %4976 = dma.hbm_to_vmem [thread:$0]  (!%p5858_p7), %s295_s18, 6144, %s297_s22, [#allocation9], %s6965_s25, %s6965_s25, %s6966_s26  }
  0x1e   : > { %s313_s27 = sshll.u32 %s5757_s23, 4  ;;  %s38_s14 = sadd.s32 1, %s5744_s9  ;;  %s314_s27 = int_to_ptr.vmem [resolvable:$true] %s313_s27 }
  0x1f   : > { %s47_s15 = sadd.s32 1, %s5736_s29  ;;  %p40_p8 = scmp.ge.s32.totalorder %s38_s14, 2 }
  0x20   : > { %s311_s24 = sshll.u32 %s6992_s6, 4  ;;  %p54_p9 = scmp.ne.s32.totalorder %s5736_s29, %s5732_s28  ;;  %s312_s24 = int_to_ptr.hbm [resolvable:$true] %s311_s24 }
  0x21   : > { %4979 = dma.hbm_to_vmem [thread:$0]  (!%p5858_p7), %s312_s24, 4096, %s314_s27, [#allocation12], %s6965_s25, %s6965_s25, %s6966_s26  }
  0x22   : > { %p55_p10 = scmp.eq.s32.totalorder %s5748_s10, 0  ;;  %p4991_p11 = scmp.lt.s32.totalorder %s5748_s10, 2 }
  0x23   : > { %s7038_s14 = smov (%p40_p8, %s38_s14), 0  ;;  %s330_s18 = sand.u32 1, %s5736_s29  }
  0x24   : > { %6993 = sst [smem:[#allocation19_spill]] %s7038_s14  ;;  %p56_p12 = por %p55_p10, %p54_p9 }
  0x25   : > { %s42_s21 = ssub.s32 %s5744_s9, %s7038_s14  ;;  %s4944_s20 = smul.u32 248, %s330_s18 }
  0x26   : > { %p45_p13 = scmp.eq.s32.totalorder %s42_s21, 0  ;;  %s4814_s22 = sshll.u32 %s5744_s9, 8 }
  0x27   : > { %p5897_p0 = pnand %p4991_p11, %p56_p12  ;;  %s349_s27 = scalar_lea.hbm %s6955_s0, %s4814_s22 }
  0x28   : > { %s5902_s19 = scalar_select %p45_p13, %s5736_s29, %s47_s15  }
  0x29   : > { %s351_s11 = sshll.u32 %s349_s27, 4  ;;  %s334_s25 = scalar_lea.vmem [#allocation3], %s4944_s20  ;;  %s352_s11 = int_to_ptr.hbm [resolvable:$true] %s351_s11 }
  0x2a   : > { %s353_s26 = sshll.u32 %s334_s25, 4  ;;  %s363_s21 = sand.u32 1, %s5748_s10   ;;  %s354_s26 = int_to_ptr.vmem [resolvable:$true] %s353_s26 }
  0x2b   : > { %s331_s2 = scalar_lea.sflag [#allocation4], %s330_s18  ;;  %s6995_s3 = smov 8  }
  0x2c   : > { %s6996_s4 = smov 128   ;;  %s4290_s6 = sshll.u32 %s330_s18, 3 }
  0x2d   : > { %4983 = dma.hbm_to_vmem [thread:$0]  (!%p5897_p0), %s352_s11, 3968, %s354_s26, %s331_s2, %s6996_s4, %s6996_s4, %s6995_s3  }
  0x2e   : > { %s4169_s9 = scalar_lea.hbm %s6956_s1, %s4814_s22  ;;  %s367_s23 = scalar_lea.vmem [#allocation5], %s4290_s6 }
  0x2f   : > { %s4170_s24 = scalar_lea.hbm %s4169_s9, 248  ;;  %s380_s27 = sshll.u32 %s367_s23, 4  ;;  %s381_s27 = int_to_ptr.vmem [resolvable:$true] %s380_s27 }
  0x30   : > { %s378_s20 = sshll.u32 %s4170_s24, 4  ;;  %s364_s25 = scalar_lea.sflag [#allocation6], %s363_s21  ;;  %s379_s20 = int_to_ptr.hbm [resolvable:$true] %s378_s20 }
  0x31   : > { %4986 = dma.hbm_to_vmem [thread:$0]  (!%p5897_p0), %s379_s20, 128, %s381_s27, %s364_s25  }
  0x32   : > { %389 = sbr.rel (%p5850_p5) target bundleno = 1275 (0x4fb), region = 52 }
  0x37   : > { %s391_s2 = sand.u32 1, %s5732_s28  }
  0x38   : > { %s4945_s3 = smul.u32 248, %s391_s2  ;;  %s392_s4 = scalar_lea.sflag [#allocation4], %s391_s2 }
  0x3a   : > { %s5921_s11 = scalar_lea.vmem [#allocation3], %s4945_s3 }
  0x3b   : > { %5707 = dma.done.wait (%p5843_p4), %s392_s4, 3968  }
  0x3c   : > { %5709 = vsyncadd (%p5843_p4), %s392_s4, 4294963328  ;;  %s6997_s6 = sadd.s32 4294967295, %s5748_s10   ;;  %s4294_s26 = sshll.u32 %s391_s2, 3 }
  0x3d   : > { %s401_s9 = sand.u32 1, %s6997_s6   ;;  %s5929_s17 = scalar_lea.vmem [#allocation5], %s4294_s26 }
  0x3e   : > { %s402_s14 = scalar_lea.sflag [#allocation6], %s401_s9 }
  0x3f   : > { %5711 = dma.done.wait (%p5843_p4), %s402_s14, 128  }
  0x40   : > { %5713 = vsyncadd (%p5843_p4), %s402_s14, 4294967168 }
  0x41   : > { %5715 = dma.done.wait (%p5835_p1), [#allocation6], 6144  }
  0x42   : > { %5717 = vsyncadd (%p5835_p1), [#allocation6], 4294961152 }
  0x43   : > { %5719 = dma.done.wait (%p5835_p1), [#allocation9], 6192  }
  0x44   : > { %5721 = vsyncadd (%p5835_p1), [#allocation9], 4294961104 }
  0x45   : > { %5723 = dma.done.wait (%p5835_p1), [#allocation12], 4096  }
  0x46   : > { %5725 = vsyncadd (%p5835_p1), [#allocation12], 4294963200  ;;  %v4386_v0 = vld [vmem:[#allocation7 + $0xa8] sm:$0xf]  ;;  %v4838_v1 = vld [vmem:[#allocation7 + $0xb0] sm:$0xf0] }
  0x47   : > { %v4482_v2 = vld [vmem:[#allocation7 + $0x168] sm:$0xf]  ;;  %v4387_v3 = vor.u32 %v4838_v1, %v4386_v0  ;;  %v4862_v4 = vld [vmem:[#allocation7 + $0x170] sm:$0xf0]  ;;  %v4837_v5 = vld [vmem:[#allocation7 + $0xac] sm:$0xf] }
  0x48   : > { %v4388_v6 = vld [vmem:[#allocation7 + $0xb4] sm:$0xf0]  ;;  %v4483_v7 = vor.u32 %v4862_v4, %v4482_v2  ;;  %v4861_v9 = vld [vmem:[#allocation7 + $0x16c] sm:$0xf]  ;;  %v4374_v11 = vld [vmem:[#allocation7 + $0x90] sm:$0xf] }
  0x49   : > { %v4391_v8 = vor.u32 %v4837_v5, %v4388_v6  ;;  %v4484_v10 = vld [vmem:[#allocation7 + $0x174] sm:$0xf0]  ;;  %1072 = vmatpush.bf16.msra.mxu0 %v4387_v3  ;;  %v4835_v13 = vld [vmem:[#allocation7 + $0x98] sm:$0xf0]  ;;  %v4470_v14 = vld [vmem:[#allocation7 + $0x150] sm:$0xf] }
  0x4a   : > { %v4487_v12 = vor.u32 %v4861_v9, %v4484_v10  ;;  %v4859_v15 = vld [vmem:[#allocation7 + $0x158] sm:$0xf0]  ;;  %1161 = vmatpush.bf16.msra.mxu1 %v4483_v7  ;;  %v4375_v16 = vor.u32 %v4835_v13, %v4374_v11  ;;  %v4834_v18 = vld [vmem:[#allocation7 + $0x94] sm:$0xf]  ;;  %v4376_v19 = vld [vmem:[#allocation7 + $0x9c] sm:$0xf0] }
  0x4b   : > { %1250 = vmatpush.bf16.msra.mxu2 %v4391_v8  ;;  %v4471_v17 = vor.u32 %v4859_v15, %v4470_v14  ;;  %v4858_v20 = vld [vmem:[#allocation7 + $0x154] sm:$0xf]  ;;  %v4379_v21 = vor.u32 %v4834_v18, %v4376_v19  ;;  %v4472_v22 = vld [vmem:[#allocation7 + $0x15c] sm:$0xf0]  ;;  %v4362_v23 = vld [vmem:[#allocation7 + $0x78] sm:$0xf] }
  0x4c   : > { %1339 = vmatpush.bf16.msra.mxu3 %v4487_v12  ;;  %v4832_v24 = vld [vmem:[#allocation7 + $0x80] sm:$0xf0]  ;;  %v4475_v25 = vor.u32 %v4858_v20, %v4472_v22  ;;  %v4458_v26 = vld [vmem:[#allocation7 + $0x138] sm:$0xf]  ;;  %v4831_v28 = vld [vmem:[#allocation7 + $0x7c] sm:$0xf] }
  0x4d   : > { %v4856_v27 = vld [vmem:[#allocation7 + $0x140] sm:$0xf0]  ;;  %1073 = vmatpush.bf16.msra.mxu0 %v4375_v16  ;;  %v4363_v29 = vor.u32 %v4832_v24, %v4362_v23  ;;  %v4364_v30 = vld [vmem:[#allocation7 + $0x84] sm:$0xf0]  ;;  %v4855_v31 = vld [vmem:[#allocation7 + $0x13c] sm:$0xf] }
  0x4e   : > { %v4460_v32 = vld [vmem:[#allocation7 + $0x144] sm:$0xf0]  ;;  %1162 = vmatpush.bf16.msra.mxu1 %v4471_v17  ;;  %v4459_v33 = vor.u32 %v4856_v27, %v4458_v26  ;;  %v4367_v34 = vor.u32 %v4831_v28, %v4364_v30  ;;  %v4350_v35 = vld [vmem:[#allocation7 + $0x60] sm:$0xf]  ;;  %v4829_v36 = vld [vmem:[#allocation7 + $0x68] sm:$0xf0] }
  0x4f   : > { %1251 = vmatpush.bf16.msra.mxu2 %v4379_v21  ;;  %v4446_v37 = vld [vmem:[#allocation7 + $0x120] sm:$0xf]  ;;  %v4463_v38 = vor.u32 %v4855_v31, %v4460_v32  ;;  %v4853_v39 = vld [vmem:[#allocation7 + $0x128] sm:$0xf0]  ;;  %v4828_v40 = vld [vmem:[#allocation7 + $0x64] sm:$0xf]  ;;  %v4351_v44 = vor.u32 %v4829_v36, %v4350_v35 }
  0x50   : > { %1340 = vmatpush.bf16.msra.mxu3 %v4475_v25  ;;  %v4352_v41 = vld [vmem:[#allocation7 + $0x6c] sm:$0xf0]  ;;  %v4852_v42 = vld [vmem:[#allocation7 + $0x124] sm:$0xf]  ;;  %v4447_v45 = vor.u32 %v4853_v39, %v4446_v37  ;;  %v4338_v47 = vld [vmem:[#allocation7 + $0x48] sm:$0xf] }
  0x51   : > { %v4448_v43 = vld [vmem:[#allocation7 + $0x12c] sm:$0xf0]  ;;  %1074 = vmatpush.bf16.msra.mxu0 %v4363_v29  ;;  %v4355_v46 = vor.u32 %v4828_v40, %v4352_v41  ;;  %v4826_v48 = vld [vmem:[#allocation7 + $0x50] sm:$0xf0]  ;;  %v4434_v49 = vld [vmem:[#allocation7 + $0x108] sm:$0xf] }
  0x52   : > { %1163 = vmatpush.bf16.msra.mxu1 %v4459_v33  ;;  %v4451_v50 = vor.u32 %v4852_v42, %v4448_v43  ;;  %v4850_v51 = vld [vmem:[#allocation7 + $0x110] sm:$0xf0]  ;;  %v4825_v52 = vld [vmem:[#allocation7 + $0x4c] sm:$0xf]  ;;  %v4340_v53 = vld [vmem:[#allocation7 + $0x54] sm:$0xf0]  ;;  %v4339_v56 = vor.u32 %v4826_v48, %v4338_v47 }
  0x53   : > { %1252 = vmatpush.bf16.msra.mxu2 %v4367_v34  ;;  %v4849_v54 = vld [vmem:[#allocation7 + $0x10c] sm:$0xf]  ;;  %v4436_v55 = vld [vmem:[#allocation7 + $0x114] sm:$0xf0]  ;;  %v4435_v57 = vor.u32 %v4850_v51, %v4434_v49  ;;  %v4343_v58 = vor.u32 %v4825_v52, %v4340_v53  ;;  %v4326_v59 = vld [vmem:[#allocation7 + $0x30] sm:$0xf] }
  0x54   : > { %1341 = vmatpush.bf16.msra.mxu3 %v4463_v38  ;;  %v4823_v60 = vld [vmem:[#allocation7 + $0x38] sm:$0xf0]  ;;  %v4422_v61 = vld [vmem:[#allocation7 + $0xf0] sm:$0xf]  ;;  %v4439_v62 = vor.u32 %v4849_v54, %v4436_v55  ;;  %v4822_v0 = vld [vmem:[#allocation7 + $0x34] sm:$0xf] }
  0x55   : > { %1075 = vmatpush.bf16.msra.mxu0 %v4351_v44  ;;  %v4847_v63 = vld [vmem:[#allocation7 + $0xf8] sm:$0xf0]  ;;  %v4328_v1 = vld [vmem:[#allocation7 + $0x3c] sm:$0xf0]  ;;  %v4846_v2 = vld [vmem:[#allocation7 + $0xf4] sm:$0xf]  ;;  %v4327_v4 = vor.u32 %v4823_v60, %v4326_v59 }
  0x56   : > { %1164 = vmatpush.bf16.msra.mxu1 %v4447_v45  ;;  %v4424_v3 = vld [vmem:[#allocation7 + $0xfc] sm:$0xf0]  ;;  %v4314_v5 = vld [vmem:[#allocation7 + $0x18] sm:$0xf]  ;;  %v4820_v6 = vld [vmem:[#allocation7 + $0x20] sm:$0xf0]  ;;  %v4423_v7 = vor.u32 %v4847_v63, %v4422_v61  ;;  %v4331_v8 = vor.u32 %v4822_v0, %v4328_v1 }
  0x57   : > { %1253 = vmatpush.bf16.msra.mxu2 %v4355_v46  ;;  %v4410_v9 = vld [vmem:[#allocation7 + $0xd8] sm:$0xf]  ;;  %v4844_v10 = vld [vmem:[#allocation7 + $0xe0] sm:$0xf0]  ;;  %v4819_v11 = vld [vmem:[#allocation7 + $0x1c] sm:$0xf]  ;;  %v4427_v12 = vor.u32 %v4846_v2, %v4424_v3  ;;  %v4315_v20 = vor.u32 %v4820_v6, %v4314_v5 }
  0x58   : > { %1342 = vmatpush.bf16.msra.mxu3 %v4451_v50  ;;  %v4316_v13 = vld [vmem:[#allocation7 + $0x24] sm:$0xf0]  ;;  %v488_v14 = vld [vmem:[%s5921_s11] sm:$0xff]  ;;  %v4817_v22 = vld [vmem:[#allocation7 + $0x8] sm:$0xf0]  ;;  %v4411_v25 = vor.u32 %v4844_v10, %v4410_v9  ;;  %p478_p1 = scmp.lt.s32.totalorder %s5740_s30, 1 }
  0x59   : > { %1076 = vmatpush.bf16.msra.mxu0 %v4339_v56  ;;  %v489_v15 = vld [vmem:[%s5921_s11 + $0x8] sm:$0xff]  ;;  %v4843_v16 = vld [vmem:[#allocation7 + $0xdc] sm:$0xf]  ;;  %v584_v18 = vunpack.c.l.bf16 %v488_v14  ;;  %v585_v23 = vunpack.c.h.bf16 %v488_v14  ;;  %v4319_v26 = vor.u32 %v4819_v11, %v4316_v13  ;;  %v4304_v31 = vld [vmem:[#allocation7 + $0xc] sm:$0xf0]  ;;  %vm4014_vm0 = vcmask 1043456  }
  0x5a   : > { %1165 = vmatpush.bf16.msra.mxu1 %v4435_v57  ;;  %v4412_v17 = vld [vmem:[#allocation7 + $0xe4] sm:$0xf0]  ;;  %v586_v19 = vunpack.c.l.bf16 %v489_v15  ;;  %v4302_v21 = vld [vmem:[#allocation7] sm:$0xf]  ;;  %v587_v24 = vunpack.c.h.bf16 %v489_v15  ;;  %v4841_v28 = vld [vmem:[#allocation7 + $0xc8] sm:$0xf0] }
  0x5b   : > { %1254 = vmatpush.bf16.msra.mxu2 %v4343_v58  ;;  %v4398_v27 = vld [vmem:[#allocation7 + $0xc0] sm:$0xf]  ;;  %v4816_v29 = vld [vmem:[#allocation7 + $0x4] sm:$0xf]  ;;  %v4415_v30 = vor.u32 %v4843_v16, %v4412_v17  ;;  %v4400_v33 = vld [vmem:[#allocation7 + $0xcc] sm:$0xf0]  ;;  %v4303_v38 = vor.u32 %v4817_v22, %v4302_v21 }
  0x5c   : > { %1343 = vmatpush.bf16.msra.mxu3 %v4439_v62  ;;  %v4840_v32 = vld [vmem:[#allocation7 + $0xc4] sm:$0xf]  ;;  %v648_v34 = vmax.f32 %v584_v18, 0.0  ;;  %v650_v35 = vmax.f32 %v586_v19, 0.0  ;;  %v4550_v36 = vld [vmem:[#allocation10 + $0x70] sm:$0xf]  ;;  %v4399_v43 = vor.u32 %v4841_v28, %v4398_v27  ;;  %v4307_v44 = vor.u32 %v4816_v29, %v4304_v31 }
  0x5d   : > { %1077 = vmatpush.bf16.msra.mxu0 %v4327_v4  ;;  %v4879_v37 = vld [vmem:[#allocation10 + $0x74] sm:$0xf0]  ;;  %v649_v39 = vmax.f32 %v585_v23, 0.0  ;;  %v651_v40 = vmax.f32 %v587_v24, 0.0  ;;  %v4614_v41 = vld [vmem:[#allocation10 + $0xf0] sm:$0xf]  ;;  %v4403_v45 = vor.u32 %v4840_v32, %v4400_v33 }
  0x5e   : > { %1166 = vmatpush.bf16.msra.mxu1 %v4423_v7  ;;  %v4895_v42 = vld [vmem:[#allocation10 + $0xf4] sm:$0xf0]  ;;  %v4551_v46 = vor.u32 %v4879_v37, %v4550_v36  ;;  %v4394_v47 = vld [vmem:[#allocation7 + $0xb0] sm:$0xf]  ;;  %v5949_v49 = vpack.c.bf16 %v650_v35, %v648_v34  ;;  %v4542_v58 = vld [vmem:[#allocation10 + $0x60] sm:$0xf] }
  0x5f   : > { %1255 = vmatpush.bf16.msra.mxu2 %v4331_v8  ;;  %v4839_v48 = vld [vmem:[#allocation7 + $0xb8] sm:$0xf0]  ;;  %v4615_v50 = vor.u32 %v4895_v42, %v4614_v41  ;;  %v4490_v51 = vld [vmem:[#allocation7 + $0x170] sm:$0xf]  ;;  %v5951_v53 = vpack.c.bf16 %v651_v40, %v649_v39  ;;  %v4877_v59 = vld [vmem:[#allocation10 + $0x64] sm:$0xf0] }
  0x60   : > { %1344 = vmatpush.bf16.msra.mxu3 %v4427_v12  ;;  %v4863_v52 = vld [vmem:[#allocation7 + $0x178] sm:$0xf0]  ;;  %v4395_v54 = vor.u32 %v4839_v48, %v4394_v47  ;;  %v490_v56 = vld [vmem:[%s5921_s11 + $0x10] sm:$0xff]  ;;  %v4606_v60 = vld [vmem:[#allocation10 + $0xe0] sm:$0xf]  ;;  %v4543_v61 = vor.u32 %v4877_v59, %v4542_v58  ;;  %s7040_s30 = smov (!%p478_p1, %s5740_s30), 1 }
  0x61   : > { %1078 = vmatpush.bf16.msra.mxu0 %v4315_v20  ;;  %v4491_v55 = vor.u32 %v4863_v52, %v4490_v51  ;;  %v491_v57 = vld [vmem:[%s5921_s11 + $0x18] sm:$0xff]  ;;  %v4893_v62 = vld [vmem:[#allocation10 + $0xe4] sm:$0xf0]  ;;  %v4836_v0 = vld [vmem:[#allocation7 + $0xa0] sm:$0xf0]  ;;  %v588_v1 = vunpack.c.l.bf16 %v490_v56  ;;  %v589_v7 = vunpack.c.h.bf16 %v490_v56  ;;  %s4946_s15 = smul.u32 248, %s7040_s30 }
  0x62   : > { %1167 = vmatpush.bf16.msra.mxu1 %v4411_v25  ;;  %v4382_v63 = vld [vmem:[#allocation7 + $0x98] sm:$0xf]  ;;  %v590_v2 = vunpack.c.l.bf16 %v491_v57  ;;  %v4607_v3 = vor.u32 %v4893_v62, %v4606_v60  ;;  %v4860_v6 = vld [vmem:[#allocation7 + $0x160] sm:$0xf0]  ;;  %v591_v8 = vunpack.c.h.bf16 %v491_v57  ;;  %v494_v28 = vld [vmem:[%s5921_s11 + $0x30] sm:$0xff]  ;;  %vm4017_vm2 = vcmask 1047556  }
  0x63   : > { %1256 = vmatpush.bf16.msra.mxu2 %v4319_v26  ;;  %v4383_v4 = vor.u32 %v4836_v0, %v4382_v63  ;;  %v4478_v5 = vld [vmem:[#allocation7 + $0x158] sm:$0xf]  ;;  %v652_v10 = vmax.f32 %v588_v1, 0.0  ;;  %v653_v12 = vmax.f32 %v589_v7, 0.0  ;;  %v493_v17 = vld [vmem:[%s5921_s11 + $0x28] sm:$0xff]  ;;  %v596_v37 = vunpack.c.l.bf16 %v494_v28  ;;  %s6726_s27 = scalar_lea.vmem %s6963_s8, %s4946_s15 }
  0x64   : > { %1345 = vmatpush.bf16.msra.mxu3 %v4415_v30  ;;  %v4479_v9 = vor.u32 %v4860_v6, %v4478_v5  ;;  %v654_v11 = vmax.f32 %v590_v2, 0.0  ;;  %v655_v13 = vmax.f32 %v591_v8, 0.0  ;;  %v492_v16 = vld [vmem:[%s5921_s11 + $0x20] sm:$0xff]  ;;  %v594_v19 = vunpack.c.l.bf16 %v493_v17  ;;  %v495_v29 = vld [vmem:[%s5921_s11 + $0x38] sm:$0xff]  ;;  %v4833_v36 = vld [vmem:[#allocation7 + $0x88] sm:$0xf0] }
  0x65   : > { %1079 = vmatpush.bf16.msra.mxu0 %v4303_v38  ;;  %v592_v18 = vunpack.c.l.bf16 %v492_v16  ;;  %v593_v20 = vunpack.c.h.bf16 %v492_v16  ;;  %v595_v21 = vunpack.c.h.bf16 %v493_v17  ;;  %v4534_v30 = vld [vmem:[#allocation10 + $0x50] sm:$0xf]  ;;  %v4875_v31 = vld [vmem:[#allocation10 + $0x54] sm:$0xf0]  ;;  %v4370_v35 = vld [vmem:[#allocation7 + $0x80] sm:$0xf]  ;;  %v598_v38 = vunpack.c.l.bf16 %v495_v29 }
  0x66   : > { %1168 = vmatpush.bf16.msra.mxu1 %v4399_v43  ;;  %v5959_v14 = vpack.c.bf16 %v654_v11, %v652_v10  ;;  %v5961_v15 = vpack.c.bf16 %v655_v13, %v653_v12  ;;  %v658_v23 = vmax.f32 %v594_v19, 0.0  ;;  %v4598_v32 = vld [vmem:[#allocation10 + $0xd0] sm:$0xf]  ;;  %v4535_v33 = vor.u32 %v4875_v31, %v4534_v30  ;;  %v4891_v34 = vld [vmem:[#allocation10 + $0xd4] sm:$0xf0]  ;;  %v501_v31 = vld [vmem:[%s5921_s11 + $0x68] sm:$0xff] }
  0x67   : > { %1257 = vmatpush.bf16.msra.mxu2 %v4307_v44  ;;  %v656_v22 = vmax.f32 %v592_v18, 0.0  ;;  %v657_v24 = vmax.f32 %v593_v20, 0.0  ;;  %v659_v25 = vmax.f32 %v595_v21, 0.0  ;;  %v4599_v39 = vor.u32 %v4891_v34, %v4598_v32  ;;  %v4466_v41 = vld [vmem:[#allocation7 + $0x140] sm:$0xf]  ;;  %v498_v2 = vld [vmem:[%s5921_s11 + $0x50] sm:$0xff] }
  0x68   : > { %1346 = vmatpush.bf16.msra.mxu3 %v4403_v45  ;;  %1080 = vmatmul.bf16.vlgmr.msra.gmra.mxu0 %v5949_v49  ;;  %v4371_v40 = vor.u32 %v4833_v36, %v4370_v35  ;;  %v4857_v42 = vld [vmem:[#allocation7 + $0x148] sm:$0xf0]  ;;  %v597_v43 = vunpack.c.h.bf16 %v494_v28  ;;  %v599_v44 = vunpack.c.h.bf16 %v495_v29  ;;  %v662_v47 = vmax.f32 %v598_v38, 0.0  ;;  %v4590_v6 = vld [vmem:[#allocation10 + $0xc0] sm:$0xf] }
  0x69   : > { %1169 = vmatmul.bf16.vlgmr.msra.gmra.mxu1 %v5951_v53  ;;  %1428 = vmatpush.bf16.msrb.mxu0 %v4395_v54  ;;  %v5969_v26 = vpack.c.bf16 %v658_v23, %v656_v22  ;;  %v5971_v27 = vpack.c.bf16 %v659_v25, %v657_v24  ;;  %v4467_v45 = vor.u32 %v4857_v42, %v4466_v41  ;;  %v496_v54 = vld [vmem:[%s5921_s11 + $0x40] sm:$0xff]  ;;  %v4873_v5 = vld [vmem:[#allocation10 + $0x44] sm:$0xf0]  ;;  %v4830_v10 = vld [vmem:[#allocation7 + $0x70] sm:$0xf0]  ;;  %v604_v11 = vunpack.c.l.bf16 %v498_v2 }
  0x6a   : > { %1258 = vmatmul.bf16.vlgmr.msra.gmra.mxu2 %v5949_v49  ;;  %1517 = vmatpush.bf16.msrb.mxu1 %v4491_v55  ;;  %v661_v48 = vmax.f32 %v597_v43, 0.0  ;;  %v497_v55 = vld [vmem:[%s5921_s11 + $0x48] sm:$0xff]  ;;  %v600_v56 = vunpack.c.l.bf16 %v496_v54  ;;  %v601_v58 = vunpack.c.h.bf16 %v496_v54  ;;  %v4854_v18 = vld [vmem:[#allocation7 + $0x130] sm:$0xf0]  ;;  %v605_v19 = vunpack.c.h.bf16 %v498_v2  ;;  %v500_v30 = vld [vmem:[%s5921_s11 + $0x60] sm:$0xff] }
  0x6b   : > { %2044 = vmatpush.bf16.msrb.mxu2 %v4551_v46  ;;  %1347 = vmatmul.bf16.vlgmr.msra.gmra.mxu3 %v5951_v53  ;;  %v660_v46 = vmax.f32 %v596_v37, 0.0  ;;  %v602_v57 = vunpack.c.l.bf16 %v497_v55  ;;  %v603_v59 = vunpack.c.h.bf16 %v497_v55  ;;  %v4889_v8 = vld [vmem:[#allocation10 + $0xc4] sm:$0xf0]  ;;  %v4454_v17 = vld [vmem:[#allocation7 + $0x128] sm:$0xf]  ;;  %v668_v22 = vmax.f32 %v604_v11, 0.0 }
  0x6c   : > { %2133 = vmatpush.bf16.msrb.mxu3 %v4615_v50  ;;  %v663_v50 = vmax.f32 %v599_v44, 0.0  ;;  %v664_v60 = vmax.f32 %v600_v56, 0.0  ;;  %v665_v62 = vmax.f32 %v601_v58, 0.0  ;;  %v4591_v13 = vor.u32 %v4889_v8, %v4590_v6  ;;  %v502_v42 = vld [vmem:[%s5921_s11 + $0x70] sm:$0xff]  ;;  %v503_v43 = vld [vmem:[%s5921_s11 + $0x78] sm:$0xff]  ;;  %v504_v8 = vld [vmem:[%s5921_s11 + $0x80] sm:$0xff] }
  0x6d   : > { %1429 = vmatpush.bf16.msrb.mxu0 %v4383_v4  ;;  %v5979_v51 = vpack.c.bf16 %v662_v47, %v660_v46  ;;  %v667_v63 = vmax.f32 %v603_v59, 0.0  ;;  %v4526_v4 = vld [vmem:[#allocation10 + $0x40] sm:$0xf]  ;;  %v4455_v21 = vor.u32 %v4854_v18, %v4454_v17  ;;  %v669_v24 = vmax.f32 %v605_v19, 0.0  ;;  %v4518_v44 = vld [vmem:[#allocation10 + $0x30] sm:$0xf] }
  0x6e   : > { %1518 = vmatpush.bf16.msrb.mxu1 %v4479_v9  ;;  %v5981_v52 = vpack.c.bf16 %v663_v50, %v661_v48  ;;  %v4527_v7 = vor.u32 %v4873_v5, %v4526_v4  ;;  %v4358_v9 = vld [vmem:[#allocation7 + $0x68] sm:$0xf]  ;;  %v608_v32 = vunpack.c.l.bf16 %v500_v30  ;;  %v609_v34 = vunpack.c.h.bf16 %v500_v30  ;;  %v4582_v46 = vld [vmem:[#allocation10 + $0xb0] sm:$0xf]  ;;  %v4887_v48 = vld [vmem:[#allocation10 + $0xb4] sm:$0xf0] }
  0x6f   : > { %2045 = vmatpush.bf16.msrb.mxu2 %v4543_v61  ;;  %v666_v61 = vmax.f32 %v602_v57, 0.0  ;;  %v5991_v1 = vpack.c.bf16 %v667_v63, %v665_v62  ;;  %v4359_v16 = vor.u32 %v4830_v10, %v4358_v9  ;;  %v611_v35 = vunpack.c.h.bf16 %v501_v31  ;;  %v4346_v62 = vld [vmem:[#allocation7 + $0x50] sm:$0xf]  ;;  %v4827_v63 = vld [vmem:[#allocation7 + $0x58] sm:$0xf0]  ;;  %v505_v9 = vld [vmem:[%s5921_s11 + $0x88] sm:$0xff] }
  0x70   : > { %2134 = vmatpush.bf16.msrb.mxu3 %v4607_v3  ;;  %v499_v3 = vld [vmem:[%s5921_s11 + $0x58] sm:$0xff]  ;;  %v672_v36 = vmax.f32 %v608_v32, 0.0  ;;  %v673_v38 = vmax.f32 %v609_v34, 0.0  ;;  %v612_v50 = vunpack.c.l.bf16 %v502_v42  ;;  %v614_v54 = vunpack.c.l.bf16 %v503_v43 }
  0x71   : > { %1430 = vmatpush.bf16.msrb.mxu0 %v4371_v40  ;;  %v5989_v0 = vpack.c.bf16 %v666_v61, %v664_v60  ;;  %v606_v12 = vunpack.c.l.bf16 %v499_v3  ;;  %v607_v20 = vunpack.c.h.bf16 %v499_v3  ;;  %v4583_v55 = vor.u32 %v4887_v48, %v4582_v46  ;;  %v4442_v2 = vld [vmem:[#allocation7 + $0x110] sm:$0xf]  ;;  %v4851_v4 = vld [vmem:[#allocation7 + $0x118] sm:$0xf0] }
  0x72   : > { %1519 = vmatpush.bf16.msrb.mxu1 %v4467_v45  ;;  %v4871_v45 = vld [vmem:[#allocation10 + $0x34] sm:$0xf0]  ;;  %v613_v56 = vunpack.c.h.bf16 %v502_v42  ;;  %v615_v57 = vunpack.c.h.bf16 %v503_v43  ;;  %v676_v58 = vmax.f32 %v612_v50, 0.0  ;;  %v678_v59 = vmax.f32 %v614_v54, 0.0 }
  0x73   : > { %2046 = vmatpush.bf16.msrb.mxu2 %v4535_v33  ;;  %v670_v23 = vmax.f32 %v606_v12, 0.0  ;;  %v671_v25 = vmax.f32 %v607_v20, 0.0  ;;  %v610_v33 = vunpack.c.l.bf16 %v501_v31  ;;  %v4519_v47 = vor.u32 %v4871_v45, %v4518_v44  ;;  %v507_v34 = vld [vmem:[%s5921_s11 + $0x98] sm:$0xff] }
  0x74   : > { %2135 = vmatpush.bf16.msrb.mxu3 %v4599_v39  ;;  %v675_v39 = vmax.f32 %v611_v35, 0.0  ;;  %v677_v60 = vmax.f32 %v613_v56, 0.0  ;;  %v679_v61 = vmax.f32 %v615_v57, 0.0  ;;  %v4347_v3 = vor.u32 %v4827_v63, %v4346_v62  ;;  %v4510_v35 = vld [vmem:[#allocation10 + $0x20] sm:$0xf] }
  0x75   : > { %1431 = vmatpush.bf16.msrb.mxu0 %v4359_v16  ;;  %v5999_v28 = vpack.c.bf16 %v670_v23, %v668_v22  ;;  %v6001_v29 = vpack.c.bf16 %v671_v25, %v669_v24  ;;  %v674_v37 = vmax.f32 %v610_v33, 0.0  ;;  %v6019_v5 = vpack.c.bf16 %v678_v59, %v676_v58  ;;  %v808_v16 = vld [vmem:[#allocation8] sm:$0x7]  ;;  %v506_v33 = vld [vmem:[%s5921_s11 + $0x90] sm:$0xff]  ;;  %v4334_v63 = vld [vmem:[#allocation7 + $0x38] sm:$0xf] }
  0x76   : > { %1520 = vmatpush.bf16.msrb.mxu1 %v4455_v21  ;;  %v6011_v41 = vpack.c.bf16 %v675_v39, %v673_v38  ;;  %v4443_v6 = vor.u32 %v4851_v4, %v4442_v2  ;;  %v616_v10 = vunpack.c.l.bf16 %v504_v8  ;;  %v618_v11 = vunpack.c.l.bf16 %v505_v9  ;;  %v4885_v39 = vld [vmem:[#allocation10 + $0xa4] sm:$0xf0]  ;;  %v4824_v2 = vld [vmem:[#allocation7 + $0x40] sm:$0xf0] }
  0x77   : > { %2047 = vmatpush.bf16.msrb.mxu2 %v4527_v7  ;;  %v6009_v40 = vpack.c.bf16 %v674_v37, %v672_v36  ;;  %v6021_v7 = vpack.c.bf16 %v679_v61, %v677_v60  ;;  %v617_v12 = vunpack.c.h.bf16 %v504_v8  ;;  %v6029_v21 = vperm.slane %v808_v16, 0  ;;  %v4869_v36 = vld [vmem:[#allocation10 + $0x24] sm:$0xf0]  ;;  %v4574_v37 = vld [vmem:[#allocation10 + $0xa0] sm:$0xf] }
  0x78   : > { %1085 = vmatmul.bf16.gmra.mxu0 %v5959_v14  ;;  %2136 = vmatpush.bf16.msrb.mxu3 %v4591_v13  ;;  %v619_v13 = vunpack.c.h.bf16 %v505_v9  ;;  %v680_v17 = vmax.f32 %v616_v10, 0.0  ;;  %v682_v18 = vmax.f32 %v618_v11, 0.0  ;;  %v6039_v32 = vperm.slane %v808_v16, 1 }
  0x79   : > { %1174 = vmatmul.bf16.gmra.mxu1 %v5961_v15  ;;  %1432 = vmatpush.bf16.msrb.mxu0 %v4347_v3  ;;  %v681_v19 = vmax.f32 %v617_v12, 0.0  ;;  %v4511_v38 = vor.u32 %v4869_v36, %v4510_v35  ;;  %v620_v43 = vunpack.c.l.bf16 %v506_v33  ;;  %v622_v44 = vunpack.c.l.bf16 %v507_v34  ;;  %v4430_v3 = vld [vmem:[#allocation7 + $0xf8] sm:$0xf] }
  0x7a   : > { %1263 = vmatmul.bf16.gmra.mxu2 %v5959_v14  ;;  %1521 = vmatpush.bf16.msrb.mxu1 %v4443_v6  ;;  %v683_v20 = vmax.f32 %v619_v13, 0.0  ;;  %v6031_v22 = vpack.c.bf16 %v682_v18, %v680_v17  ;;  %v4575_v45 = vor.u32 %v4885_v39, %v4574_v37  ;;  %v621_v50 = vunpack.c.h.bf16 %v506_v33  ;;  %v4848_v6 = vld [vmem:[#allocation7 + $0x100] sm:$0xf0] }
  0x7b   : > { %1352 = vmatmul.bf16.gmra.mxu3 %v5961_v15  ;;  %2048 = vmatpush.bf16.msrb.mxu2 %v4519_v47  ;;  %v623_v54 = vunpack.c.h.bf16 %v507_v34  ;;  %v684_v59 = vmax.f32 %v620_v43, 0.0  ;;  %v686_v60 = vmax.f32 %v622_v44, 0.0  ;;  %v4335_v4 = vor.u32 %v4824_v2, %v4334_v63 }
  0x7c   : > { %2137 = vmatpush.bf16.msrb.mxu3 %v4583_v55  ;;  %v6033_v24 = vpack.c.bf16 %v683_v20, %v681_v19  ;;  %v685_v61 = vmax.f32 %v621_v50, 0.0  ;;  %v4431_v10 = vor.u32 %v4848_v6, %v4430_v3  ;;  %vm4015_vm1 = vsmask.f32 3328 }
  0x7d   : > { %v687_v62 = vmax.f32 %v623_v54, 0.0  ;;  %v6046_v9 = vpack.c.bf16 %v686_v60, %v684_v59  ;;  %1433 = vmatpush.bf16.msrb.mxu0 %v4335_v4  ;;  %vm4018_vm3 = vsmask.f32 7424  ;;  %vm4016_vm4 = vmand %vm4014_vm0, %vm4015_vm1 }
  0x7e   : > { %1522 = vmatpush.bf16.msrb.mxu1 %v4431_v10  ;;  %vm4019_vm5 = vmand %vm4017_vm2, %vm4018_vm3 }
  0x7f   : > { %2049 = vmatpush.bf16.msrb.mxu2 %v4511_v38  ;;  %v6049_v16 = vpack.c.bf16 %v687_v62, %v685_v61  ;;  %vm6728_vm6 = vmor %vm4019_vm5, %vm4016_vm4 }
  0x80   : > { %2138 = vmatpush.bf16.msrb.mxu3 %v4575_v45 }
  0x88   : > { %1090 = vmatmul.bf16.gmra.mxu0 %v5969_v26 }
  0x89   : > { %1179 = vmatmul.bf16.gmra.mxu1 %v5971_v27 }
  0x8a   : > { %1268 = vmatmul.bf16.gmra.mxu2 %v5969_v26 }
  0x8b   : > { %1357 = vmatmul.bf16.gmra.mxu3 %v5971_v27 }
  0x98   : > { %1095 = vmatmul.bf16.gmra.mxu0 %v5979_v51 }
  0x99   : > { %1184 = vmatmul.bf16.gmra.mxu1 %v5981_v52 }
  0x9a   : > { %1273 = vmatmul.bf16.gmra.mxu2 %v5979_v51 }
  0x9b   : > { %1362 = vmatmul.bf16.gmra.mxu3 %v5981_v52 }
  0xa8   : > { %1100 = vmatmul.bf16.gmra.mxu0 %v5989_v0 }
  0xa9   : > { %1189 = vmatmul.bf16.gmra.mxu1 %v5991_v1 }
  0xaa   : > { %1278 = vmatmul.bf16.gmra.mxu2 %v5989_v0 }
  0xab   : > { %1367 = vmatmul.bf16.gmra.mxu3 %v5991_v1 }
  0xb8   : > { %1105 = vmatmul.bf16.gmra.mxu0 %v5999_v28 }
  0xb9   : > { %1194 = vmatmul.bf16.gmra.mxu1 %v6001_v29 }
  0xba   : > { %1283 = vmatmul.bf16.gmra.mxu2 %v5999_v28 }
  0xbb   : > { %1372 = vmatmul.bf16.gmra.mxu3 %v6001_v29 }
  0xc8   : > { %1110 = vmatmul.bf16.gmra.mxu0 %v6009_v40 }
  0xc9   : > { %1199 = vmatmul.bf16.gmra.mxu1 %v6011_v41 }
  0xca   : > { %1288 = vmatmul.bf16.gmra.mxu2 %v6009_v40 }
  0xcb   : > { %1377 = vmatmul.bf16.gmra.mxu3 %v6011_v41 }
  0xd8   : > { %1115 = vmatmul.bf16.gmra.mxu0 %v6019_v5 }
  0xd9   : > { %1204 = vmatmul.bf16.gmra.mxu1 %v6021_v7 }
  0xda   : > { %1293 = vmatmul.bf16.gmra.mxu2 %v6019_v5 }
  0xdb   : > { %1382 = vmatmul.bf16.gmra.mxu3 %v6021_v7 }
  0xe5   : > { %v1081_v23 = vpop.f32.mrf.mxu0 }
  0xe6   : > { %v1082_v25 = vadd.f32 %v1081_v23, %v6029_v21  ;;  %v1170_v30 = vpop.f32.mrf.mxu1 }
  0xe8   : > { %v1171_v31 = vadd.f32 %v1170_v30, %v1082_v25  ;;  %1120 = vmatmul.bf16.gmra.mxu0 %v6031_v22  ;;  %v508_v30 = vld [vmem:[%s5921_s11 + $0xa0] sm:$0xff] }
  0xe9   : > { %1209 = vmatmul.bf16.gmra.mxu1 %v6033_v24  ;;  %v624_v35 = vunpack.c.l.bf16 %v508_v30 }
  0xea   : > { %1298 = vmatmul.bf16.gmra.mxu2 %v6031_v22  ;;  %5052 = vtanh.f32 %v1171_v31  ;;  %v509_v31 = vld [vmem:[%s5921_s11 + $0xa8] sm:$0xff] }
  0xeb   : > { %1387 = vmatmul.bf16.gmra.mxu3 %v6033_v24  ;;  %v626_v36 = vunpack.c.l.bf16 %v509_v31  ;;  %v627_v43 = vunpack.c.h.bf16 %v509_v31  ;;  %v688_v54 = vmax.f32 %v624_v35, 0.0 }
  0xed   : > { %v1259_v42 = vpop.f32.mrf.mxu2  ;;  %v1083_v48 = vpop.f32.mrf.mxu0 }
  0xee   : > { %v1260_v46 = vadd.f32 %v1259_v42, %v6039_v32  ;;  %v1348_v47 = vpop.f32.mrf.mxu3  ;;  %v1084_v55 = vadd.f32 %v1083_v48, %v6029_v21  ;;  %v1172_v56 = vpop.f32.mrf.mxu1  ;;  %v625_v42 = vunpack.c.h.bf16 %v508_v30 }
  0xf0   : > { %v1349_v57 = vadd.f32 %v1348_v47, %v1260_v46  ;;  %v1173_v58 = vadd.f32 %v1172_v56, %v1084_v55  ;;  %v5053_v19 = vpop.eup %5052  ;;  %v690_v55 = vmax.f32 %v626_v36, 0.0 }
  0xf2   : > { %5054 = vtanh.f32 %v1173_v58  ;;  %v691_v58 = vmax.f32 %v627_v43, 0.0  ;;  %v6064_v60 = vpack.c.bf16 %v690_v55, %v688_v54 }
  0xf3   : > { %5056 = vtanh.f32 %v1349_v57  ;;  %v689_v57 = vmax.f32 %v625_v42, 0.0 }
  0xf5   : > { %v1261_v8 = vpop.f32.mrf.mxu2  ;;  %v1086_v13 = vpop.f32.mrf.mxu0  ;;  %v6067_v2 = vpack.c.bf16 %v691_v58, %v689_v57 }
  0xf6   : > { %v1262_v11 = vadd.f32 %v1261_v8, %v6039_v32  ;;  %v1350_v12 = vpop.f32.mrf.mxu3  ;;  %v1087_v17 = vadd.f32 %v1086_v13, %v6029_v21  ;;  %v1175_v18 = vpop.f32.mrf.mxu1  ;;  %v511_v13 = vld [vmem:[%s5921_s11 + $0xb8] sm:$0xff] }
  0xf7   : > { %v631_v42 = vunpack.c.h.bf16 %v511_v13 }
  0xf8   : > { %v1351_v20 = vadd.f32 %v1350_v12, %v1262_v11  ;;  %v5055_v23 = vpop.eup %5054  ;;  %v1176_v25 = vadd.f32 %v1175_v18, %v1087_v17  ;;  %1125 = vmatmul.bf16.gmra.mxu0 %v6046_v9  ;;  %v510_v12 = vld [vmem:[%s5921_s11 + $0xb0] sm:$0xff] }
  0xf9   : > { %1214 = vmatmul.bf16.gmra.mxu1 %v6049_v16  ;;  %v6057_v33 = vpack.c.bf16 %v5055_v23, %v5053_v19  ;;  %v5057_v44 = vpop.eup %5056  ;;  %v4502_v18 = vld [vmem:[#allocation10 + $0x10] sm:$0xf]  ;;  %v4867_v19 = vld [vmem:[#allocation10 + $0x14] sm:$0xf0]  ;;  %v628_v31 = vunpack.c.l.bf16 %v510_v12  ;;  %v695_v58 = vmax.f32 %v631_v42, 0.0 }
  0xfa   : > { %5058 = vtanh.f32 %v1351_v20  ;;  %1303 = vmatmul.bf16.gmra.mxu2 %v6046_v9  ;;  %v4566_v20 = vld [vmem:[#allocation10 + $0x90] sm:$0xf]  ;;  %v4503_v23 = vor.u32 %v4867_v19, %v4502_v18 }
  0xfb   : > { %1392 = vmatmul.bf16.gmra.mxu3 %v6049_v16  ;;  %5060 = vtanh.f32 %v1176_v25  ;;  %v4883_v25 = vld [vmem:[#allocation10 + $0x94] sm:$0xf0] }
  0xfc   : > { %v4567_v35 = vor.u32 %v4883_v25, %v4566_v20  ;;  %2050 = vmatpush.bf16.msrb.mxu2 %v4503_v23 }
  0xfd   : > { %v1264_v34 = vpop.f32.mrf.mxu2  ;;  %v1088_v39 = vpop.f32.mrf.mxu0 }
  0xfe   : > { %v1265_v37 = vadd.f32 %v1264_v34, %v6039_v32  ;;  %v1353_v38 = vpop.f32.mrf.mxu3  ;;  %v1089_v45 = vadd.f32 %v1088_v39, %v6029_v21  ;;  %v1177_v46 = vpop.f32.mrf.mxu1  ;;  %v630_v34 = vunpack.c.l.bf16 %v511_v13  ;;  %v629_v39 = vunpack.c.h.bf16 %v510_v12  ;;  %2139 = vmatpush.bf16.msrb.mxu3 %v4567_v35 }
 0x100   : > { %v5059_v47 = vpop.eup %5058  ;;  %v1354_v48 = vadd.f32 %v1353_v38, %v1265_v37  ;;  %v1178_v50 = vadd.f32 %v1177_v46, %v1089_v45  ;;  %v694_v54 = vmax.f32 %v630_v34, 0.0  ;;  %v693_v57 = vmax.f32 %v629_v39, 0.0  ;;  %v513_v34 = vld [vmem:[%s5921_s11 + $0xc8] sm:$0xff] }
 0x101   : > { %v6062_v56 = vpack.c.bf16 %v5059_v47, %v5057_v44  ;;  %v5061_v6 = vpop.eup %5060 }
 0x102   : > { %5062 = vtanh.f32 %v1178_v50  ;;  %v692_v50 = vmax.f32 %v628_v31, 0.0  ;;  %v6085_v18 = vpack.c.bf16 %v695_v58, %v693_v57  ;;  %v512_v31 = vld [vmem:[%s5921_s11 + $0xc0] sm:$0xff] }
 0x103   : > { %5064 = vtanh.f32 %v1354_v48 }
 0x105   : > { %v1266_v59 = vpop.f32.mrf.mxu2  ;;  %v1091_v63 = vpop.f32.mrf.mxu0 }
 0x106   : > { %v1267_v61 = vadd.f32 %v1266_v59, %v6039_v32  ;;  %v1355_v62 = vpop.f32.mrf.mxu3  ;;  %v1092_v3 = vadd.f32 %v1091_v63, %v6029_v21  ;;  %v1180_v4 = vpop.f32.mrf.mxu1  ;;  %v4322_v59 = vld [vmem:[#allocation7 + $0x20] sm:$0xf] }
 0x108   : > { %v1356_v8 = vadd.f32 %v1355_v62, %v1267_v61  ;;  %v5063_v10 = vpop.eup %5062  ;;  %v1181_v11 = vadd.f32 %v1180_v4, %v1092_v3  ;;  %1130 = vmatmul.bf16.gmra.mxu0 %v6064_v60  ;;  %v4821_v61 = vld [vmem:[#allocation7 + $0x28] sm:$0xf0]  ;;  %v4418_v62 = vld [vmem:[#allocation7 + $0xe0] sm:$0xf] }
 0x109   : > { %1219 = vmatmul.bf16.gmra.mxu1 %v6067_v2  ;;  %v6075_v17 = vpack.c.bf16 %v5063_v10, %v5061_v6  ;;  %v5065_v43 = vpop.eup %5064  ;;  %v4323_v63 = vor.u32 %v4821_v61, %v4322_v59  ;;  %v4845_v3 = vld [vmem:[#allocation7 + $0xe8] sm:$0xf0]  ;;  %v6082_v6 = vpack.c.bf16 %v694_v54, %v692_v50 }
 0x10a   : > { %5066 = vtanh.f32 %v1356_v8  ;;  %1308 = vmatmul.bf16.gmra.mxu2 %v6064_v60  ;;  %v4419_v8 = vor.u32 %v4845_v3, %v4418_v62 }
 0x10b   : > { %1397 = vmatmul.bf16.gmra.mxu3 %v6067_v2  ;;  %5068 = vtanh.f32 %v1181_v11  ;;  %1434 = vmatpush.bf16.msrb.mxu0 %v4323_v63 }
 0x10c   : > { %1523 = vmatpush.bf16.msrb.mxu1 %v4419_v8 }
 0x10d   : > { %v1269_v30 = vpop.f32.mrf.mxu2  ;;  %v1093_v38 = vpop.f32.mrf.mxu0 }
 0x10e   : > { %v1270_v36 = vadd.f32 %v1269_v30, %v6039_v32  ;;  %v1358_v37 = vpop.f32.mrf.mxu3  ;;  %v1094_v44 = vadd.f32 %v1093_v38, %v6029_v21  ;;  %v1182_v45 = vpop.f32.mrf.mxu1  ;;  %v634_v38 = vunpack.c.l.bf16 %v513_v34 }
 0x110   : > { %v5067_v46 = vpop.eup %5066  ;;  %v1359_v47 = vadd.f32 %v1358_v37, %v1270_v36  ;;  %v1183_v48 = vadd.f32 %v1182_v45, %v1094_v44  ;;  %v632_v37 = vunpack.c.l.bf16 %v512_v31  ;;  %v633_v44 = vunpack.c.h.bf16 %v512_v31  ;;  %v514_v31 = vld [vmem:[%s5921_s11 + $0xd0] sm:$0xff] }
 0x111   : > { %v6080_v55 = vpack.c.bf16 %v5067_v46, %v5065_v43  ;;  %v5069_v20 = vpop.eup %5068  ;;  %v635_v45 = vunpack.c.h.bf16 %v513_v34  ;;  %v698_v59 = vmax.f32 %v634_v38, 0.0  ;;  %v515_v34 = vld [vmem:[%s5921_s11 + $0xd8] sm:$0xff]  ;;  %v4865_v38 = vld [vmem:[#allocation10 + $0x4] sm:$0xf0] }
 0x112   : > { %5070 = vtanh.f32 %v1183_v48  ;;  %v696_v58 = vmax.f32 %v632_v37, 0.0  ;;  %v697_v62 = vmax.f32 %v633_v44, 0.0  ;;  %v4494_v37 = vld [vmem:[#allocation10] sm:$0xf] }
 0x113   : > { %5072 = vtanh.f32 %v1359_v47  ;;  %v699_v63 = vmax.f32 %v635_v45, 0.0  ;;  %v636_v45 = vunpack.c.l.bf16 %v514_v31 }
 0x115   : > { %v1271_v4 = vpop.f32.mrf.mxu2  ;;  %v1096_v13 = vpop.f32.mrf.mxu0 }
 0x116   : > { %v1272_v10 = vadd.f32 %v1271_v4, %v6039_v32  ;;  %v1360_v12 = vpop.f32.mrf.mxu3  ;;  %v1097_v11 = vadd.f32 %v1096_v13, %v6029_v21  ;;  %v1185_v19 = vpop.f32.mrf.mxu1  ;;  %v6100_v4 = vpack.c.bf16 %v698_v59, %v696_v58  ;;  %v6103_v13 = vpack.c.bf16 %v699_v63, %v697_v62 }
 0x117   : > { %v639_v58 = vunpack.c.h.bf16 %v515_v34 }
 0x118   : > { %v1361_v23 = vadd.f32 %v1360_v12, %v1272_v10  ;;  %v5071_v25 = vpop.eup %5070  ;;  %v1186_v30 = vadd.f32 %v1185_v19, %v1097_v11  ;;  %1135 = vmatmul.bf16.gmra.mxu0 %v6082_v6  ;;  %6998 = vst [vmem:[#allocation20_spill] sm:$0xff] %v6103_v13 }
 0x119   : > { %1224 = vmatmul.bf16.gmra.mxu1 %v6085_v18  ;;  %v6093_v35 = vpack.c.bf16 %v5071_v25, %v5069_v20  ;;  %v5073_v46 = vpop.eup %5072 }
 0x11a   : > { %5074 = vtanh.f32 %v1361_v23  ;;  %1313 = vmatmul.bf16.gmra.mxu2 %v6082_v6 }
 0x11b   : > { %1402 = vmatmul.bf16.gmra.mxu3 %v6085_v18  ;;  %5076 = vtanh.f32 %v1186_v30 }
 0x11d   : > { %v1274_v36 = vpop.f32.mrf.mxu2  ;;  %v1098_v43 = vpop.f32.mrf.mxu0 }
 0x11e   : > { %v1275_v39 = vadd.f32 %v1274_v36, %v6039_v32  ;;  %v1363_v42 = vpop.f32.mrf.mxu3  ;;  %v1099_v47 = vadd.f32 %v1098_v43, %v6029_v21  ;;  %v1187_v48 = vpop.f32.mrf.mxu1  ;;  %v4881_v43 = vld [vmem:[#allocation10 + $0x84] sm:$0xf0] }
 0x120   : > { %v5075_v50 = vpop.eup %5074  ;;  %v1364_v54 = vadd.f32 %v1363_v42, %v1275_v39  ;;  %v1188_v57 = vadd.f32 %v1187_v48, %v1099_v47  ;;  %v4558_v39 = vld [vmem:[#allocation10 + $0x80] sm:$0xf]  ;;  %v4495_v42 = vor.u32 %v4865_v38, %v4494_v37  ;;  %v4842_v38 = vld [vmem:[#allocation7 + $0xd0] sm:$0xf0] }
 0x121   : > { %v6098_v61 = vpack.c.bf16 %v5075_v50, %v5073_v46  ;;  %v5077_v20 = vpop.eup %5076  ;;  %v638_v46 = vunpack.c.l.bf16 %v515_v34  ;;  %v4559_v47 = vor.u32 %v4881_v43, %v4558_v39  ;;  %v4406_v34 = vld [vmem:[#allocation7 + $0xc8] sm:$0xf] }
 0x122   : > { %5078 = vtanh.f32 %v1188_v57  ;;  %v637_v57 = vunpack.c.h.bf16 %v514_v31  ;;  %2051 = vmatpush.bf16.msrb.mxu2 %v4495_v42  ;;  %v4818_v31 = vld [vmem:[#allocation7 + $0x10] sm:$0xf0]  ;;  %v4407_v43 = vor.u32 %v4842_v38, %v4406_v34 }
 0x123   : > { %5080 = vtanh.f32 %v1364_v54  ;;  %2140 = vmatpush.bf16.msrb.mxu3 %v4559_v47 }
 0x124   : > { %1524 = vmatpush.bf16.msrb.mxu1 %v4407_v43 }
 0x125   : > { %v1276_v3 = vpop.f32.mrf.mxu2  ;;  %v1101_v12 = vpop.f32.mrf.mxu0 }
 0x126   : > { %v1277_v8 = vadd.f32 %v1276_v3, %v6039_v32  ;;  %v1365_v10 = vpop.f32.mrf.mxu3  ;;  %v1102_v11 = vadd.f32 %v1101_v12, %v6029_v21  ;;  %v1190_v19 = vpop.f32.mrf.mxu1  ;;  %v700_v12 = vmax.f32 %v636_v45, 0.0 }
 0x128   : > { %v1366_v23 = vadd.f32 %v1365_v10, %v1277_v8  ;;  %v5079_v25 = vpop.eup %5078  ;;  %v1191_v30 = vadd.f32 %v1190_v19, %v1102_v11  ;;  %1140 = vmatmul.bf16.gmra.mxu0 %v6100_v4  ;;  %v702_v11 = vmax.f32 %v638_v46, 0.0 }
 0x129   : > { %1229 = vmatmul.bf16.gmra.mxu1 %v6103_v13  ;;  %v6111_v36 = vpack.c.bf16 %v5079_v25, %v5077_v20  ;;  %v5081_v59 = vpop.eup %5080  ;;  %v701_v20 = vmax.f32 %v637_v57, 0.0  ;;  %v4310_v25 = vld [vmem:[#allocation7 + $0x8] sm:$0xf] }
 0x12a   : > { %5082 = vtanh.f32 %v1366_v23  ;;  %1318 = vmatmul.bf16.gmra.mxu2 %v6100_v4  ;;  %v703_v23 = vmax.f32 %v639_v58, 0.0  ;;  %v4311_v37 = vor.u32 %v4818_v31, %v4310_v25  ;;  %v6118_v42 = vpack.c.bf16 %v702_v11, %v700_v12 }
 0x12b   : > { %1407 = vmatmul.bf16.gmra.mxu3 %v6103_v13  ;;  %5084 = vtanh.f32 %v1191_v30 }
 0x12c   : > { %6999 = vst [vmem:[#allocation21_spill] sm:$0xff] %v6118_v42  ;;  %v6121_v46 = vpack.c.bf16 %v703_v23, %v701_v20  ;;  %1435 = vmatpush.bf16.msrb.mxu0 %v4311_v37 }
 0x12d   : > { %v1279_v44 = vpop.f32.mrf.mxu2  ;;  %v1103_v54 = vpop.f32.mrf.mxu0 }
 0x12e   : > { %v1280_v48 = vadd.f32 %v1279_v44, %v6039_v32  ;;  %v1368_v50 = vpop.f32.mrf.mxu3  ;;  %v1104_v62 = vadd.f32 %v1103_v54, %v6029_v21  ;;  %v1192_v63 = vpop.f32.mrf.mxu1  ;;  %7000 = vst [vmem:[#allocation22_spill] sm:$0xff] %v6121_v46 }
 0x130   : > { %v5083_v3 = vpop.eup %5082  ;;  %v1369_v8 = vadd.f32 %v1368_v50, %v1280_v48  ;;  %v1193_v10 = vadd.f32 %v1192_v63, %v1104_v62  ;;  %v517_v62 = vld [vmem:[%s5921_s11 + $0xe8] sm:$0xff] }
 0x131   : > { %v6116_v19 = vpack.c.bf16 %v5083_v3, %v5081_v59  ;;  %v5085_v50 = vpop.eup %5084  ;;  %v516_v59 = vld [vmem:[%s5921_s11 + $0xe0] sm:$0xff]  ;;  %v642_v12 = vunpack.c.l.bf16 %v517_v62  ;;  %v643_v25 = vunpack.c.h.bf16 %v517_v62 }
 0x132   : > { %5086 = vtanh.f32 %v1193_v10  ;;  %v640_v10 = vunpack.c.l.bf16 %v516_v59  ;;  %v641_v23 = vunpack.c.h.bf16 %v516_v59 }
 0x133   : > { %5088 = vtanh.f32 %v1369_v8 }
 0x135   : > { %v1281_v39 = vpop.f32.mrf.mxu2  ;;  %v1106_v45 = vpop.f32.mrf.mxu0 }
 0x136   : > { %v1282_v44 = vadd.f32 %v1281_v39, %v6039_v32  ;;  %v1370_v47 = vpop.f32.mrf.mxu3  ;;  %v1107_v30 = vadd.f32 %v1106_v45, %v6029_v21  ;;  %v1195_v48 = vpop.f32.mrf.mxu1 }
 0x138   : > { %v1371_v54 = vadd.f32 %v1370_v47, %v1282_v44  ;;  %v5087_v57 = vpop.eup %5086  ;;  %v1196_v58 = vadd.f32 %v1195_v48, %v1107_v30  ;;  %1145 = vmatmul.bf16.gmra.mxu0 %v6118_v42  ;;  %v704_v44 = vmax.f32 %v640_v10, 0.0  ;;  %v706_v47 = vmax.f32 %v642_v12, 0.0 }
 0x139   : > { %1234 = vmatmul.bf16.gmra.mxu1 %v6121_v46  ;;  %v6129_v63 = vpack.c.bf16 %v5087_v57, %v5085_v50  ;;  %v5089_v31 = vpop.eup %5088  ;;  %v705_v30 = vmax.f32 %v641_v23, 0.0  ;;  %v707_v48 = vmax.f32 %v643_v25, 0.0  ;;  %v518_v23 = vld [vmem:[%s5921_s11 + $0xf0] sm:$0xff] }
 0x13a   : > { %5090 = vtanh.f32 %v1371_v54  ;;  %1323 = vmatmul.bf16.gmra.mxu2 %v6118_v42  ;;  %v6136_v54 = vpack.c.bf16 %v706_v47, %v704_v44  ;;  %v550_v25 = vld [vmem:[%s5929_s17] sm:$0xff]  ;;  %v4680_v44 = vld [vmem:[#allocation10 + $0x178] sm:$0xf0]  ;;  %v644_v47 = vunpack.c.l.bf16 %v518_v23 }
 0x13b   : > { %1412 = vmatmul.bf16.gmra.mxu3 %v6121_v46  ;;  %5092 = vtanh.f32 %v1196_v58  ;;  %v4552_v42 = vld [vmem:[#allocation10 + $0x78] sm:$0xf0] }
 0x13c   : > { %7001 = vst [vmem:[#allocation23_spill] sm:$0xff] %v6136_v54 }
 0x13d   : > { %v1284_v3 = vpop.f32.mrf.mxu2  ;;  %v1108_v20 = vpop.f32.mrf.mxu0 }
 0x13e   : > { %v1285_v11 = vadd.f32 %v1284_v3, %v6039_v32  ;;  %v1373_v8 = vpop.f32.mrf.mxu3  ;;  %v1109_v34 = vadd.f32 %v1108_v20, %v6029_v21  ;;  %v1197_v37 = vpop.f32.mrf.mxu1  ;;  %v6139_v3 = vpack.c.bf16 %v707_v48, %v705_v30  ;;  %v646_v30 = vunpack.c.l.bf16 %v550_v25 }
 0x140   : > { %v5091_v38 = vpop.eup %5090  ;;  %v1374_v39 = vadd.f32 %v1373_v8, %v1285_v11  ;;  %v1198_v43 = vadd.f32 %v1197_v37, %v1109_v34  ;;  %7002 = vst [vmem:[#allocation24_spill] sm:$0xff] %v6139_v3  ;;  %v4894_v34 = vld [vmem:[#allocation10 + $0xf4] sm:$0xf]  ;;  %v4616_v37 = vld [vmem:[#allocation10 + $0xf8] sm:$0xf0] }
 0x141   : > { %v6134_v45 = vpack.c.bf16 %v5091_v38, %v5089_v31  ;;  %v5093_v11 = vpop.eup %5092  ;;  %v4910_v38 = vld [vmem:[#allocation10 + $0x174] sm:$0xf] }
 0x142   : > { %5094 = vtanh.f32 %v1198_v43  ;;  %v4619_v43 = vor.u32 %v4894_v34, %v4616_v37  ;;  %v4683_v48 = vor.u32 %v4910_v38, %v4680_v44  ;;  %v708_v37 = vmax.f32 %v644_v47, 0.0 }
 0x143   : > { %5096 = vtanh.f32 %v1374_v39 }
 0x144   : > { %2400 = vmatpush.bf16.msra.mxu2 %v4619_v43  ;;  %2489 = vmatpush.bf16.msra.mxu3 %v4683_v48 }
 0x145   : > { %v1286_v50 = vpop.f32.mrf.mxu2  ;;  %v1111_v62 = vpop.f32.mrf.mxu0 }
 0x146   : > { %v1287_v57 = vadd.f32 %v1286_v50, %v6039_v32  ;;  %v1375_v59 = vpop.f32.mrf.mxu3  ;;  %v1112_v10 = vadd.f32 %v1111_v62, %v6029_v21  ;;  %v1200_v12 = vpop.f32.mrf.mxu1  ;;  %v645_v62 = vunpack.c.h.bf16 %v518_v23  ;;  %v4911_v23 = vld [vmem:[#allocation10 + $0x174] sm:$0xf0] }
 0x148   : > { %v1376_v8 = vadd.f32 %v1375_v59, %v1287_v57  ;;  %v5095_v58 = vpop.eup %5094  ;;  %v1201_v20 = vadd.f32 %v1200_v12, %v1112_v10  ;;  %1150 = vmatmul.bf16.gmra.mxu0 %v6136_v54  ;;  %v647_v10 = vunpack.c.h.bf16 %v550_v25  ;;  %v709_v38 = vmax.f32 %v645_v62, 0.0  ;;  %v4878_v25 = vld [vmem:[#allocation10 + $0x74] sm:$0xf] }
 0x149   : > { %1239 = vmatmul.bf16.gmra.mxu1 %v6139_v3  ;;  %v6147_v31 = vpack.c.bf16 %v5095_v58, %v5093_v11  ;;  %v5097_v12 = vpop.eup %5096  ;;  %v4555_v48 = vor.u32 %v4878_v25, %v4552_v42 }
 0x14a   : > { %5098 = vtanh.f32 %v1376_v8  ;;  %1328 = vmatmul.bf16.gmra.mxu2 %v6136_v54  ;;  %v710_v54 = vmax.f32 %v646_v30, 0.0  ;;  %v711_v44 = vmax.f32 %v647_v10, 0.0 }
 0x14b   : > { %1417 = vmatmul.bf16.gmra.mxu3 %v6139_v3  ;;  %5100 = vtanh.f32 %v1201_v20  ;;  %2311 = vmatpush.bf16.msra.mxu1 %v4555_v48 }
 0x14c   : > { %v6157_v30 = vpack.c.bf16 %v711_v44, %v709_v38 }
 0x14d   : > { %v1289_v39 = vpop.f32.mrf.mxu2  ;;  %v1113_v59 = vpop.f32.mrf.mxu0 }
 0x14e   : > { %v1290_v50 = vadd.f32 %v1289_v39, %v6039_v32  ;;  %v1378_v57 = vpop.f32.mrf.mxu3  ;;  %v1114_v11 = vadd.f32 %v1113_v59, %v6029_v21  ;;  %v1202_v8 = vpop.f32.mrf.mxu1  ;;  %v4678_v39 = vld [vmem:[#allocation10 + $0x170] sm:$0xf]  ;;  %v6154_v59 = vpack.c.bf16 %v710_v54, %v708_v37 }
 0x14f   : > { %v4679_v43 = vor.u32 %v4911_v23, %v4678_v39 }
 0x150   : > { %v5099_v58 = vpop.eup %5098  ;;  %v1379_v3 = vadd.f32 %v1378_v57, %v1290_v50  ;;  %v1203_v34 = vadd.f32 %v1202_v8, %v1114_v11 }
 0x151   : > { %v6152_v46 = vpack.c.bf16 %v5099_v58, %v5097_v12  ;;  %2222 = vmatpush.bf16.msra.mxu0 %v4679_v43  ;;  %v5101_v10 = vpop.eup %5100 }
 0x152   : > { %5102 = vtanh.f32 %v1203_v34 }
 0x153   : > { %5104 = vtanh.f32 %v1379_v3 }
 0x155   : > { %v1291_v13 = vpop.f32.mrf.mxu2  ;;  %v1116_v47 = vpop.f32.mrf.mxu0 }
 0x156   : > { %v1292_v50 = vadd.f32 %v1291_v13, %v6039_v32  ;;  %v1380_v57 = vpop.f32.mrf.mxu3  ;;  %v1117_v20 = vadd.f32 %v1116_v47, %v6029_v21  ;;  %v1205_v62 = vpop.f32.mrf.mxu1 }
 0x158   : > { %v1381_v12 = vadd.f32 %v1380_v57, %v1292_v50  ;;  %v5103_v11 = vpop.eup %5102  ;;  %v1206_v8 = vadd.f32 %v1205_v62, %v1117_v20  ;;  %1155 = vmatmul.bf16.gmra.mxu0 %v6154_v59 }
 0x159   : > { %1244 = vmatmul.bf16.gmra.mxu1 %v6157_v30  ;;  %v6163_v13 = vpack.c.bf16 %v5103_v11, %v5101_v10  ;;  %v5105_v37 = vpop.eup %5104 }
 0x15a   : > { %5106 = vtanh.f32 %v1381_v12  ;;  %1333 = vmatmul.bf16.gmra.mxu2 %v6154_v59 }
 0x15b   : > { %1422 = vmatmul.bf16.gmra.mxu3 %v6157_v30  ;;  %5108 = vtanh.f32 %v1206_v8 }
 0x15d   : > { %v1294_v42 = vpop.f32.mrf.mxu2  ;;  %v1118_v34 = vpop.f32.mrf.mxu0 }
 0x15e   : > { %v1295_v54 = vadd.f32 %v1294_v42, %v6039_v32  ;;  %v1383_v58 = vpop.f32.mrf.mxu3  ;;  %v1119_v3 = vadd.f32 %v1118_v34, %v6029_v21  ;;  %v1207_v38 = vpop.f32.mrf.mxu1  ;;  %v4892_v42 = vld [vmem:[#allocation10 + $0xe4] sm:$0xf] }
 0x160   : > { %v5107_v44 = vpop.eup %5106  ;;  %v1384_v39 = vadd.f32 %v1383_v58, %v1295_v54  ;;  %v1208_v23 = vadd.f32 %v1207_v38, %v1119_v3  ;;  %v4608_v54 = vld [vmem:[#allocation10 + $0xe8] sm:$0xf0]  ;;  %v4908_v58 = vld [vmem:[#allocation10 + $0x164] sm:$0xf] }
 0x161   : > { %v6168_v25 = vpack.c.bf16 %v5107_v44, %v5105_v37  ;;  %v5109_v62 = vpop.eup %5108  ;;  %v4611_v34 = vor.u32 %v4892_v42, %v4608_v54  ;;  %v4672_v37 = vld [vmem:[#allocation10 + $0x168] sm:$0xf0] }
 0x162   : > { %5110 = vtanh.f32 %v1208_v23  ;;  %v4675_v38 = vor.u32 %v4908_v58, %v4672_v37  ;;  %v4544_v42 = vld [vmem:[#allocation10 + $0x68] sm:$0xf0] }
 0x163   : > { %5112 = vtanh.f32 %v1384_v39  ;;  %2401 = vmatpush.bf16.msra.mxu2 %v4611_v34 }
 0x164   : > { %2490 = vmatpush.bf16.msra.mxu3 %v4675_v38 }
 0x165   : > { %v1296_v43 = vpop.f32.mrf.mxu2  ;;  %v1121_v57 = vpop.f32.mrf.mxu0 }
 0x166   : > { %v1297_v48 = vadd.f32 %v1296_v43, %v6039_v32  ;;  %v1385_v50 = vpop.f32.mrf.mxu3  ;;  %v1122_v47 = vadd.f32 %v1121_v57, %v6029_v21  ;;  %v1210_v20 = vpop.f32.mrf.mxu1 }
 0x168   : > { %v1386_v10 = vadd.f32 %v1385_v50, %v1297_v48  ;;  %v5111_v12 = vpop.eup %5110  ;;  %v1211_v11 = vadd.f32 %v1210_v20, %v1122_v47  ;;  %1436 = vmatmul.bf16.vlgmr.msrb.gmra.mxu0 %v5949_v49  ;;  %v4670_v20 = vld [vmem:[#allocation10 + $0x160] sm:$0xf] }
 0x169   : > { %1525 = vmatmul.bf16.vlgmr.msrb.gmra.mxu1 %v5951_v53  ;;  %v6175_v8 = vpack.c.bf16 %v5111_v12, %v5109_v62  ;;  %v5113_v23 = vpop.eup %5112  ;;  %v4909_v62 = vld [vmem:[#allocation10 + $0x164] sm:$0xf0] }
 0x16a   : > { %5114 = vtanh.f32 %v1386_v10  ;;  %2052 = vmatmul.bf16.vlgmr.msrb.gmra.mxu2 %v6057_v33  ;;  %v4876_v10 = vld [vmem:[#allocation10 + $0x64] sm:$0xf]  ;;  %v4671_v12 = vor.u32 %v4909_v62, %v4670_v20 }
 0x16b   : > { %2141 = vmatmul.bf16.vlgmr.msrb.gmra.mxu3 %v6062_v56  ;;  %5116 = vtanh.f32 %v1211_v11  ;;  %v4547_v58 = vor.u32 %v4876_v10, %v4544_v42 }
 0x16c   : > { %2223 = vmatpush.bf16.msra.mxu0 %v4671_v12 }
 0x16d   : > { %v1299_v3 = vpop.f32.mrf.mxu2  ;;  %v1123_v49 = vpop.f32.mrf.mxu0  ;;  %2312 = vmatpush.bf16.msra.mxu1 %v4547_v58 }
 0x16e   : > { %v1300_v44 = vadd.f32 %v1299_v3, %v6039_v32  ;;  %v1388_v39 = vpop.f32.mrf.mxu3  ;;  %v1124_v53 = vadd.f32 %v1123_v49, %v6029_v21  ;;  %v1212_v43 = vpop.f32.mrf.mxu1 }
 0x170   : > { %v5115_v48 = vpop.eup %5114  ;;  %v1389_v50 = vadd.f32 %v1388_v39, %v1300_v44  ;;  %v1213_v57 = vadd.f32 %v1212_v43, %v1124_v53 }
 0x171   : > { %v6180_v47 = vpack.c.bf16 %v5115_v48, %v5113_v23  ;;  %v5117_v39 = vpop.eup %5116 }
 0x172   : > { %5118 = vtanh.f32 %v1213_v57 }
 0x173   : > { %5120 = vtanh.f32 %v1389_v50 }
 0x175   : > { %v1301_v54 = vpop.f32.mrf.mxu2  ;;  %v1126_v3 = vpop.f32.mrf.mxu0 }
 0x176   : > { %v1302_v34 = vadd.f32 %v1301_v54, %v6039_v32  ;;  %v1390_v37 = vpop.f32.mrf.mxu3  ;;  %v1127_v38 = vadd.f32 %v1126_v3, %v6029_v21  ;;  %v1215_v44 = vpop.f32.mrf.mxu1 }
 0x178   : > { %v1391_v49 = vadd.f32 %v1390_v37, %v1302_v34  ;;  %v5119_v11 = vpop.eup %5118  ;;  %v1216_v23 = vadd.f32 %v1215_v44, %v1127_v38  ;;  %1441 = vmatmul.bf16.gmra.mxu0 %v5959_v14 }
 0x179   : > { %1530 = vmatmul.bf16.gmra.mxu1 %v5961_v15  ;;  %v6187_v53 = vpack.c.bf16 %v5119_v11, %v5117_v39  ;;  %v5121_v62 = vpop.eup %5120 }
 0x17a   : > { %5122 = vtanh.f32 %v1391_v49  ;;  %2057 = vmatmul.bf16.gmra.mxu2 %v6075_v17 }
 0x17b   : > { %2146 = vmatmul.bf16.gmra.mxu3 %v6080_v55  ;;  %5124 = vtanh.f32 %v1216_v23 }
 0x17d   : > { %v1304_v43 = vpop.f32.mrf.mxu2  ;;  %v1128_v20 = vpop.f32.mrf.mxu0 }
 0x17e   : > { %v1305_v48 = vadd.f32 %v1304_v43, %v6039_v32  ;;  %v1393_v57 = vpop.f32.mrf.mxu3  ;;  %v1129_v50 = vadd.f32 %v1128_v20, %v6029_v21  ;;  %v1217_v10 = vpop.f32.mrf.mxu1  ;;  %v4890_v43 = vld [vmem:[#allocation10 + $0xd4] sm:$0xf] }
 0x180   : > { %v5123_v12 = vpop.eup %5122  ;;  %v1394_v14 = vadd.f32 %v1393_v57, %v1305_v48  ;;  %v1218_v42 = vadd.f32 %v1217_v10, %v1129_v50  ;;  %v4600_v48 = vld [vmem:[#allocation10 + $0xd8] sm:$0xf0]  ;;  %v4906_v57 = vld [vmem:[#allocation10 + $0x154] sm:$0xf] }
 0x181   : > { %v6192_v54 = vpack.c.bf16 %v5123_v12, %v5121_v62  ;;  %v5125_v44 = vpop.eup %5124  ;;  %v4603_v20 = vor.u32 %v4890_v43, %v4600_v48  ;;  %v4664_v62 = vld [vmem:[#allocation10 + $0x158] sm:$0xf0] }
 0x182   : > { %5126 = vtanh.f32 %v1218_v42  ;;  %v4667_v10 = vor.u32 %v4906_v57, %v4664_v62  ;;  %v4536_v43 = vld [vmem:[#allocation10 + $0x58] sm:$0xf0] }
 0x183   : > { %5128 = vtanh.f32 %v1394_v14  ;;  %2402 = vmatpush.bf16.msra.mxu2 %v4603_v20 }
 0x184   : > { %2491 = vmatpush.bf16.msra.mxu3 %v4667_v10 }
 0x185   : > { %v1306_v15 = vpop.f32.mrf.mxu2  ;;  %v1131_v37 = vpop.f32.mrf.mxu0 }
 0x186   : > { %v1307_v58 = vadd.f32 %v1306_v15, %v6039_v32  ;;  %v1395_v34 = vpop.f32.mrf.mxu3  ;;  %v1132_v3 = vadd.f32 %v1131_v37, %v6029_v21  ;;  %v1220_v38 = vpop.f32.mrf.mxu1 }
 0x188   : > { %v1396_v39 = vadd.f32 %v1395_v34, %v1307_v58  ;;  %v5127_v49 = vpop.eup %5126  ;;  %v1221_v11 = vadd.f32 %v1220_v38, %v1132_v3  ;;  %1446 = vmatmul.bf16.gmra.mxu0 %v5969_v26  ;;  %v4662_v38 = vld [vmem:[#allocation10 + $0x150] sm:$0xf] }
 0x189   : > { %1535 = vmatmul.bf16.gmra.mxu1 %v5971_v27  ;;  %v6199_v23 = vpack.c.bf16 %v5127_v49, %v5125_v44  ;;  %v5129_v42 = vpop.eup %5128  ;;  %v4907_v44 = vld [vmem:[#allocation10 + $0x154] sm:$0xf0] }
 0x18a   : > { %5130 = vtanh.f32 %v1396_v39  ;;  %2062 = vmatmul.bf16.gmra.mxu2 %v6093_v35  ;;  %v4874_v39 = vld [vmem:[#allocation10 + $0x54] sm:$0xf]  ;;  %v4663_v49 = vor.u32 %v4907_v44, %v4662_v38 }
 0x18b   : > { %2151 = vmatmul.bf16.gmra.mxu3 %v6098_v61  ;;  %5132 = vtanh.f32 %v1221_v11  ;;  %v4539_v57 = vor.u32 %v4874_v39, %v4536_v43 }
 0x18c   : > { %2224 = vmatpush.bf16.msra.mxu0 %v4663_v49 }
 0x18d   : > { %v1309_v50 = vpop.f32.mrf.mxu2  ;;  %v1133_v26 = vpop.f32.mrf.mxu0  ;;  %2313 = vmatpush.bf16.msra.mxu1 %v4539_v57 }
 0x18e   : > { %v1310_v12 = vadd.f32 %v1309_v50, %v6039_v32  ;;  %v1398_v14 = vpop.f32.mrf.mxu3  ;;  %v1134_v27 = vadd.f32 %v1133_v26, %v6029_v21  ;;  %v1222_v15 = vpop.f32.mrf.mxu1 }
 0x190   : > { %v5131_v58 = vpop.eup %5130  ;;  %v1399_v34 = vadd.f32 %v1398_v14, %v1310_v12  ;;  %v1223_v37 = vadd.f32 %v1222_v15, %v1134_v27 }
 0x191   : > { %v6204_v3 = vpack.c.bf16 %v5131_v58, %v5129_v42  ;;  %v5133_v14 = vpop.eup %5132 }
 0x192   : > { %5134 = vtanh.f32 %v1223_v37 }
 0x193   : > { %5136 = vtanh.f32 %v1399_v34 }
 0x195   : > { %v1311_v48 = vpop.f32.mrf.mxu2  ;;  %v1136_v50 = vpop.f32.mrf.mxu0 }
 0x196   : > { %v1312_v20 = vadd.f32 %v1311_v48, %v6039_v32  ;;  %v1400_v62 = vpop.f32.mrf.mxu3  ;;  %v1137_v10 = vadd.f32 %v1136_v50, %v6029_v21  ;;  %v1225_v12 = vpop.f32.mrf.mxu1 }
 0x198   : > { %v1401_v26 = vadd.f32 %v1400_v62, %v1312_v20  ;;  %v5135_v11 = vpop.eup %5134  ;;  %v1226_v42 = vadd.f32 %v1225_v12, %v1137_v10  ;;  %1451 = vmatmul.bf16.gmra.mxu0 %v5979_v51 }
 0x199   : > { %1540 = vmatmul.bf16.gmra.mxu1 %v5981_v52  ;;  %v6211_v27 = vpack.c.bf16 %v5135_v11, %v5133_v14  ;;  %v5137_v44 = vpop.eup %5136 }
 0x19a   : > { %5138 = vtanh.f32 %v1401_v26  ;;  %2067 = vmatmul.bf16.gmra.mxu2 %v6111_v36 }
 0x19b   : > { %2156 = vmatmul.bf16.gmra.mxu3 %v6116_v19  ;;  %5140 = vtanh.f32 %v1226_v42 }
 0x19d   : > { %v1314_v15 = vpop.f32.mrf.mxu2  ;;  %v1138_v38 = vpop.f32.mrf.mxu0 }
 0x19e   : > { %v1315_v58 = vadd.f32 %v1314_v15, %v6039_v32  ;;  %v1403_v37 = vpop.f32.mrf.mxu3  ;;  %v1139_v34 = vadd.f32 %v1138_v38, %v6029_v21  ;;  %v1227_v39 = vpop.f32.mrf.mxu1  ;;  %v4888_v15 = vld [vmem:[#allocation10 + $0xc4] sm:$0xf] }
 0x1a0   : > { %v5139_v49 = vpop.eup %5138  ;;  %v1404_v51 = vadd.f32 %v1403_v37, %v1315_v58  ;;  %v1228_v43 = vadd.f32 %v1227_v39, %v1139_v34  ;;  %v4592_v58 = vld [vmem:[#allocation10 + $0xc8] sm:$0xf0]  ;;  %v4904_v37 = vld [vmem:[#allocation10 + $0x144] sm:$0xf] }
 0x1a1   : > { %v6216_v48 = vpack.c.bf16 %v5139_v49, %v5137_v44  ;;  %v5141_v12 = vpop.eup %5140  ;;  %v4595_v38 = vor.u32 %v4888_v15, %v4592_v58  ;;  %v4656_v44 = vld [vmem:[#allocation10 + $0x148] sm:$0xf0] }
 0x1a2   : > { %5142 = vtanh.f32 %v1228_v43  ;;  %v4659_v39 = vor.u32 %v4904_v37, %v4656_v44  ;;  %v4528_v15 = vld [vmem:[#allocation10 + $0x48] sm:$0xf0] }
 0x1a3   : > { %5144 = vtanh.f32 %v1404_v51  ;;  %2403 = vmatpush.bf16.msra.mxu2 %v4595_v38 }
 0x1a4   : > { %2492 = vmatpush.bf16.msra.mxu3 %v4659_v39 }
 0x1a5   : > { %v1316_v52 = vpop.f32.mrf.mxu2  ;;  %v1141_v62 = vpop.f32.mrf.mxu0 }
 0x1a6   : > { %v1317_v57 = vadd.f32 %v1316_v52, %v6039_v32  ;;  %v1405_v20 = vpop.f32.mrf.mxu3  ;;  %v1142_v50 = vadd.f32 %v1141_v62, %v6029_v21  ;;  %v1230_v10 = vpop.f32.mrf.mxu1 }
 0x1a8   : > { %v1406_v14 = vadd.f32 %v1405_v20, %v1317_v57  ;;  %v5143_v26 = vpop.eup %5142  ;;  %v1231_v11 = vadd.f32 %v1230_v10, %v1142_v50  ;;  %1456 = vmatmul.bf16.gmra.mxu0 %v5989_v0  ;;  %v4654_v10 = vld [vmem:[#allocation10 + $0x140] sm:$0xf] }
 0x1a9   : > { %1545 = vmatmul.bf16.gmra.mxu1 %v5991_v1  ;;  %v6223_v42 = vpack.c.bf16 %v5143_v26, %v5141_v12  ;;  %v5145_v43 = vpop.eup %5144  ;;  %v4905_v12 = vld [vmem:[#allocation10 + $0x144] sm:$0xf0] }
 0x1aa   : > { %5146 = vtanh.f32 %v1406_v14  ;;  %2072 = vmatmul.bf16.gmra.mxu2 %v6129_v63  ;;  %v4872_v14 = vld [vmem:[#allocation10 + $0x44] sm:$0xf]  ;;  %v4655_v26 = vor.u32 %v4905_v12, %v4654_v10 }
 0x1ab   : > { %2161 = vmatmul.bf16.gmra.mxu3 %v6134_v45  ;;  %5148 = vtanh.f32 %v1231_v11  ;;  %v4531_v37 = vor.u32 %v4872_v14, %v4528_v15 }
 0x1ac   : > { %2225 = vmatpush.bf16.msra.mxu0 %v4655_v26 }
 0x1ad   : > { %v1319_v34 = vpop.f32.mrf.mxu2  ;;  %v1143_v0 = vpop.f32.mrf.mxu0  ;;  %2314 = vmatpush.bf16.msra.mxu1 %v4531_v37 }
 0x1ae   : > { %v1320_v49 = vadd.f32 %v1319_v34, %v6039_v32  ;;  %v1408_v51 = vpop.f32.mrf.mxu3  ;;  %v1144_v1 = vadd.f32 %v1143_v0, %v6029_v21  ;;  %v1232_v52 = vpop.f32.mrf.mxu1 }
 0x1b0   : > { %v5147_v57 = vpop.eup %5146  ;;  %v1409_v20 = vadd.f32 %v1408_v51, %v1320_v49  ;;  %v1233_v62 = vadd.f32 %v1232_v52, %v1144_v1 }
 0x1b1   : > { %v6228_v50 = vpack.c.bf16 %v5147_v57, %v5145_v43  ;;  %v5149_v51 = vpop.eup %5148 }
 0x1b2   : > { %5150 = vtanh.f32 %v1233_v62 }
 0x1b3   : > { %5152 = vtanh.f32 %v1409_v20 }
 0x1b5   : > { %v1321_v58 = vpop.f32.mrf.mxu2  ;;  %v1146_v34 = vpop.f32.mrf.mxu0 }
 0x1b6   : > { %v1322_v38 = vadd.f32 %v1321_v58, %v6039_v32  ;;  %v1410_v44 = vpop.f32.mrf.mxu3  ;;  %v1147_v39 = vadd.f32 %v1146_v34, %v6029_v21  ;;  %v1235_v49 = vpop.f32.mrf.mxu1 }
 0x1b8   : > { %v1411_v0 = vadd.f32 %v1410_v44, %v1322_v38  ;;  %v5151_v11 = vpop.eup %5150  ;;  %v1236_v43 = vadd.f32 %v1235_v49, %v1147_v39  ;;  %1461 = vmatmul.bf16.gmra.mxu0 %v5999_v28 }
 0x1b9   : > { %1550 = vmatmul.bf16.gmra.mxu1 %v6001_v29  ;;  %v6235_v1 = vpack.c.bf16 %v5151_v11, %v5149_v51  ;;  %v5153_v12 = vpop.eup %5152 }
 0x1ba   : > { %5154 = vtanh.f32 %v1411_v0  ;;  %2077 = vmatmul.bf16.gmra.mxu2 %v6147_v31 }
 0x1bb   : > { %7003 = vst [vmem:[#allocation25_spill] sm:$0xff] %v6235_v1  ;;  %2166 = vmatmul.bf16.gmra.mxu3 %v6152_v46  ;;  %5156 = vtanh.f32 %v1236_v43 }
 0x1bd   : > { %v1324_v52 = vpop.f32.mrf.mxu2  ;;  %v1148_v10 = vpop.f32.mrf.mxu0 }
 0x1be   : > { %v1325_v57 = vadd.f32 %v1324_v52, %v6039_v32  ;;  %v1413_v62 = vpop.f32.mrf.mxu3  ;;  %v1149_v20 = vadd.f32 %v1148_v10, %v6029_v21  ;;  %v1237_v14 = vpop.f32.mrf.mxu1  ;;  %v4886_v52 = vld [vmem:[#allocation10 + $0xb4] sm:$0xf] }
 0x1c0   : > { %v5155_v26 = vpop.eup %5154  ;;  %v1414_v28 = vadd.f32 %v1413_v62, %v1325_v57  ;;  %v1238_v15 = vadd.f32 %v1237_v14, %v1149_v20  ;;  %v4584_v57 = vld [vmem:[#allocation10 + $0xb8] sm:$0xf0]  ;;  %v4902_v62 = vld [vmem:[#allocation10 + $0x134] sm:$0xf] }
 0x1c1   : > { %v6240_v58 = vpack.c.bf16 %v5155_v26, %v5153_v12  ;;  %v5157_v49 = vpop.eup %5156  ;;  %v4587_v10 = vor.u32 %v4886_v52, %v4584_v57  ;;  %v4648_v12 = vld [vmem:[#allocation10 + $0x138] sm:$0xf0] }
 0x1c2   : > { %5158 = vtanh.f32 %v1238_v15  ;;  %v4651_v14 = vor.u32 %v4902_v62, %v4648_v12 }
 0x1c3   : > { %7004 = vst [vmem:[#allocation26_spill] sm:$0xff] %v6240_v58  ;;  %5160 = vtanh.f32 %v1414_v28  ;;  %2404 = vmatpush.bf16.msra.mxu2 %v4587_v10 }
 0x1c4   : > { %2493 = vmatpush.bf16.msra.mxu3 %v4651_v14  ;;  %v4903_v14 = vld [vmem:[#allocation10 + $0x134] sm:$0xf0] }
 0x1c5   : > { %v1326_v29 = vpop.f32.mrf.mxu2  ;;  %v1151_v44 = vpop.f32.mrf.mxu0 }
 0x1c6   : > { %v1327_v37 = vadd.f32 %v1326_v29, %v6039_v32  ;;  %v1415_v38 = vpop.f32.mrf.mxu3  ;;  %v1152_v34 = vadd.f32 %v1151_v44, %v6029_v21  ;;  %v1240_v39 = vpop.f32.mrf.mxu1 }
 0x1c8   : > { %v1416_v51 = vadd.f32 %v1415_v38, %v1327_v37  ;;  %v5159_v0 = vpop.eup %5158  ;;  %v1241_v11 = vadd.f32 %v1240_v39, %v1152_v34  ;;  %1466 = vmatmul.bf16.gmra.mxu0 %v6009_v40 }
 0x1c9   : > { %1555 = vmatmul.bf16.gmra.mxu1 %v6011_v41  ;;  %v6247_v43 = vpack.c.bf16 %v5159_v0, %v5157_v49  ;;  %v5161_v15 = vpop.eup %5160 }
 0x1ca   : > { %5162 = vtanh.f32 %v1416_v51  ;;  %2082 = vmatmul.bf16.gmra.mxu2 %v6163_v13 }
 0x1cb   : > { %7005 = vst [vmem:[#allocation27_spill] sm:$0xff] %v6247_v43  ;;  %2171 = vmatmul.bf16.gmra.mxu3 %v6168_v25  ;;  %5164 = vtanh.f32 %v1241_v11  ;;  %v4646_v11 = vld [vmem:[#allocation10 + $0x130] sm:$0xf] }
 0x1cd   : > { %v1329_v20 = vpop.f32.mrf.mxu2  ;;  %v1153_v40 = vpop.f32.mrf.mxu0 }
 0x1ce   : > { %v1330_v26 = vadd.f32 %v1329_v20, %v6039_v32  ;;  %v1418_v28 = vpop.f32.mrf.mxu3  ;;  %v1154_v41 = vadd.f32 %v1153_v40, %v6029_v21  ;;  %v1242_v29 = vpop.f32.mrf.mxu1  ;;  %v4647_v40 = vor.u32 %v4903_v14, %v4646_v11 }
 0x1d0   : > { %v5163_v37 = vpop.eup %5162  ;;  %v1419_v38 = vadd.f32 %v1418_v28, %v1330_v26  ;;  %v1243_v44 = vadd.f32 %v1242_v29, %v1154_v41  ;;  %v4870_v26 = vld [vmem:[#allocation10 + $0x34] sm:$0xf]  ;;  %2226 = vmatpush.bf16.msra.mxu0 %v4647_v40 }
 0x1d1   : > { %v6252_v34 = vpack.c.bf16 %v5163_v37, %v5161_v15  ;;  %v5165_v62 = vpop.eup %5164  ;;  %v4520_v15 = vld [vmem:[#allocation10 + $0x38] sm:$0xf0] }
 0x1d2   : > { %5166 = vtanh.f32 %v1243_v44  ;;  %v4523_v41 = vor.u32 %v4870_v26, %v4520_v15 }
 0x1d3   : > { %7006 = vst [vmem:[#allocation28_spill] sm:$0xff] %v6252_v34  ;;  %5168 = vtanh.f32 %v1419_v38 }
 0x1d4   : > { %2315 = vmatpush.bf16.msra.mxu1 %v4523_v41 }
 0x1d5   : > { %v1331_v39 = vpop.f32.mrf.mxu2  ;;  %v1156_v0 = vpop.f32.mrf.mxu0 }
 0x1d6   : > { %v1332_v49 = vadd.f32 %v1331_v39, %v6039_v32  ;;  %v1420_v51 = vpop.f32.mrf.mxu3  ;;  %v1157_v52 = vadd.f32 %v1156_v0, %v6029_v21  ;;  %v1245_v57 = vpop.f32.mrf.mxu1 }
 0x1d8   : > { %v1421_v10 = vadd.f32 %v1420_v51, %v1332_v49  ;;  %v5167_v12 = vpop.eup %5166  ;;  %v1246_v20 = vadd.f32 %v1245_v57, %v1157_v52  ;;  %1471 = vmatmul.bf16.gmra.mxu0 %v6019_v5  ;;  %v5500_v57 = vld [vmem:[#allocation8] sm:$0x7] }
 0x1d9   : > { %1560 = vmatmul.bf16.gmra.mxu1 %v6021_v7  ;;  %v6259_v28 = vpack.c.bf16 %v5167_v12, %v5165_v62  ;;  %v5169_v7 = vpop.eup %5168  ;;  %v6266_v62 = vperm.slane %v5500_v57, 2 }
 0x1da   : > { %5170 = vtanh.f32 %v1421_v10  ;;  %2087 = vmatmul.bf16.gmra.mxu2 %v6175_v8 }
 0x1db   : > { %7007 = vst [vmem:[#allocation29_spill] sm:$0xff] %v6259_v28  ;;  %2176 = vmatmul.bf16.gmra.mxu3 %v6180_v47  ;;  %5172 = vtanh.f32 %v1246_v20 }
 0x1dd   : > { %v1334_v29 = vpop.f32.mrf.mxu2  ;;  %v1158_v38 = vpop.f32.mrf.mxu0 }
 0x1de   : > { %v1335_v37 = vadd.f32 %v1334_v29, %v6039_v32  ;;  %v1423_v5 = vpop.f32.mrf.mxu3  ;;  %v1159_v44 = vadd.f32 %v1158_v38, %v6029_v21  ;;  %v1247_v39 = vpop.f32.mrf.mxu1  ;;  %v1798_v21 = vld [vmem:[%s6960_s5] sm:$0x3]  ;;  %v4576_v38 = vld [vmem:[#allocation10 + $0xa8] sm:$0xf0] }
 0x1e0   : > { %v5171_v49 = vpop.eup %5170  ;;  %v1424_v51 = vadd.f32 %v1423_v5, %v1335_v37  ;;  %v1248_v0 = vadd.f32 %v1247_v39, %v1159_v44  ;;  %v4884_v5 = vld [vmem:[#allocation10 + $0xa4] sm:$0xf]  ;;  %v4640_v39 = vld [vmem:[#allocation10 + $0x128] sm:$0xf0] }
 0x1e1   : > { %v6264_v52 = vpack.c.bf16 %v5171_v49, %v5169_v7  ;;  %v5173_v15 = vpop.eup %5172  ;;  %v4900_v7 = vld [vmem:[#allocation10 + $0x124] sm:$0xf]  ;;  %v4579_v44 = vor.u32 %v4884_v5, %v4576_v38  ;;  %v4512_v5 = vld [vmem:[#allocation10 + $0x28] sm:$0xf0] }
 0x1e2   : > { %5174 = vtanh.f32 %v1248_v0 }
 0x1e3   : > { %7008 = vst [vmem:[#allocation30_spill] sm:$0xff] %v6264_v52  ;;  %5176 = vtanh.f32 %v1424_v51  ;;  %v4643_v51 = vor.u32 %v4900_v7, %v4640_v39  ;;  %2405 = vmatpush.bf16.msra.mxu2 %v4579_v44 }
 0x1e5   : > { %v1336_v10 = vpop.f32.mrf.mxu2  ;;  %v1437_v14 = vpop.f32.mrf.mxu0  ;;  %2494 = vmatpush.bf16.msra.mxu3 %v4643_v51 }
 0x1e6   : > { %v1337_v12 = vadd.f32 %v1336_v10, %v6039_v32  ;;  %v1425_v11 = vpop.f32.mrf.mxu3  ;;  %v1438_v26 = vadd.f32 %v1437_v14, %v6266_v62  ;;  %v1526_v40 = vpop.f32.mrf.mxu1  ;;  %v6276_v32 = vperm.slane %v1798_v21, 0  ;;  %v4638_v21 = vld [vmem:[#allocation10 + $0x120] sm:$0xf] }
 0x1e8   : > { %v1426_v41 = vadd.f32 %v1425_v11, %v1337_v12  ;;  %v5175_v29 = vpop.eup %5174  ;;  %v1527_v20 = vadd.f32 %v1526_v40, %v1438_v26  ;;  %1476 = vmatmul.bf16.gmra.mxu0 %v6031_v22 }
 0x1e9   : > { %1565 = vmatmul.bf16.gmra.mxu1 %v6033_v24  ;;  %v6278_v37 = vpack.c.bf16 %v5175_v29, %v5173_v15  ;;  %v5177_v24 = vpop.eup %5176  ;;  %v4901_v15 = vld [vmem:[#allocation10 + $0x124] sm:$0xf0] }
 0x1ea   : > { %5178 = vtanh.f32 %v1426_v41  ;;  %2092 = vmatmul.bf16.gmra.mxu2 %v6187_v53  ;;  %v4868_v41 = vld [vmem:[#allocation10 + $0x24] sm:$0xf]  ;;  %v4639_v29 = vor.u32 %v4901_v15, %v4638_v21 }
 0x1eb   : > { %2181 = vmatmul.bf16.gmra.mxu3 %v6192_v54  ;;  %5180 = vtanh.f32 %v1527_v20  ;;  %v4515_v7 = vor.u32 %v4868_v41, %v4512_v5 }
 0x1ec   : > { %2227 = vmatpush.bf16.msra.mxu0 %v4639_v29 }
 0x1ed   : > { %v2053_v49 = vpop.f32.mrf.mxu2  ;;  %v1439_v57 = vpop.f32.mrf.mxu0  ;;  %2316 = vmatpush.bf16.msra.mxu1 %v4515_v7 }
 0x1ee   : > { %v2054_v22 = vadd.f32 %v2053_v49, %v6276_v32  ;;  %v2142_v0 = vpop.f32.mrf.mxu3  ;;  %v1440_v10 = vadd.f32 %v1439_v57, %v6266_v62  ;;  %v1528_v12 = vpop.f32.mrf.mxu1 }
 0x1f0   : > { %v5179_v11 = vpop.eup %5178  ;;  %v6283_v14 = vadd.f32 %v2142_v0, %v2054_v22  ;;  %v1529_v26 = vadd.f32 %v1528_v12, %v1440_v10 }
 0x1f1   : > { %v6285_v40 = vpack.c.bf16 %v5179_v11, %v5177_v24  ;;  %v5181_v0 = vpop.eup %5180 }
 0x1f2   : > { %5182 = vtanh.f32 %v1529_v26 }
 0x1f5   : > { %v2055_v38 = vpop.f32.mrf.mxu2  ;;  %v1442_v49 = vpop.f32.mrf.mxu0 }
 0x1f6   : > { %v2056_v44 = vadd.f32 %v2055_v38, %v6276_v32  ;;  %v2144_v39 = vpop.f32.mrf.mxu3  ;;  %v1443_v51 = vadd.f32 %v1442_v49, %v6266_v62  ;;  %v1531_v22 = vpop.f32.mrf.mxu1 }
 0x1f8   : > { %v6289_v57 = vadd.f32 %v2144_v39, %v2056_v44  ;;  %v5183_v20 = vpop.eup %5182  ;;  %v1532_v24 = vadd.f32 %v1531_v22, %v1443_v51  ;;  %1481 = vmatmul.bf16.gmra.mxu0 %v6046_v9 }
 0x1f9   : > { %v6292_v10 = vpack.c.bf16 %v5183_v20, %v5181_v0  ;;  %1570 = vmatmul.bf16.gmra.mxu1 %v6049_v16 }
 0x1fa   : > { %2097 = vmatmul.bf16.gmra.mxu2 %v6199_v23  ;;  %5184 = vtanh.f32 %v1532_v24  ;;  %v4882_v24 = vld [vmem:[#allocation10 + $0x94] sm:$0xf] }
 0x1fb   : > { %2186 = vmatmul.bf16.gmra.mxu3 %v6204_v3 }
 0x1fd   : > { %v2058_v12 = vpop.f32.mrf.mxu2  ;;  %v1444_v21 = vpop.f32.mrf.mxu0 }
 0x1fe   : > { %v2059_v11 = vadd.f32 %v2058_v12, %v6276_v32  ;;  %v2147_v26 = vpop.f32.mrf.mxu3  ;;  %v1445_v15 = vadd.f32 %v1444_v21, %v6266_v62  ;;  %v1533_v41 = vpop.f32.mrf.mxu1  ;;  %v4568_v12 = vld [vmem:[#allocation10 + $0x98] sm:$0xf0] }
 0x1ff   : > { %v4632_v21 = vld [vmem:[#allocation10 + $0x118] sm:$0xf0] }
 0x200   : > { %v6299_v29 = vadd.f32 %v2147_v26, %v2059_v11  ;;  %v1534_v5 = vadd.f32 %v1533_v41, %v1445_v15  ;;  %v5185_v49 = vpop.eup %5184  ;;  %v4898_v11 = vld [vmem:[#allocation10 + $0x114] sm:$0xf]  ;;  %v4571_v26 = vor.u32 %v4882_v24, %v4568_v12  ;;  %v4504_v24 = vld [vmem:[#allocation10 + $0x18] sm:$0xf0] }
 0x201   : > { %v4635_v41 = vor.u32 %v4898_v11, %v4632_v21 }
 0x202   : > { %5186 = vtanh.f32 %v1534_v5  ;;  %2406 = vmatpush.bf16.msra.mxu2 %v4571_v26 }
 0x203   : > { %2495 = vmatpush.bf16.msra.mxu3 %v4635_v41 }
 0x205   : > { %v2060_v9 = vpop.f32.mrf.mxu2  ;;  %v1447_v7 = vpop.f32.mrf.mxu0 }
 0x206   : > { %v2061_v16 = vadd.f32 %v2060_v9, %v6276_v32  ;;  %v2149_v38 = vpop.f32.mrf.mxu3  ;;  %v1448_v44 = vadd.f32 %v1447_v7, %v6266_v62  ;;  %v1536_v39 = vpop.f32.mrf.mxu1 }
 0x208   : > { %v6303_v51 = vadd.f32 %v2149_v38, %v2061_v16  ;;  %v5187_v22 = vpop.eup %5186  ;;  %v1537_v0 = vadd.f32 %v1536_v39, %v1448_v44  ;;  %1486 = vmatmul.bf16.gmra.mxu0 %v6064_v60  ;;  %v4630_v44 = vld [vmem:[#allocation10 + $0x110] sm:$0xf]  ;;  %v4899_v39 = vld [vmem:[#allocation10 + $0x114] sm:$0xf0] }
 0x209   : > { %1575 = vmatmul.bf16.gmra.mxu1 %v6067_v2  ;;  %v6308_v20 = vpack.c.bf16 %v5187_v22, %v5185_v49  ;;  %v4866_v49 = vld [vmem:[#allocation10 + $0x14] sm:$0xf]  ;;  %v4631_v22 = vor.u32 %v4899_v39, %v4630_v44 }
 0x20a   : > { %2102 = vmatmul.bf16.gmra.mxu2 %v6211_v27  ;;  %5188 = vtanh.f32 %v1537_v0  ;;  %v4507_v11 = vor.u32 %v4866_v49, %v4504_v24 }
 0x20b   : > { %2191 = vmatmul.bf16.gmra.mxu3 %v6216_v48  ;;  %2228 = vmatpush.bf16.msra.mxu0 %v4631_v22 }
 0x20c   : > { %2317 = vmatpush.bf16.msra.mxu1 %v4507_v11 }
 0x20d   : > { %v2063_v15 = vpop.f32.mrf.mxu2  ;;  %v1449_v16 = vpop.f32.mrf.mxu0 }
 0x20e   : > { %v2064_v5 = vadd.f32 %v2063_v15, %v6276_v32  ;;  %v2152_v9 = vpop.f32.mrf.mxu3  ;;  %v1450_v60 = vadd.f32 %v1449_v16, %v6266_v62  ;;  %v1538_v2 = vpop.f32.mrf.mxu1 }
 0x210   : > { %v6313_v38 = vadd.f32 %v2152_v9, %v2064_v5  ;;  %v1539_v7 = vadd.f32 %v1538_v2, %v1450_v60  ;;  %v5189_v5 = vpop.eup %5188 }
 0x212   : > { %5190 = vtanh.f32 %v1539_v7 }
 0x215   : > { %v2065_v12 = vpop.f32.mrf.mxu2  ;;  %v1452_v26 = vpop.f32.mrf.mxu0 }
 0x216   : > { %v2066_v21 = vadd.f32 %v2065_v12, %v6276_v32  ;;  %v2154_v15 = vpop.f32.mrf.mxu3  ;;  %v1453_v16 = vadd.f32 %v1452_v26, %v6266_v62  ;;  %v1541_v41 = vpop.f32.mrf.mxu1 }
 0x218   : > { %v6317_v9 = vadd.f32 %v2154_v15, %v2066_v21  ;;  %v5191_v0 = vpop.eup %5190  ;;  %v1542_v60 = vadd.f32 %v1541_v41, %v1453_v16  ;;  %1491 = vmatmul.bf16.gmra.mxu0 %v6082_v6 }
 0x219   : > { %1580 = vmatmul.bf16.gmra.mxu1 %v6085_v18  ;;  %v6322_v2 = vpack.c.bf16 %v5191_v0, %v5189_v5 }
 0x21a   : > { %2107 = vmatmul.bf16.gmra.mxu2 %v6223_v42  ;;  %5192 = vtanh.f32 %v1542_v60 }
 0x21b   : > { %2196 = vmatmul.bf16.gmra.mxu3 %v6228_v50 }
 0x21d   : > { %v2068_v7 = vpop.f32.mrf.mxu2  ;;  %v1454_v49 = vpop.f32.mrf.mxu0 }
 0x21e   : > { %v2069_v44 = vadd.f32 %v2068_v7, %v6276_v32  ;;  %v2157_v39 = vpop.f32.mrf.mxu3  ;;  %v1455_v22 = vadd.f32 %v1454_v49, %v6266_v62  ;;  %v1543_v24 = vpop.f32.mrf.mxu1  ;;  %v4560_v49 = vld [vmem:[#allocation10 + $0x88] sm:$0xf0] }
 0x220   : > { %v6327_v12 = vadd.f32 %v2157_v39, %v2069_v44  ;;  %v1544_v11 = vadd.f32 %v1543_v24, %v1455_v22  ;;  %v5193_v41 = vpop.eup %5192  ;;  %v7010_v44 = vld [vmem:[#allocation20_spill] sm:$0xff] }
 0x221   : > { %v4880_v39 = vld [vmem:[#allocation10 + $0x84] sm:$0xf] }
 0x222   : > { %5194 = vtanh.f32 %v1544_v11  ;;  %v4896_v22 = vld [vmem:[#allocation10 + $0x104] sm:$0xf]  ;;  %v4563_v24 = vor.u32 %v4880_v39, %v4560_v49  ;;  %v4624_v11 = vld [vmem:[#allocation10 + $0x108] sm:$0xf0] }
 0x223   : > { %v4864_v39 = vld [vmem:[#allocation10 + $0x4] sm:$0xf] }
 0x224   : > { %2407 = vmatpush.bf16.msra.mxu2 %v4563_v24 }
 0x225   : > { %v2070_v6 = vpop.f32.mrf.mxu2  ;;  %v1457_v15 = vpop.f32.mrf.mxu0 }
 0x226   : > { %v2071_v18 = vadd.f32 %v2070_v6, %v6276_v32  ;;  %v2159_v21 = vpop.f32.mrf.mxu3  ;;  %v1458_v26 = vadd.f32 %v1457_v15, %v6266_v62  ;;  %v1546_v16 = vpop.f32.mrf.mxu1 }
 0x228   : > { %v6331_v5 = vadd.f32 %v2159_v21, %v2071_v18  ;;  %v5195_v0 = vpop.eup %5194  ;;  %v1547_v7 = vadd.f32 %v1546_v16, %v1458_v26  ;;  %1496 = vmatmul.bf16.gmra.mxu0 %v6100_v4  ;;  %v4627_v18 = vor.u32 %v4896_v22, %v4624_v11 }
 0x229   : > { %1585 = vmatmul.bf16.gmra.mxu1 %v7010_v44  ;;  %v6336_v60 = vpack.c.bf16 %v5195_v0, %v5193_v41  ;;  %v4622_v44 = vld [vmem:[#allocation10 + $0x100] sm:$0xf] }
 0x22a   : > { %7009 = vst [vmem:[#allocation31_spill] sm:$0xff] %v6331_v5  ;;  %2112 = vmatmul.bf16.gmra.mxu2 %v6235_v1  ;;  %2496 = vmatpush.bf16.msra.mxu3 %v4627_v18  ;;  %5196 = vtanh.f32 %v1547_v7  ;;  %v4496_v1 = vld [vmem:[#allocation10 + $0x8] sm:$0xf0] }
 0x22b   : > { %2201 = vmatmul.bf16.gmra.mxu3 %v6240_v58  ;;  %v4897_v58 = vld [vmem:[#allocation10 + $0x104] sm:$0xf0]  ;;  %v4499_v11 = vor.u32 %v4864_v39, %v4496_v1 }
 0x22c   : > { %v4623_v49 = vor.u32 %v4897_v58, %v4622_v44  ;;  %v7012_v58 = vld [vmem:[#allocation22_spill] sm:$0xff] }
 0x22d   : > { %v2073_v6 = vpop.f32.mrf.mxu2  ;;  %v1459_v26 = vpop.f32.mrf.mxu0  ;;  %2318 = vmatpush.bf16.msra.mxu1 %v4499_v11 }
 0x22e   : > { %v2074_v21 = vadd.f32 %v2073_v6, %v6276_v32  ;;  %v2162_v15 = vpop.f32.mrf.mxu3  ;;  %v1460_v4 = vadd.f32 %v1459_v26, %v6266_v62  ;;  %v1548_v16 = vpop.f32.mrf.mxu1  ;;  %2229 = vmatpush.bf16.msra.mxu0 %v4623_v49 }
 0x230   : > { %v6341_v41 = vadd.f32 %v2162_v15, %v2074_v21  ;;  %v1549_v0 = vadd.f32 %v1548_v16, %v1460_v4  ;;  %v5197_v21 = vpop.eup %5196  ;;  %v7011_v16 = vld [vmem:[#allocation21_spill] sm:$0xff] }
 0x232   : > { %5198 = vtanh.f32 %v1549_v0 }
 0x235   : > { %v2075_v22 = vpop.f32.mrf.mxu2  ;;  %v1462_v24 = vpop.f32.mrf.mxu0 }
 0x236   : > { %v2076_v6 = vadd.f32 %v2075_v22, %v6276_v32  ;;  %v2164_v5 = vpop.f32.mrf.mxu3  ;;  %v1463_v26 = vadd.f32 %v1462_v24, %v6266_v62  ;;  %v1551_v18 = vpop.f32.mrf.mxu1 }
 0x238   : > { %v6345_v15 = vadd.f32 %v2164_v5, %v2076_v6  ;;  %v5199_v7 = vpop.eup %5198  ;;  %v1552_v4 = vadd.f32 %v1551_v18, %v1463_v26  ;;  %1501 = vmatmul.bf16.gmra.mxu0 %v7011_v16 }
 0x239   : > { %1590 = vmatmul.bf16.gmra.mxu1 %v7012_v58  ;;  %v6350_v1 = vpack.c.bf16 %v5199_v7, %v5197_v21 }
 0x23a   : > { %2117 = vmatmul.bf16.gmra.mxu2 %v6247_v43  ;;  %5200 = vtanh.f32 %v1552_v4 }
 0x23b   : > { %2206 = vmatmul.bf16.gmra.mxu3 %v6252_v34 }
 0x23d   : > { %v2078_v0 = vpop.f32.mrf.mxu2  ;;  %v1464_v49 = vpop.f32.mrf.mxu0 }
 0x23e   : > { %v2079_v44 = vadd.f32 %v2078_v0, %v6276_v32  ;;  %v2167_v39 = vpop.f32.mrf.mxu3  ;;  %v1465_v5 = vadd.f32 %v1464_v49, %v6266_v62  ;;  %v1553_v22 = vpop.f32.mrf.mxu1  ;;  %v7015_v49 = vld [vmem:[#allocation23_spill] sm:$0xff] }
 0x240   : > { %v6355_v11 = vadd.f32 %v2167_v39, %v2079_v44  ;;  %v1554_v6 = vadd.f32 %v1553_v22, %v1465_v5  ;;  %v5201_v58 = vpop.eup %5200  ;;  %v7016_v44 = vld [vmem:[#allocation24_spill] sm:$0xff]  ;;  %v4926_v39 = vld [vmem:[#allocation11 + $0x74] sm:$0xf]  ;;  %v4744_v5 = vld [vmem:[#allocation11 + $0x78] sm:$0xf0] }
 0x241   : > { %v4942_v22 = vld [vmem:[#allocation11 + $0xf4] sm:$0xf] }
 0x242   : > { %7013 = vst [vmem:[#allocation20_spill] sm:$0xff] %v6355_v11  ;;  %5202 = vtanh.f32 %v1554_v6  ;;  %v4747_v6 = vor.u32 %v4926_v39, %v4744_v5  ;;  %v4806_v39 = vld [vmem:[#allocation11 + $0xf0] sm:$0xf] }
 0x244   : > { %3242 = vmatpush.bf16.msrb.mxu2 %v4747_v6 }
 0x245   : > { %v2080_v24 = vpop.f32.mrf.mxu2  ;;  %v1467_v21 = vpop.f32.mrf.mxu0 }
 0x246   : > { %v2081_v26 = vadd.f32 %v2080_v24, %v6276_v32  ;;  %v2169_v18 = vpop.f32.mrf.mxu3  ;;  %v1468_v7 = vadd.f32 %v1467_v21, %v6266_v62  ;;  %v1556_v16 = vpop.f32.mrf.mxu1  ;;  %v4808_v24 = vld [vmem:[#allocation11 + $0xf8] sm:$0xf0] }
 0x248   : > { %v6359_v0 = vadd.f32 %v2169_v18, %v2081_v26  ;;  %v5203_v34 = vpop.eup %5202  ;;  %v1557_v43 = vadd.f32 %v1556_v16, %v1468_v7  ;;  %1506 = vmatmul.bf16.gmra.mxu0 %v7015_v49  ;;  %v4811_v26 = vor.u32 %v4942_v22, %v4808_v24 }
 0x249   : > { %1595 = vmatmul.bf16.gmra.mxu1 %v7016_v44  ;;  %v6364_v4 = vpack.c.bf16 %v5203_v34, %v5201_v58 }
 0x24a   : > { %7014 = vst [vmem:[#allocation21_spill] sm:$0xff] %v6359_v0  ;;  %2122 = vmatmul.bf16.gmra.mxu2 %v6259_v28  ;;  %3331 = vmatpush.bf16.msrb.mxu3 %v4811_v26  ;;  %5204 = vtanh.f32 %v1557_v43  ;;  %v4927_v28 = vld [vmem:[#allocation11 + $0x74] sm:$0xf0] }
 0x24b   : > { %2211 = vmatmul.bf16.gmra.mxu3 %v6264_v52  ;;  %v4742_v52 = vld [vmem:[#allocation11 + $0x70] sm:$0xf]  ;;  %v4943_v0 = vld [vmem:[#allocation11 + $0xf4] sm:$0xf0] }
 0x24c   : > { %v4743_v5 = vor.u32 %v4927_v28, %v4742_v52  ;;  %v4807_v24 = vor.u32 %v4943_v0, %v4806_v39 }
 0x24d   : > { %v2083_v21 = vpop.f32.mrf.mxu2  ;;  %v1469_v16 = vpop.f32.mrf.mxu0 }
 0x24e   : > { %v2084_v18 = vadd.f32 %v2083_v21, %v6276_v32  ;;  %v2172_v7 = vpop.f32.mrf.mxu3  ;;  %v1470_v49 = vadd.f32 %v1469_v16, %v6266_v62  ;;  %v1558_v44 = vpop.f32.mrf.mxu1  ;;  %3064 = vmatpush.bf16.msrb.mxu0 %v4743_v5  ;;  %3153 = vmatpush.bf16.msrb.mxu1 %v4807_v24 }
 0x250   : > { %v6369_v34 = vadd.f32 %v2172_v7, %v2084_v18  ;;  %v1559_v58 = vadd.f32 %v1558_v44, %v1470_v49  ;;  %v5205_v18 = vpop.eup %5204 }
 0x252   : > { %5206 = vtanh.f32 %v1559_v58 }
 0x255   : > { %v2085_v22 = vpop.f32.mrf.mxu2  ;;  %v1472_v6 = vpop.f32.mrf.mxu0 }
 0x256   : > { %v2086_v21 = vadd.f32 %v2085_v22, %v6276_v32  ;;  %v2174_v11 = vpop.f32.mrf.mxu3  ;;  %v1473_v16 = vadd.f32 %v1472_v6, %v6266_v62  ;;  %v1561_v26 = vpop.f32.mrf.mxu1 }
 0x258   : > { %v6373_v7 = vadd.f32 %v2174_v11, %v2086_v21  ;;  %v5207_v43 = vpop.eup %5206  ;;  %v1562_v49 = vadd.f32 %v1561_v26, %v1473_v16  ;;  %1511 = vmatmul.bf16.gmra.mxu0 %v6154_v59 }
 0x259   : > { %1600 = vmatmul.bf16.gmra.mxu1 %v6157_v30  ;;  %v6378_v28 = vpack.c.bf16 %v5207_v43, %v5205_v18 }
 0x25a   : > { %2127 = vmatmul.bf16.gmra.mxu2 %v6278_v37  ;;  %5208 = vtanh.f32 %v1562_v49 }
 0x25b   : > { %2216 = vmatmul.bf16.gmra.mxu3 %v6285_v40 }
 0x25d   : > { %v2088_v52 = vpop.f32.mrf.mxu2  ;;  %v1474_v58 = vpop.f32.mrf.mxu0 }
 0x25e   : > { %v2089_v0 = vadd.f32 %v2088_v52, %v6276_v32  ;;  %v2177_v44 = vpop.f32.mrf.mxu3  ;;  %v1475_v11 = vadd.f32 %v1474_v58, %v6266_v62  ;;  %v1563_v39 = vpop.f32.mrf.mxu1  ;;  %v4940_v58 = vld [vmem:[#allocation11 + $0xe4] sm:$0xf] }
 0x260   : > { %v6383_v5 = vadd.f32 %v2177_v44, %v2089_v0  ;;  %v1564_v22 = vadd.f32 %v1563_v39, %v1475_v11  ;;  %v5209_v26 = vpop.eup %5208  ;;  %v4924_v0 = vld [vmem:[#allocation11 + $0x64] sm:$0xf]  ;;  %v4736_v44 = vld [vmem:[#allocation11 + $0x68] sm:$0xf0] }
 0x261   : > { %v4739_v11 = vor.u32 %v4924_v0, %v4736_v44  ;;  %v4800_v39 = vld [vmem:[#allocation11 + $0xe8] sm:$0xf0]  ;;  %v4941_v44 = vld [vmem:[#allocation11 + $0xe4] sm:$0xf0] }
 0x262   : > { %5210 = vtanh.f32 %v1564_v22 }
 0x263   : > { %3243 = vmatpush.bf16.msrb.mxu2 %v4739_v11 }
 0x265   : > { %v2090_v59 = vpop.f32.mrf.mxu2  ;;  %v1477_v21 = vpop.f32.mrf.mxu0 }
 0x266   : > { %v2091_v30 = vadd.f32 %v2090_v59, %v6276_v32  ;;  %v2179_v24 = vpop.f32.mrf.mxu3  ;;  %v1478_v6 = vadd.f32 %v1477_v21, %v6266_v62  ;;  %v1566_v16 = vpop.f32.mrf.mxu1  ;;  %v4803_v59 = vor.u32 %v4940_v58, %v4800_v39 }
 0x268   : > { %v6387_v18 = vadd.f32 %v2179_v24, %v2091_v30  ;;  %v5211_v43 = vpop.eup %5210  ;;  %v1567_v52 = vadd.f32 %v1566_v16, %v1478_v6  ;;  %2230 = vmatmul.bf16.vlgmr.msra.gmra.mxu0 %v6292_v10  ;;  %3332 = vmatpush.bf16.msrb.mxu3 %v4803_v59 }
 0x269   : > { %2319 = vmatmul.bf16.vlgmr.msra.gmra.mxu1 %v6057_v33  ;;  %v6392_v49 = vpack.c.bf16 %v5211_v43, %v5209_v26  ;;  %v4925_v26 = vld [vmem:[#allocation11 + $0x64] sm:$0xf0]  ;;  %v4798_v43 = vld [vmem:[#allocation11 + $0xe0] sm:$0xf] }
 0x26a   : > { %7017 = vst [vmem:[#allocation22_spill] sm:$0xff] %v6387_v18  ;;  %2408 = vmatmul.bf16.vlgmr.msra.gmra.mxu2 %v6062_v56  ;;  %5212 = vtanh.f32 %v1567_v52  ;;  %v4799_v39 = vor.u32 %v4941_v44, %v4798_v43 }
 0x26b   : > { %2497 = vmatmul.bf16.vlgmr.msra.gmra.mxu3 %v6292_v10  ;;  %v4734_v10 = vld [vmem:[#allocation11 + $0x60] sm:$0xf] }
 0x26c   : > { %v4735_v0 = vor.u32 %v4925_v26, %v4734_v10  ;;  %3154 = vmatpush.bf16.msrb.mxu1 %v4799_v39 }
 0x26d   : > { %v2093_v22 = vpop.f32.mrf.mxu2  ;;  %v1479_v21 = vpop.f32.mrf.mxu0 }
 0x26e   : > { %v2094_v30 = vadd.f32 %v2093_v22, %v6276_v32  ;;  %v2182_v24 = vpop.f32.mrf.mxu3  ;;  %v1480_v33 = vadd.f32 %v1479_v21, %v6266_v62  ;;  %v1568_v6 = vpop.f32.mrf.mxu1  ;;  %3065 = vmatpush.bf16.msrb.mxu0 %v4735_v0 }
 0x270   : > { %v6397_v56 = vadd.f32 %v2182_v24, %v2094_v30  ;;  %v1569_v16 = vadd.f32 %v1568_v6, %v1480_v33  ;;  %v5213_v30 = vpop.eup %5212 }
 0x272   : > { %5214 = vtanh.f32 %v1569_v16 }
 0x275   : > { %v2095_v58 = vpop.f32.mrf.mxu2  ;;  %v1482_v11 = vpop.f32.mrf.mxu0 }
 0x276   : > { %v2096_v22 = vadd.f32 %v2095_v58, %v6276_v32  ;;  %v2184_v18 = vpop.f32.mrf.mxu3  ;;  %v1483_v21 = vadd.f32 %v1482_v11, %v6266_v62  ;;  %v1571_v59 = vpop.f32.mrf.mxu1 }
 0x278   : > { %v6401_v24 = vadd.f32 %v2184_v18, %v2096_v22  ;;  %v5215_v52 = vpop.eup %5214  ;;  %v1572_v33 = vadd.f32 %v1571_v59, %v1483_v21  ;;  %2235 = vmatmul.bf16.gmra.mxu0 %v6308_v20 }
 0x279   : > { %2324 = vmatmul.bf16.gmra.mxu1 %v6075_v17  ;;  %v6406_v6 = vpack.c.bf16 %v5215_v52, %v5213_v30 }
 0x27a   : > { %2413 = vmatmul.bf16.gmra.mxu2 %v6080_v55  ;;  %5216 = vtanh.f32 %v1572_v33 }
 0x27b   : > { %2502 = vmatmul.bf16.gmra.mxu3 %v6308_v20 }
 0x27d   : > { %v2098_v16 = vpop.f32.mrf.mxu2  ;;  %v1484_v43 = vpop.f32.mrf.mxu0 }
 0x27e   : > { %v2099_v10 = vadd.f32 %v2098_v16, %v6276_v32  ;;  %v2187_v26 = vpop.f32.mrf.mxu3  ;;  %v1485_v18 = vadd.f32 %v1484_v43, %v6266_v62  ;;  %v1573_v0 = vpop.f32.mrf.mxu1  ;;  %v4922_v16 = vld [vmem:[#allocation11 + $0x54] sm:$0xf] }
 0x280   : > { %v6411_v44 = vadd.f32 %v2187_v26, %v2099_v10  ;;  %v1574_v58 = vadd.f32 %v1573_v0, %v1485_v18  ;;  %v5217_v21 = vpop.eup %5216  ;;  %v4728_v10 = vld [vmem:[#allocation11 + $0x58] sm:$0xf0]  ;;  %v4938_v26 = vld [vmem:[#allocation11 + $0xd4] sm:$0xf] }
 0x281   : > { %v4731_v43 = vor.u32 %v4922_v16, %v4728_v10  ;;  %v4792_v18 = vld [vmem:[#allocation11 + $0xd8] sm:$0xf0]  ;;  %v4939_v16 = vld [vmem:[#allocation11 + $0xd4] sm:$0xf0] }
 0x282   : > { %5218 = vtanh.f32 %v1574_v58  ;;  %v4795_v58 = vor.u32 %v4938_v26, %v4792_v18 }
 0x283   : > { %3244 = vmatpush.bf16.msrb.mxu2 %v4731_v43 }
 0x284   : > { %3333 = vmatpush.bf16.msrb.mxu3 %v4795_v58 }
 0x285   : > { %v2100_v17 = vpop.f32.mrf.mxu2  ;;  %v1487_v22 = vpop.f32.mrf.mxu0 }
 0x286   : > { %v2101_v55 = vadd.f32 %v2100_v17, %v6276_v32  ;;  %v2189_v39 = vpop.f32.mrf.mxu3  ;;  %v1488_v20 = vadd.f32 %v1487_v22, %v6266_v62  ;;  %v1576_v11 = vpop.f32.mrf.mxu1 }
 0x288   : > { %v6415_v59 = vadd.f32 %v2189_v39, %v2101_v55  ;;  %v5219_v30 = vpop.eup %5218  ;;  %v1577_v52 = vadd.f32 %v1576_v11, %v1488_v20  ;;  %2240 = vmatmul.bf16.gmra.mxu0 %v6322_v2  ;;  %v4923_v11 = vld [vmem:[#allocation11 + $0x54] sm:$0xf0] }
 0x289   : > { %2329 = vmatmul.bf16.gmra.mxu1 %v6093_v35  ;;  %v6420_v33 = vpack.c.bf16 %v5219_v30, %v5217_v21  ;;  %v4790_v21 = vld [vmem:[#allocation11 + $0xd0] sm:$0xf] }
 0x28a   : > { %2418 = vmatmul.bf16.gmra.mxu2 %v6098_v61  ;;  %5220 = vtanh.f32 %v1577_v52  ;;  %v4791_v26 = vor.u32 %v4939_v16, %v4790_v21 }
 0x28b   : > { %2507 = vmatmul.bf16.gmra.mxu3 %v6322_v2  ;;  %v4726_v2 = vld [vmem:[#allocation11 + $0x50] sm:$0xf] }
 0x28c   : > { %v4727_v30 = vor.u32 %v4923_v11, %v4726_v2  ;;  %3155 = vmatpush.bf16.msrb.mxu1 %v4791_v26 }
 0x28d   : > { %v2103_v0 = vpop.f32.mrf.mxu2  ;;  %v1489_v39 = vpop.f32.mrf.mxu0 }
 0x28e   : > { %v2104_v17 = vadd.f32 %v2103_v0, %v6276_v32  ;;  %v2192_v55 = vpop.f32.mrf.mxu3  ;;  %v1490_v35 = vadd.f32 %v1489_v39, %v6266_v62  ;;  %v1578_v22 = vpop.f32.mrf.mxu1  ;;  %3066 = vmatpush.bf16.msrb.mxu0 %v4727_v30 }
 0x290   : > { %v6425_v61 = vadd.f32 %v2192_v55, %v2104_v17  ;;  %v1579_v20 = vadd.f32 %v1578_v22, %v1490_v35  ;;  %v5221_v17 = vpop.eup %5220 }
 0x292   : > { %5222 = vtanh.f32 %v1579_v20 }
 0x295   : > { %v2105_v10 = vpop.f32.mrf.mxu2  ;;  %v1492_v43 = vpop.f32.mrf.mxu0 }
 0x296   : > { %v2106_v18 = vadd.f32 %v2105_v10, %v6276_v32  ;;  %v2194_v0 = vpop.f32.mrf.mxu3  ;;  %v1493_v39 = vadd.f32 %v1492_v43, %v6266_v62  ;;  %v1581_v58 = vpop.f32.mrf.mxu1 }
 0x298   : > { %v6429_v55 = vadd.f32 %v2194_v0, %v2106_v18  ;;  %v5223_v52 = vpop.eup %5222  ;;  %v1582_v35 = vadd.f32 %v1581_v58, %v1493_v39  ;;  %2245 = vmatmul.bf16.gmra.mxu0 %v6336_v60 }
 0x299   : > { %2334 = vmatmul.bf16.gmra.mxu1 %v6111_v36  ;;  %v6434_v22 = vpack.c.bf16 %v5223_v52, %v5221_v17 }
 0x29a   : > { %2423 = vmatmul.bf16.gmra.mxu2 %v6116_v19  ;;  %5224 = vtanh.f32 %v1582_v35 }
 0x29b   : > { %2512 = vmatmul.bf16.gmra.mxu3 %v6336_v60 }
 0x29d   : > { %v2108_v20 = vpop.f32.mrf.mxu2  ;;  %v1494_v21 = vpop.f32.mrf.mxu0 }
 0x29e   : > { %v2109_v2 = vadd.f32 %v2108_v20, %v6276_v32  ;;  %v2197_v11 = vpop.f32.mrf.mxu3  ;;  %v1495_v30 = vadd.f32 %v1494_v21, %v6266_v62  ;;  %v1583_v16 = vpop.f32.mrf.mxu1  ;;  %v4920_v20 = vld [vmem:[#allocation11 + $0x44] sm:$0xf] }
 0x2a0   : > { %v6439_v10 = vadd.f32 %v2197_v11, %v2109_v2  ;;  %v1584_v26 = vadd.f32 %v1583_v16, %v1495_v30  ;;  %v5225_v39 = vpop.eup %5224  ;;  %v4720_v2 = vld [vmem:[#allocation11 + $0x48] sm:$0xf0]  ;;  %v4936_v11 = vld [vmem:[#allocation11 + $0xc4] sm:$0xf] }
 0x2a1   : > { %v4723_v21 = vor.u32 %v4920_v20, %v4720_v2  ;;  %v4784_v30 = vld [vmem:[#allocation11 + $0xc8] sm:$0xf0]  ;;  %v4937_v20 = vld [vmem:[#allocation11 + $0xc4] sm:$0xf0] }
 0x2a2   : > { %5226 = vtanh.f32 %v1584_v26  ;;  %v4787_v26 = vor.u32 %v4936_v11, %v4784_v30 }
 0x2a3   : > { %3245 = vmatpush.bf16.msrb.mxu2 %v4723_v21 }
 0x2a4   : > { %3334 = vmatpush.bf16.msrb.mxu3 %v4787_v26 }
 0x2a5   : > { %v2110_v36 = vpop.f32.mrf.mxu2  ;;  %v1497_v0 = vpop.f32.mrf.mxu0 }
 0x2a6   : > { %v2111_v19 = vadd.f32 %v2110_v36, %v6276_v32  ;;  %v2199_v18 = vpop.f32.mrf.mxu3  ;;  %v1498_v60 = vadd.f32 %v1497_v0, %v6266_v62  ;;  %v1586_v43 = vpop.f32.mrf.mxu1 }
 0x2a8   : > { %v6443_v58 = vadd.f32 %v2199_v18, %v2111_v19  ;;  %v5227_v17 = vpop.eup %5226  ;;  %v1587_v52 = vadd.f32 %v1586_v43, %v1498_v60  ;;  %2250 = vmatmul.bf16.gmra.mxu0 %v6350_v1  ;;  %v4921_v43 = vld [vmem:[#allocation11 + $0x44] sm:$0xf0] }
 0x2a9   : > { %2339 = vmatmul.bf16.gmra.mxu1 %v6129_v63  ;;  %v6448_v35 = vpack.c.bf16 %v5227_v17, %v5225_v39  ;;  %v4782_v39 = vld [vmem:[#allocation11 + $0xc0] sm:$0xf] }
 0x2aa   : > { %2428 = vmatmul.bf16.gmra.mxu2 %v6134_v45  ;;  %5228 = vtanh.f32 %v1587_v52  ;;  %v4783_v11 = vor.u32 %v4937_v20, %v4782_v39 }
 0x2ab   : > { %2517 = vmatmul.bf16.gmra.mxu3 %v6350_v1  ;;  %v4718_v1 = vld [vmem:[#allocation11 + $0x40] sm:$0xf] }
 0x2ac   : > { %v4719_v17 = vor.u32 %v4921_v43, %v4718_v1  ;;  %3156 = vmatpush.bf16.msrb.mxu1 %v4783_v11 }
 0x2ad   : > { %v2113_v16 = vpop.f32.mrf.mxu2  ;;  %v1499_v18 = vpop.f32.mrf.mxu0 }
 0x2ae   : > { %v2114_v36 = vadd.f32 %v2113_v16, %v6276_v32  ;;  %v2202_v19 = vpop.f32.mrf.mxu3  ;;  %v1500_v63 = vadd.f32 %v1499_v18, %v6266_v62  ;;  %v1588_v0 = vpop.f32.mrf.mxu1  ;;  %3067 = vmatpush.bf16.msrb.mxu0 %v4719_v17 }
 0x2b0   : > { %v6453_v45 = vadd.f32 %v2202_v19, %v2114_v36  ;;  %v1589_v60 = vadd.f32 %v1588_v0, %v1500_v63  ;;  %v5229_v36 = vpop.eup %5228 }
 0x2b2   : > { %5230 = vtanh.f32 %v1589_v60 }
 0x2b5   : > { %v2115_v2 = vpop.f32.mrf.mxu2  ;;  %v1502_v21 = vpop.f32.mrf.mxu0 }
 0x2b6   : > { %v2116_v30 = vadd.f32 %v2115_v2, %v6276_v32  ;;  %v2204_v16 = vpop.f32.mrf.mxu3  ;;  %v1503_v18 = vadd.f32 %v1502_v21, %v6266_v62  ;;  %v1591_v26 = vpop.f32.mrf.mxu1 }
 0x2b8   : > { %v6457_v19 = vadd.f32 %v2204_v16, %v2116_v30  ;;  %v5231_v52 = vpop.eup %5230  ;;  %v1592_v63 = vadd.f32 %v1591_v26, %v1503_v18  ;;  %2255 = vmatmul.bf16.gmra.mxu0 %v6364_v4 }
 0x2b9   : > { %2344 = vmatmul.bf16.gmra.mxu1 %v6147_v31  ;;  %v6462_v0 = vpack.c.bf16 %v5231_v52, %v5229_v36 }
 0x2ba   : > { %2433 = vmatmul.bf16.gmra.mxu2 %v6152_v46  ;;  %5232 = vtanh.f32 %v1592_v63 }
 0x2bb   : > { %2522 = vmatmul.bf16.gmra.mxu3 %v6364_v4 }
 0x2bd   : > { %v2118_v60 = vpop.f32.mrf.mxu2  ;;  %v1504_v39 = vpop.f32.mrf.mxu0 }
 0x2be   : > { %v2119_v1 = vadd.f32 %v2118_v60, %v6276_v32  ;;  %v2207_v43 = vpop.f32.mrf.mxu3  ;;  %v1505_v17 = vadd.f32 %v1504_v39, %v6266_v62  ;;  %v1593_v20 = vpop.f32.mrf.mxu1 }
 0x2c0   : > { %v6467_v2 = vadd.f32 %v2207_v43, %v2119_v1  ;;  %v1594_v11 = vadd.f32 %v1593_v20, %v1505_v17  ;;  %v5233_v18 = vpop.eup %5232 }
 0x2c2   : > { %5234 = vtanh.f32 %v1594_v11 }
 0x2c5   : > { %v2120_v31 = vpop.f32.mrf.mxu2  ;;  %v1507_v16 = vpop.f32.mrf.mxu0 }
 0x2c6   : > { %v2121_v46 = vadd.f32 %v2120_v31, %v6276_v32  ;;  %v2209_v30 = vpop.f32.mrf.mxu3  ;;  %v1508_v4 = vadd.f32 %v1507_v16, %v6266_v62  ;;  %v1596_v21 = vpop.f32.mrf.mxu1 }
 0x2c8   : > { %v6471_v26 = vadd.f32 %v2209_v30, %v2121_v46  ;;  %v5235_v36 = vpop.eup %5234  ;;  %v1597_v52 = vadd.f32 %v1596_v21, %v1508_v4  ;;  %2260 = vmatmul.bf16.gmra.mxu0 %v6378_v28  ;;  %v4712_v46 = vld [vmem:[#allocation11 + $0x38] sm:$0xf0] }
 0x2c9   : > { %2349 = vmatmul.bf16.gmra.mxu1 %v6163_v13  ;;  %v6476_v63 = vpack.c.bf16 %v5235_v36, %v5233_v18  ;;  %v4918_v13 = vld [vmem:[#allocation11 + $0x34] sm:$0xf]  ;;  %v4776_v4 = vld [vmem:[#allocation11 + $0xb8] sm:$0xf0] }
 0x2ca   : > { %2438 = vmatmul.bf16.gmra.mxu2 %v6168_v25  ;;  %5236 = vtanh.f32 %v1597_v52  ;;  %v4934_v25 = vld [vmem:[#allocation11 + $0xb4] sm:$0xf]  ;;  %v4715_v16 = vor.u32 %v4918_v13, %v4712_v46 }
 0x2cb   : > { %2527 = vmatmul.bf16.gmra.mxu3 %v6378_v28  ;;  %v4779_v36 = vor.u32 %v4934_v25, %v4776_v4  ;;  %v4774_v4 = vld [vmem:[#allocation11 + $0xb0] sm:$0xf] }
 0x2cc   : > { %3246 = vmatpush.bf16.msrb.mxu2 %v4715_v16  ;;  %v4919_v16 = vld [vmem:[#allocation11 + $0x34] sm:$0xf0] }
 0x2cd   : > { %v2123_v60 = vpop.f32.mrf.mxu2  ;;  %v1509_v39 = vpop.f32.mrf.mxu0  ;;  %3335 = vmatpush.bf16.msrb.mxu3 %v4779_v36  ;;  %v4935_v36 = vld [vmem:[#allocation11 + $0xb4] sm:$0xf0] }
 0x2ce   : > { %v2124_v1 = vadd.f32 %v2123_v60, %v6276_v32  ;;  %v2212_v43 = vpop.f32.mrf.mxu3  ;;  %v1510_v17 = vadd.f32 %v1509_v39, %v6266_v62  ;;  %v1598_v20 = vpop.f32.mrf.mxu1 }
 0x2d0   : > { %v6481_v11 = vadd.f32 %v2212_v43, %v2124_v1  ;;  %v1599_v31 = vadd.f32 %v1598_v20, %v1510_v17  ;;  %v5237_v1 = vpop.eup %5236 }
 0x2d2   : > { %5238 = vtanh.f32 %v1599_v31 }
 0x2d5   : > { %v2125_v30 = vpop.f32.mrf.mxu2  ;;  %v1512_v18 = vpop.f32.mrf.mxu0 }
 0x2d6   : > { %v2126_v28 = vadd.f32 %v2125_v30, %v6276_v32  ;;  %v2214_v21 = vpop.f32.mrf.mxu3  ;;  %v1513_v60 = vadd.f32 %v1512_v18, %v6266_v62  ;;  %v1601_v39 = vpop.f32.mrf.mxu1  ;;  %v4710_v30 = vld [vmem:[#allocation11 + $0x30] sm:$0xf] }
 0x2d7   : > { %v4711_v18 = vor.u32 %v4919_v16, %v4710_v30 }
 0x2d8   : > { %v6485_v43 = vadd.f32 %v2214_v21, %v2126_v28  ;;  %v5239_v52 = vpop.eup %5238  ;;  %v1602_v17 = vadd.f32 %v1601_v39, %v1513_v60  ;;  %2265 = vmatmul.bf16.gmra.mxu0 %v6392_v49 }
 0x2d9   : > { %2354 = vmatmul.bf16.gmra.mxu1 %v6175_v8  ;;  %v6490_v20 = vpack.c.bf16 %v5239_v52, %v5237_v1  ;;  %3068 = vmatpush.bf16.msrb.mxu0 %v4711_v18 }
 0x2da   : > { %7018 = vst [vmem:[#allocation23_spill] sm:$0xff] %v6485_v43  ;;  %2443 = vmatmul.bf16.gmra.mxu2 %v6180_v47  ;;  %v4775_v47 = vor.u32 %v4935_v36, %v4774_v4  ;;  %5240 = vtanh.f32 %v1602_v17 }
 0x2db   : > { %2532 = vmatmul.bf16.gmra.mxu3 %v6392_v49 }
 0x2dc   : > { %3157 = vmatpush.bf16.msrb.mxu1 %v4775_v47 }
 0x2dd   : > { %v2128_v31 = vpop.f32.mrf.mxu2  ;;  %v1514_v25 = vpop.f32.mrf.mxu0 }
 0x2de   : > { %v2129_v13 = vadd.f32 %v2128_v31, %v6276_v32  ;;  %v2217_v46 = vpop.f32.mrf.mxu3  ;;  %v1515_v28 = vadd.f32 %v1514_v25, %v6266_v62  ;;  %v1603_v21 = vpop.f32.mrf.mxu1 }
 0x2e0   : > { %v6495_v8 = vadd.f32 %v2217_v46, %v2129_v13  ;;  %v1604_v60 = vadd.f32 %v1603_v21, %v1515_v28  ;;  %v5241_v62 = vpop.eup %5240  ;;  %v5501_v13 = vld [vmem:[%s6960_s5] sm:$0x3] }
 0x2e1   : > { %v6504_v46 = vperm.slane %v5501_v13, 1 }
 0x2e2   : > { %5242 = vtanh.f32 %v1604_v60 }
 0x2e5   : > { %v2130_v49 = vpop.f32.mrf.mxu2  ;;  %v2231_v52 = vpop.f32.mrf.mxu0 }
 0x2e6   : > { %v2131_v39 = vadd.f32 %v2130_v49, %v6276_v32  ;;  %v2219_v1 = vpop.f32.mrf.mxu3  ;;  %v2232_v31 = vadd.f32 %v2231_v52, %v6283_v14  ;;  %v2320_v43 = vpop.f32.mrf.mxu1  ;;  %v4932_v52 = vld [vmem:[#allocation11 + $0xa4] sm:$0xf] }
 0x2e7   : > { %v2321_v30 = vadd.f32 %v2320_v43, %v6504_v46 }
 0x2e8   : > { %v6499_v25 = vadd.f32 %v2219_v1, %v2131_v39  ;;  %v5243_v17 = vpop.eup %5242  ;;  %2270 = vmatmul.bf16.gmra.mxu0 %v6406_v6  ;;  %v2578_v14 = vmul.f32 0.5, %v2232_v31  ;;  %v4916_v1 = vld [vmem:[#allocation11 + $0x24] sm:$0xf] }
 0x2e9   : > { %2359 = vmatmul.bf16.gmra.mxu1 %v6187_v53  ;;  %v6509_v32 = vpack.c.bf16 %v5243_v17, %v5241_v62  ;;  %v4768_v17 = vld [vmem:[#allocation11 + $0xa8] sm:$0xf0] }
 0x2ea   : > { %2448 = vmatmul.bf16.gmra.mxu2 %v6192_v54  ;;  %5244 = vtanh.f32 %v2578_v14 }
 0x2eb   : > { %2537 = vmatmul.bf16.gmra.mxu3 %v6406_v6  ;;  %v4704_v6 = vld [vmem:[#allocation11 + $0x28] sm:$0xf0] }
 0x2ec   : > { %v4707_v13 = vor.u32 %v4916_v1, %v4704_v6 }
 0x2ed   : > { %v2409_v16 = vpop.f32.mrf.mxu2  ;;  %v2233_v21 = vpop.f32.mrf.mxu0 }
 0x2ee   : > { %v2410_v4 = vadd.f32 %v2409_v16, %v2321_v30  ;;  %v2498_v28 = vpop.f32.mrf.mxu3  ;;  %v2234_v18 = vadd.f32 %v2233_v21, %v6289_v57  ;;  %v2322_v36 = vpop.f32.mrf.mxu1  ;;  %v4771_v30 = vor.u32 %v4932_v52, %v4768_v17  ;;  %3247 = vmatpush.bf16.msrb.mxu2 %v4707_v13 }
 0x2ef   : > { %v2323_v54 = vadd.f32 %v2322_v36, %v6504_v46 }
 0x2f0   : > { %v2499_v47 = vadd.f32 %v2498_v28, %v2410_v4  ;;  %v2580_v60 = vmul.f32 0.5, %v2234_v18  ;;  %v5245_v49 = vpop.eup %5244  ;;  %3336 = vmatpush.bf16.msrb.mxu3 %v4771_v30 }
 0x2f1   : > { %v2706_v16 = vadd.f32 1.0, %v5245_v49  ;;  %v4917_v49 = vld [vmem:[#allocation11 + $0x24] sm:$0xf0] }
 0x2f2   : > { %5246 = vtanh.f32 %v2580_v60  ;;  %v2579_v53 = vmul.f32 0.5, %v2499_v47 }
 0x2f4   : > { %5248 = vtanh.f32 %v2579_v53 }
 0x2f5   : > { %v2411_v39 = vpop.f32.mrf.mxu2  ;;  %v2236_v62 = vpop.f32.mrf.mxu0 }
 0x2f6   : > { %v2412_v43 = vadd.f32 %v2411_v39, %v2323_v54  ;;  %v2500_v31 = vpop.f32.mrf.mxu3  ;;  %v2237_v14 = vadd.f32 %v2236_v62, %v6299_v29  ;;  %v2325_v57 = vpop.f32.mrf.mxu1  ;;  %v2770_v29 = vmul.f32 0.5, %v2706_v16  ;;  %v4702_v54 = vld [vmem:[#allocation11 + $0x20] sm:$0xf] }
 0x2f7   : > { %v2326_v60 = vadd.f32 %v2325_v57, %v6504_v46 }
 0x2f8   : > { %v2501_v4 = vadd.f32 %v2500_v31, %v2412_v43  ;;  %v5247_v28 = vpop.eup %5246  ;;  %2275 = vmatmul.bf16.gmra.mxu0 %v6420_v33  ;;  %v2582_v36 = vmul.f32 0.5, %v2237_v14  ;;  %v4766_v31 = vld [vmem:[#allocation11 + $0xa0] sm:$0xf] }
 0x2f9   : > { %v2708_v21 = vadd.f32 1.0, %v5247_v28  ;;  %2364 = vmatmul.bf16.gmra.mxu1 %v6199_v23  ;;  %v4703_v23 = vor.u32 %v4917_v49, %v4702_v54 }
 0x2fa   : > { %v2581_v18 = vmul.f32 0.5, %v2501_v4  ;;  %2453 = vmatmul.bf16.gmra.mxu2 %v6204_v3  ;;  %v5249_v39 = vpop.eup %5248  ;;  %v4933_v3 = vld [vmem:[#allocation11 + $0xa4] sm:$0xf0] }
 0x2fb   : > { %2542 = vmatmul.bf16.gmra.mxu3 %v6420_v33  ;;  %v2772_v47 = vmul.f32 0.5, %v2708_v21  ;;  %v4767_v13 = vor.u32 %v4933_v3, %v4766_v31  ;;  %3069 = vmatpush.bf16.msrb.mxu0 %v4703_v23  ;;  %v2707_v14 = vadd.f32 1.0, %v5249_v39 }
 0x2fc   : > { %5250 = vtanh.f32 %v2581_v18 }
 0x2fd   : > { %v2414_v53 = vpop.f32.mrf.mxu2  ;;  %v6521_v1 = vpack.c.bf16 %v2772_v47, %v2770_v29  ;;  %v2238_v43 = vpop.f32.mrf.mxu0  ;;  %5252 = vtanh.f32 %v2582_v36  ;;  %3158 = vmatpush.bf16.msrb.mxu1 %v4767_v13  ;;  %v2771_v18 = vmul.f32 0.5, %v2707_v14 }
 0x2fe   : > { %v2415_v6 = vadd.f32 %v2414_v53, %v2326_v60  ;;  %v2503_v52 = vpop.f32.mrf.mxu3  ;;  %v2239_v33 = vadd.f32 %v2238_v43, %v6303_v51  ;;  %v2327_v62 = vpop.f32.mrf.mxu1 }
 0x2ff   : > { %v2328_v28 = vadd.f32 %v2327_v62, %v6504_v46 }
 0x300   : > { %v2504_v17 = vadd.f32 %v2503_v52, %v2415_v6  ;;  %v2584_v57 = vmul.f32 0.5, %v2239_v33 }
 0x302   : > { %v5251_v30 = vpop.eup %5250  ;;  %5254 = vtanh.f32 %v2584_v57  ;;  %v2583_v4 = vmul.f32 0.5, %v2504_v17 }
 0x303   : > { %v2709_v16 = vadd.f32 1.0, %v5251_v30  ;;  %v5253_v21 = vpop.eup %5252 }
 0x304   : > { %v2710_v39 = vadd.f32 1.0, %v5253_v21  ;;  %5256 = vtanh.f32 %v2583_v4 }
 0x305   : > { %v2773_v29 = vmul.f32 0.5, %v2709_v16  ;;  %v2416_v47 = vpop.f32.mrf.mxu2  ;;  %v2241_v51 = vpop.f32.mrf.mxu0 }
 0x306   : > { %v2417_v36 = vadd.f32 %v2416_v47, %v2328_v28  ;;  %v2505_v60 = vpop.f32.mrf.mxu3  ;;  %v2242_v54 = vadd.f32 %v2241_v51, %v6313_v38  ;;  %v2330_v49 = vpop.f32.mrf.mxu1  ;;  %v2774_v3 = vmul.f32 0.5, %v2710_v39 }
 0x307   : > { %v6525_v53 = vpack.c.bf16 %v2773_v29, %v2771_v18  ;;  %v2331_v38 = vadd.f32 %v2330_v49, %v6504_v46  ;;  %v4696_v49 = vld [vmem:[#allocation11 + $0x18] sm:$0xf0] }
 0x308   : > { %v2506_v6 = vadd.f32 %v2505_v60, %v2417_v36  ;;  %v5255_v52 = vpop.eup %5254  ;;  %2280 = vmatmul.bf16.gmra.mxu0 %v6434_v22  ;;  %v2586_v31 = vmul.f32 0.5, %v2242_v54  ;;  %v4914_v54 = vld [vmem:[#allocation11 + $0x14] sm:$0xf] }
 0x309   : > { %v2712_v43 = vadd.f32 1.0, %v5255_v52  ;;  %2369 = vmatmul.bf16.gmra.mxu1 %v6211_v27 }
 0x30a   : > { %v2585_v23 = vmul.f32 0.5, %v2506_v6  ;;  %2458 = vmatmul.bf16.gmra.mxu2 %v6216_v48  ;;  %v5257_v13 = vpop.eup %5256 }
 0x30b   : > { %2547 = vmatmul.bf16.gmra.mxu3 %v6434_v22  ;;  %v2776_v33 = vmul.f32 0.5, %v2712_v43  ;;  %v2711_v4 = vadd.f32 1.0, %v5257_v13  ;;  %v4930_v43 = vld [vmem:[#allocation11 + $0x94] sm:$0xf] }
 0x30c   : > { %5258 = vtanh.f32 %v2585_v23  ;;  %v4760_v23 = vld [vmem:[#allocation11 + $0x98] sm:$0xf0] }
 0x30d   : > { %v2419_v62 = vpop.f32.mrf.mxu2  ;;  %v2243_v57 = vpop.f32.mrf.mxu0  ;;  %v6533_v30 = vpack.c.bf16 %v2776_v33, %v2774_v3  ;;  %5260 = vtanh.f32 %v2586_v31  ;;  %v2775_v36 = vmul.f32 0.5, %v2711_v4  ;;  %v4763_v33 = vor.u32 %v4930_v43, %v4760_v23 }
 0x30e   : > { %v2420_v17 = vadd.f32 %v2419_v62, %v2331_v38  ;;  %v2508_v14 = vpop.f32.mrf.mxu3  ;;  %v2244_v27 = vadd.f32 %v2243_v57, %v6317_v9  ;;  %v2332_v16 = vpop.f32.mrf.mxu1  ;;  %v4699_v9 = vor.u32 %v4914_v54, %v4696_v49 }
 0x30f   : > { %v2333_v29 = vadd.f32 %v2332_v16, %v6504_v46  ;;  %3337 = vmatpush.bf16.msrb.mxu3 %v4763_v33 }
 0x310   : > { %v2509_v48 = vadd.f32 %v2508_v14, %v2420_v17  ;;  %v2588_v28 = vmul.f32 0.5, %v2244_v27  ;;  %3248 = vmatpush.bf16.msrb.mxu2 %v4699_v9 }
 0x312   : > { %v5259_v22 = vpop.eup %5258  ;;  %5262 = vtanh.f32 %v2588_v28  ;;  %v2587_v18 = vmul.f32 0.5, %v2509_v48  ;;  %v4694_v28 = vld [vmem:[#allocation11 + $0x10] sm:$0xf] }
 0x313   : > { %v2713_v21 = vadd.f32 1.0, %v5259_v22  ;;  %v5261_v47 = vpop.eup %5260  ;;  %v4915_v22 = vld [vmem:[#allocation11 + $0x14] sm:$0xf0] }
 0x314   : > { %v2714_v62 = vadd.f32 1.0, %v5261_v47  ;;  %5264 = vtanh.f32 %v2587_v18 }
 0x315   : > { %v2777_v60 = vmul.f32 0.5, %v2713_v21  ;;  %v2421_v51 = vpop.f32.mrf.mxu2  ;;  %v2246_v52 = vpop.f32.mrf.mxu0 }
 0x316   : > { %v2422_v39 = vadd.f32 %v2421_v51, %v2333_v29  ;;  %v2510_v6 = vpop.f32.mrf.mxu3  ;;  %v2247_v31 = vadd.f32 %v2246_v52, %v6327_v12  ;;  %v2335_v3 = vpop.f32.mrf.mxu1  ;;  %v2778_v12 = vmul.f32 0.5, %v2714_v62 }
 0x317   : > { %v6538_v38 = vpack.c.bf16 %v2777_v60, %v2775_v36  ;;  %v2336_v48 = vadd.f32 %v2335_v3, %v6504_v46  ;;  %v4695_v36 = vor.u32 %v4915_v22, %v4694_v28  ;;  %v4758_v60 = vld [vmem:[#allocation11 + $0x90] sm:$0xf] }
 0x318   : > { %v2511_v13 = vadd.f32 %v2510_v6, %v2422_v39  ;;  %v5263_v17 = vpop.eup %5262  ;;  %2285 = vmatmul.bf16.gmra.mxu0 %v6448_v35  ;;  %v2590_v27 = vmul.f32 0.5, %v2247_v31 }
 0x319   : > { %v2716_v14 = vadd.f32 1.0, %v5263_v17  ;;  %2374 = vmatmul.bf16.gmra.mxu1 %v6223_v42  ;;  %v4931_v42 = vld [vmem:[#allocation11 + $0x94] sm:$0xf0]  ;;  %3070 = vmatpush.bf16.msrb.mxu0 %v4695_v36 }
 0x31a   : > { %v2589_v57 = vmul.f32 0.5, %v2511_v13  ;;  %2463 = vmatmul.bf16.gmra.mxu2 %v6228_v50  ;;  %v5265_v21 = vpop.eup %5264  ;;  %v7019_v50 = vld [vmem:[#allocation31_spill] sm:$0xff]  ;;  %v4759_v49 = vor.u32 %v4931_v42, %v4758_v60 }
 0x31b   : > { %2552 = vmatmul.bf16.gmra.mxu3 %v6448_v35  ;;  %v2780_v16 = vmul.f32 0.5, %v2716_v14  ;;  %v2715_v6 = vadd.f32 1.0, %v5265_v21 }
 0x31c   : > { %5266 = vtanh.f32 %v2589_v57  ;;  %3159 = vmatpush.bf16.msrb.mxu1 %v4759_v49 }
 0x31d   : > { %v2424_v4 = vpop.f32.mrf.mxu2  ;;  %v2248_v47 = vpop.f32.mrf.mxu0  ;;  %v6545_v51 = vpack.c.bf16 %v2780_v16, %v2778_v12  ;;  %5268 = vtanh.f32 %v2590_v27  ;;  %v2779_v33 = vmul.f32 0.5, %v2715_v6 }
 0x31e   : > { %v2425_v18 = vadd.f32 %v2424_v4, %v2336_v48  ;;  %v2513_v29 = vpop.f32.mrf.mxu3  ;;  %v2249_v35 = vadd.f32 %v2248_v47, %v7019_v50  ;;  %v2337_v54 = vpop.f32.mrf.mxu1 }
 0x31f   : > { %v2338_v31 = vadd.f32 %v2337_v54, %v6504_v46 }
 0x320   : > { %v2514_v39 = vadd.f32 %v2513_v29, %v2425_v18  ;;  %v2592_v52 = vmul.f32 0.5, %v2249_v35  ;;  %v7020_v18 = vld [vmem:[#allocation25_spill] sm:$0xff]  ;;  %v7021_v29 = vld [vmem:[#allocation26_spill] sm:$0xff] }
 0x322   : > { %v5267_v9 = vpop.eup %5266  ;;  %5270 = vtanh.f32 %v2592_v52  ;;  %v2591_v23 = vmul.f32 0.5, %v2514_v39 }
 0x323   : > { %v2717_v43 = vadd.f32 1.0, %v5267_v9  ;;  %v5269_v3 = vpop.eup %5268 }
 0x324   : > { %v2718_v48 = vadd.f32 1.0, %v5269_v3  ;;  %5272 = vtanh.f32 %v2591_v23 }
 0x325   : > { %v2781_v62 = vmul.f32 0.5, %v2717_v43  ;;  %v2426_v13 = vpop.f32.mrf.mxu2  ;;  %v2251_v57 = vpop.f32.mrf.mxu0 }
 0x326   : > { %v2427_v17 = vadd.f32 %v2426_v13, %v2338_v31  ;;  %v2515_v14 = vpop.f32.mrf.mxu3  ;;  %v2252_v27 = vadd.f32 %v2251_v57, %v6341_v41  ;;  %v2340_v12 = vpop.f32.mrf.mxu1  ;;  %v2782_v36 = vmul.f32 0.5, %v2718_v48  ;;  %v4912_v57 = vld [vmem:[#allocation11 + $0x4] sm:$0xf] }
 0x327   : > { %v6550_v16 = vpack.c.bf16 %v2781_v62, %v2779_v33  ;;  %v2341_v60 = vadd.f32 %v2340_v12, %v6504_v46 }
 0x328   : > { %v2516_v4 = vadd.f32 %v2515_v14, %v2427_v17  ;;  %v5271_v28 = vpop.eup %5270  ;;  %2290 = vmatmul.bf16.gmra.mxu0 %v6462_v0  ;;  %v2594_v47 = vmul.f32 0.5, %v2252_v27  ;;  %v4688_v27 = vld [vmem:[#allocation11 + $0x8] sm:$0xf0] }
 0x329   : > { %v2720_v22 = vadd.f32 1.0, %v5271_v28  ;;  %2379 = vmatmul.bf16.gmra.mxu1 %v7020_v18  ;;  %v4928_v28 = vld [vmem:[#allocation11 + $0x84] sm:$0xf] }
 0x32a   : > { %v2593_v21 = vmul.f32 0.5, %v2516_v4  ;;  %2468 = vmatmul.bf16.gmra.mxu2 %v7021_v29  ;;  %v5273_v50 = vpop.eup %5272 }
 0x32b   : > { %2557 = vmatmul.bf16.gmra.mxu3 %v6462_v0  ;;  %v2784_v41 = vmul.f32 0.5, %v2720_v22  ;;  %v2719_v43 = vadd.f32 1.0, %v5273_v50  ;;  %v4752_v22 = vld [vmem:[#allocation11 + $0x88] sm:$0xf0] }
 0x32c   : > { %5274 = vtanh.f32 %v2593_v21  ;;  %v7022_v21 = vld [vmem:[#allocation20_spill] sm:$0xff] }
 0x32d   : > { %v2429_v42 = vpop.f32.mrf.mxu2  ;;  %v2253_v49 = vpop.f32.mrf.mxu0  ;;  %v6557_v39 = vpack.c.bf16 %v2784_v41, %v2782_v36  ;;  %5276 = vtanh.f32 %v2594_v47  ;;  %v2783_v13 = vmul.f32 0.5, %v2719_v43  ;;  %v4755_v47 = vor.u32 %v4928_v28, %v4752_v22 }
 0x32e   : > { %v2430_v35 = vadd.f32 %v2429_v42, %v2341_v60  ;;  %v2518_v54 = vpop.f32.mrf.mxu3  ;;  %v2254_v6 = vadd.f32 %v2253_v49, %v6345_v15  ;;  %v2342_v52 = vpop.f32.mrf.mxu1  ;;  %v4691_v15 = vor.u32 %v4912_v57, %v4688_v27  ;;  %v7024_v49 = vld [vmem:[#allocation28_spill] sm:$0xff]  ;;  %v4929_v57 = vld [vmem:[#allocation11 + $0x84] sm:$0xf0] }
 0x32f   : > { %v2343_v33 = vadd.f32 %v2342_v52, %v6504_v46  ;;  %3338 = vmatpush.bf16.msrb.mxu3 %v4755_v47 }
 0x330   : > { %v2519_v9 = vadd.f32 %v2518_v54, %v2430_v35  ;;  %v2596_v23 = vmul.f32 0.5, %v2254_v6  ;;  %3249 = vmatpush.bf16.msrb.mxu2 %v4691_v15  ;;  %v7023_v54 = vld [vmem:[#allocation27_spill] sm:$0xff] }
 0x332   : > { %v5275_v0 = vpop.eup %5274  ;;  %5278 = vtanh.f32 %v2596_v23  ;;  %v2595_v3 = vmul.f32 0.5, %v2519_v9 }
 0x333   : > { %v2721_v31 = vadd.f32 1.0, %v5275_v0  ;;  %v5277_v62 = vpop.eup %5276  ;;  %v4686_v0 = vld [vmem:[#allocation11] sm:$0xf] }
 0x334   : > { %v2722_v41 = vadd.f32 1.0, %v5277_v62  ;;  %5280 = vtanh.f32 %v2595_v3 }
 0x335   : > { %v2785_v17 = vmul.f32 0.5, %v2721_v31  ;;  %v2431_v14 = vpop.f32.mrf.mxu2  ;;  %v2256_v4 = vpop.f32.mrf.mxu0  ;;  %v4913_v31 = vld [vmem:[#allocation11 + $0x4] sm:$0xf0] }
 0x336   : > { %v2432_v12 = vadd.f32 %v2431_v14, %v2343_v33  ;;  %v2520_v48 = vpop.f32.mrf.mxu3  ;;  %v2257_v18 = vadd.f32 %v2256_v4, %v7022_v21  ;;  %v2345_v29 = vpop.f32.mrf.mxu1  ;;  %v2786_v52 = vmul.f32 0.5, %v2722_v41  ;;  %v4750_v14 = vld [vmem:[#allocation11 + $0x80] sm:$0xf] }
 0x337   : > { %v6562_v36 = vpack.c.bf16 %v2785_v17, %v2783_v13  ;;  %v2346_v43 = vadd.f32 %v2345_v29, %v6504_v46  ;;  %v4687_v17 = vor.u32 %v4913_v31, %v4686_v0  ;;  %v4751_v4 = vor.u32 %v4929_v57, %v4750_v14 }
 0x338   : > { %v2521_v60 = vadd.f32 %v2520_v48, %v2432_v12  ;;  %v5279_v42 = vpop.eup %5278  ;;  %2295 = vmatmul.bf16.gmra.mxu0 %v6476_v63  ;;  %v2598_v6 = vmul.f32 0.5, %v2257_v18  ;;  %v7025_v12 = vld [vmem:[#allocation21_spill] sm:$0xff] }
 0x339   : > { %v2724_v50 = vadd.f32 1.0, %v5279_v42  ;;  %2384 = vmatmul.bf16.gmra.mxu1 %v7023_v54  ;;  %3071 = vmatpush.bf16.msrb.mxu0 %v4687_v17 }
 0x33a   : > { %v2597_v35 = vmul.f32 0.5, %v2521_v60  ;;  %2473 = vmatmul.bf16.gmra.mxu2 %v7024_v49  ;;  %v5281_v3 = vpop.eup %5280  ;;  %3160 = vmatpush.bf16.msrb.mxu1 %v4751_v4 }
 0x33b   : > { %2562 = vmatmul.bf16.gmra.mxu3 %v6476_v63  ;;  %v2788_v9 = vmul.f32 0.5, %v2724_v50  ;;  %v2723_v28 = vadd.f32 1.0, %v5281_v3 }
 0x33c   : > { %5282 = vtanh.f32 %v2597_v35 }
 0x33d   : > { %v2434_v23 = vpop.f32.mrf.mxu2  ;;  %v2258_v13 = vpop.f32.mrf.mxu0  ;;  %v6569_v27 = vpack.c.bf16 %v2788_v9, %v2786_v52  ;;  %5284 = vtanh.f32 %v2598_v6  ;;  %v2787_v60 = vmul.f32 0.5, %v2723_v28 }
 0x33e   : > { %v2435_v33 = vadd.f32 %v2434_v23, %v2346_v43  ;;  %v2523_v62 = vpop.f32.mrf.mxu3  ;;  %v2259_v63 = vadd.f32 %v2258_v13, %v7025_v12  ;;  %v2347_v48 = vpop.f32.mrf.mxu1 }
 0x33f   : > { %v2348_v47 = vadd.f32 %v2347_v48, %v6504_v46 }
 0x340   : > { %v2524_v15 = vadd.f32 %v2523_v62, %v2435_v33  ;;  %v2600_v22 = vmul.f32 0.5, %v2259_v63  ;;  %v7026_v33 = vld [vmem:[#allocation29_spill] sm:$0xff]  ;;  %v7027_v62 = vld [vmem:[#allocation30_spill] sm:$0xff] }
 0x342   : > { %v5283_v21 = vpop.eup %5282  ;;  %5286 = vtanh.f32 %v2600_v22  ;;  %v2599_v29 = vmul.f32 0.5, %v2524_v15 }
 0x343   : > { %v2725_v18 = vadd.f32 1.0, %v5283_v21  ;;  %v5285_v41 = vpop.eup %5284 }
 0x344   : > { %v2726_v43 = vadd.f32 1.0, %v5285_v41  ;;  %5288 = vtanh.f32 %v2599_v29 }
 0x345   : > { %v2789_v42 = vmul.f32 0.5, %v2725_v18  ;;  %v2436_v50 = vpop.f32.mrf.mxu2  ;;  %v2261_v49 = vpop.f32.mrf.mxu0 }
 0x346   : > { %v2437_v35 = vadd.f32 %v2436_v50, %v2348_v47  ;;  %v2525_v54 = vpop.f32.mrf.mxu3  ;;  %v2262_v6 = vadd.f32 %v2261_v49, %v6369_v34  ;;  %v2350_v52 = vpop.f32.mrf.mxu1  ;;  %v2790_v17 = vmul.f32 0.5, %v2726_v43 }
 0x347   : > { %v6574_v9 = vpack.c.bf16 %v2789_v42, %v2787_v60  ;;  %v2351_v14 = vadd.f32 %v2350_v52, %v6504_v46 }
 0x348   : > { %v2526_v23 = vadd.f32 %v2525_v54, %v2437_v35  ;;  %v5287_v0 = vpop.eup %5286  ;;  %2300 = vmatmul.bf16.gmra.mxu0 %v6490_v20  ;;  %v2602_v13 = vmul.f32 0.5, %v2262_v6 }
 0x349   : > { %v2728_v31 = vadd.f32 1.0, %v5287_v0  ;;  %2389 = vmatmul.bf16.gmra.mxu1 %v7026_v33 }
 0x34a   : > { %v2601_v3 = vmul.f32 0.5, %v2526_v23  ;;  %2478 = vmatmul.bf16.gmra.mxu2 %v7027_v62  ;;  %v5289_v12 = vpop.eup %5288 }
 0x34b   : > { %2567 = vmatmul.bf16.gmra.mxu3 %v6490_v20  ;;  %v2792_v34 = vmul.f32 0.5, %v2728_v31  ;;  %v2727_v18 = vadd.f32 1.0, %v5289_v12 }
 0x34c   : > { %5290 = vtanh.f32 %v2601_v3 }
 0x34d   : > { %v2439_v57 = vpop.f32.mrf.mxu2  ;;  %v2263_v4 = vpop.f32.mrf.mxu0  ;;  %v6581_v15 = vpack.c.bf16 %v2792_v34, %v2790_v17  ;;  %5292 = vtanh.f32 %v2602_v13  ;;  %v2791_v50 = vmul.f32 0.5, %v2727_v18 }
 0x34e   : > { %v2440_v63 = vadd.f32 %v2439_v57, %v2351_v14  ;;  %v2528_v48 = vpop.f32.mrf.mxu3  ;;  %v2264_v28 = vadd.f32 %v2263_v4, %v6373_v7  ;;  %v2352_v22 = vpop.f32.mrf.mxu1 }
 0x34f   : > { %v2353_v60 = vadd.f32 %v2352_v22, %v6504_v46 }
 0x350   : > { %v2529_v21 = vadd.f32 %v2528_v48, %v2440_v63  ;;  %v2604_v29 = vmul.f32 0.5, %v2264_v28  ;;  %v7028_v28 = vld [vmem:[#allocation22_spill] sm:$0xff] }
 0x352   : > { %v5291_v20 = vpop.eup %5290  ;;  %5294 = vtanh.f32 %v2604_v29  ;;  %v2603_v41 = vmul.f32 0.5, %v2529_v21 }
 0x353   : > { %v2729_v47 = vadd.f32 1.0, %v5291_v20  ;;  %v5293_v42 = vpop.eup %5292 }
 0x354   : > { %v2730_v0 = vadd.f32 1.0, %v5293_v42  ;;  %5296 = vtanh.f32 %v2603_v41 }
 0x355   : > { %v2793_v35 = vmul.f32 0.5, %v2729_v47  ;;  %v2441_v54 = vpop.f32.mrf.mxu2  ;;  %v2266_v52 = vpop.f32.mrf.mxu0 }
 0x356   : > { %v2442_v49 = vadd.f32 %v2441_v54, %v2353_v60  ;;  %v2530_v6 = vpop.f32.mrf.mxu3  ;;  %v2267_v43 = vadd.f32 %v2266_v52, %v6383_v5  ;;  %v2355_v7 = vpop.f32.mrf.mxu1  ;;  %v2794_v17 = vmul.f32 0.5, %v2730_v0 }
 0x357   : > { %v6586_v23 = vpack.c.bf16 %v2793_v35, %v2791_v50  ;;  %v2356_v34 = vadd.f32 %v2355_v7, %v6504_v46 }
 0x358   : > { %v2531_v31 = vadd.f32 %v2530_v6, %v2442_v49  ;;  %v5295_v3 = vpop.eup %5294  ;;  %2305 = vmatmul.bf16.gmra.mxu0 %v6509_v32  ;;  %v2606_v13 = vmul.f32 0.5, %v2267_v43 }
 0x359   : > { %v2732_v33 = vadd.f32 1.0, %v5295_v3  ;;  %2394 = vmatmul.bf16.gmra.mxu1 %v6278_v37 }
 0x35a   : > { %v2605_v62 = vmul.f32 0.5, %v2531_v31  ;;  %2483 = vmatmul.bf16.gmra.mxu2 %v6285_v40  ;;  %v5297_v57 = vpop.eup %5296 }
 0x35b   : > { %2572 = vmatmul.bf16.gmra.mxu3 %v6509_v32  ;;  %v2796_v5 = vmul.f32 0.5, %v2732_v33  ;;  %v2731_v21 = vadd.f32 1.0, %v5297_v57 }
 0x35c   : > { %5298 = vtanh.f32 %v2605_v62 }
 0x35d   : > { %v2444_v14 = vpop.f32.mrf.mxu2  ;;  %v2268_v48 = vpop.f32.mrf.mxu0  ;;  %v6593_v4 = vpack.c.bf16 %v2796_v5, %v2794_v17  ;;  %5300 = vtanh.f32 %v2606_v13  ;;  %v2795_v60 = vmul.f32 0.5, %v2731_v21 }
 0x35e   : > { %v2445_v12 = vadd.f32 %v2444_v14, %v2356_v34  ;;  %v2533_v63 = vpop.f32.mrf.mxu3  ;;  %v2269_v37 = vadd.f32 %v2268_v48, %v7028_v28  ;;  %v2357_v22 = vpop.f32.mrf.mxu1 }
 0x35f   : > { %v2358_v47 = vadd.f32 %v2357_v22, %v6504_v46 }
 0x360   : > { %v2534_v40 = vadd.f32 %v2533_v63, %v2445_v12  ;;  %v2608_v18 = vmul.f32 0.5, %v2269_v37 }
 0x362   : > { %v5299_v32 = vpop.eup %5298  ;;  %5302 = vtanh.f32 %v2608_v18  ;;  %v2607_v20 = vmul.f32 0.5, %v2534_v40 }
 0x363   : > { %v2733_v29 = vadd.f32 1.0, %v5299_v32  ;;  %v5301_v41 = vpop.eup %5300 }
 0x364   : > { %v2734_v7 = vadd.f32 1.0, %v5301_v41  ;;  %5304 = vtanh.f32 %v2607_v20 }
 0x365   : > { %v2797_v42 = vmul.f32 0.5, %v2733_v29  ;;  %v2446_v50 = vpop.f32.mrf.mxu2  ;;  %v2271_v49 = vpop.f32.mrf.mxu0 }
 0x366   : > { %v2447_v35 = vadd.f32 %v2446_v50, %v2358_v47  ;;  %v2535_v54 = vpop.f32.mrf.mxu3  ;;  %v2272_v6 = vadd.f32 %v2271_v49, %v6397_v56  ;;  %v2360_v52 = vpop.f32.mrf.mxu1  ;;  %v2798_v13 = vmul.f32 0.5, %v2734_v7 }
 0x367   : > { %v6598_v43 = vpack.c.bf16 %v2797_v42, %v2795_v60  ;;  %v2361_v17 = vadd.f32 %v2360_v52, %v6504_v46 }
 0x368   : > { %v2536_v0 = vadd.f32 %v2535_v54, %v2447_v35  ;;  %v5303_v31 = vpop.eup %5302  ;;  %3072 = vmatmul.bf16.vlgmr.msrb.gmra.mxu0 %v6521_v1  ;;  %v2610_v62 = vmul.f32 0.5, %v2272_v6 }
 0x369   : > { %v2736_v3 = vadd.f32 1.0, %v5303_v31  ;;  %3161 = vmatmul.bf16.vlgmr.msrb.gmra.mxu1 %v6525_v53 }
 0x36a   : > { %v2609_v33 = vmul.f32 0.5, %v2536_v0  ;;  %3250 = vmatmul.bf16.vlgmr.msrb.gmra.mxu2 %v6521_v1  ;;  %v5305_v34 = vpop.eup %5304 }
 0x36b   : > { %3339 = vmatmul.bf16.vlgmr.msrb.gmra.mxu3 %v6525_v53  ;;  %v2800_v56 = vmul.f32 0.5, %v2736_v3  ;;  %v2735_v37 = vadd.f32 1.0, %v5305_v34 }
 0x36c   : > { %5306 = vtanh.f32 %v2609_v33 }
 0x36d   : > { %v2449_v5 = vpop.f32.mrf.mxu2  ;;  %v2273_v12 = vpop.f32.mrf.mxu0  ;;  %v6605_v63 = vpack.c.bf16 %v2800_v56, %v2798_v13  ;;  %5308 = vtanh.f32 %v2610_v62  ;;  %v2799_v29 = vmul.f32 0.5, %v2735_v37 }
 0x36e   : > { %v2450_v14 = vadd.f32 %v2449_v5, %v2361_v17  ;;  %v2538_v57 = vpop.f32.mrf.mxu3  ;;  %v2274_v48 = vadd.f32 %v2273_v12, %v6401_v24  ;;  %v2362_v28 = vpop.f32.mrf.mxu1 }
 0x36f   : > { %v2363_v18 = vadd.f32 %v2362_v28, %v6504_v46 }
 0x370   : > { %v2539_v1 = vadd.f32 %v2538_v57, %v2450_v14  ;;  %v2612_v22 = vmul.f32 0.5, %v2274_v48 }
 0x372   : > { %v5307_v53 = vpop.eup %5306  ;;  %5310 = vtanh.f32 %v2612_v22  ;;  %v2611_v21 = vmul.f32 0.5, %v2539_v1 }
 0x373   : > { %v2737_v40 = vadd.f32 1.0, %v5307_v53  ;;  %v5309_v32 = vpop.eup %5308 }
 0x374   : > { %v2738_v54 = vadd.f32 1.0, %v5309_v32  ;;  %5312 = vtanh.f32 %v2611_v21 }
 0x375   : > { %v2801_v20 = vmul.f32 0.5, %v2737_v40  ;;  %v2451_v47 = vpop.f32.mrf.mxu2  ;;  %v2276_v42 = vpop.f32.mrf.mxu0 }
 0x376   : > { %v2452_v41 = vadd.f32 %v2451_v47, %v2363_v18  ;;  %v2540_v60 = vpop.f32.mrf.mxu3  ;;  %v2277_v50 = vadd.f32 %v2276_v42, %v6411_v44  ;;  %v2365_v24 = vpop.f32.mrf.mxu1  ;;  %v2802_v31 = vmul.f32 0.5, %v2738_v54 }
 0x377   : > { %v6610_v35 = vpack.c.bf16 %v2801_v20, %v2799_v29  ;;  %v2366_v3 = vadd.f32 %v2365_v24, %v6504_v46 }
 0x378   : > { %v2541_v49 = vadd.f32 %v2540_v60, %v2452_v41  ;;  %v5311_v6 = vpop.eup %5310  ;;  %3077 = vmatmul.bf16.gmra.mxu0 %v6533_v30  ;;  %v2614_v0 = vmul.f32 0.5, %v2277_v50 }
 0x379   : > { %v2740_v52 = vadd.f32 1.0, %v5311_v6  ;;  %3166 = vmatmul.bf16.gmra.mxu1 %v6538_v38 }
 0x37a   : > { %v2613_v7 = vmul.f32 0.5, %v2541_v49  ;;  %3255 = vmatmul.bf16.gmra.mxu2 %v6533_v30  ;;  %v5313_v62 = vpop.eup %5312 }
 0x37b   : > { %3344 = vmatmul.bf16.gmra.mxu3 %v6538_v38  ;;  %v2804_v44 = vmul.f32 0.5, %v2740_v52  ;;  %v2739_v57 = vadd.f32 1.0, %v5313_v62 }
 0x37c   : > { %5314 = vtanh.f32 %v2613_v7 }
 0x37d   : > { %v2454_v33 = vpop.f32.mrf.mxu2  ;;  %v2278_v17 = vpop.f32.mrf.mxu0  ;;  %v6617_v5 = vpack.c.bf16 %v2804_v44, %v2802_v31  ;;  %5316 = vtanh.f32 %v2614_v0  ;;  %v2803_v22 = vmul.f32 0.5, %v2739_v57 }
 0x37e   : > { %v2455_v13 = vadd.f32 %v2454_v33, %v2366_v3  ;;  %v2543_v56 = vpop.f32.mrf.mxu3  ;;  %v2279_v34 = vadd.f32 %v2278_v17, %v6415_v59  ;;  %v2367_v14 = vpop.f32.mrf.mxu1 }
 0x37f   : > { %v2368_v1 = vadd.f32 %v2367_v14, %v6504_v46 }
 0x380   : > { %v2544_v30 = vadd.f32 %v2543_v56, %v2455_v13  ;;  %v2616_v12 = vmul.f32 0.5, %v2279_v34 }
 0x382   : > { %v5315_v38 = vpop.eup %5314  ;;  %5318 = vtanh.f32 %v2616_v12  ;;  %v2615_v28 = vmul.f32 0.5, %v2544_v30 }
 0x383   : > { %v2741_v48 = vadd.f32 1.0, %v5315_v38  ;;  %v5317_v37 = vpop.eup %5316 }
 0x384   : > { %v2742_v47 = vadd.f32 1.0, %v5317_v37  ;;  %5320 = vtanh.f32 %v2615_v28 }
 0x385   : > { %v2805_v53 = vmul.f32 0.5, %v2741_v48  ;;  %v2456_v40 = vpop.f32.mrf.mxu2  ;;  %v2281_v32 = vpop.f32.mrf.mxu0 }
 0x386   : > { %v2457_v21 = vadd.f32 %v2456_v40, %v2368_v1  ;;  %v2545_v18 = vpop.f32.mrf.mxu3  ;;  %v2282_v29 = vadd.f32 %v2281_v32, %v6425_v61  ;;  %v2370_v59 = vpop.f32.mrf.mxu1  ;;  %v2806_v54 = vmul.f32 0.5, %v2742_v47 }
 0x387   : > { %v6622_v20 = vpack.c.bf16 %v2805_v53, %v2803_v22  ;;  %v2371_v49 = vadd.f32 %v2370_v59, %v6504_v46 }
 0x388   : > { %v2546_v41 = vadd.f32 %v2545_v18, %v2457_v21  ;;  %v5319_v60 = vpop.eup %5318  ;;  %3082 = vmatmul.bf16.gmra.mxu0 %v6545_v51  ;;  %v2618_v24 = vmul.f32 0.5, %v2282_v29 }
 0x389   : > { %v2744_v42 = vadd.f32 1.0, %v5319_v60  ;;  %3171 = vmatmul.bf16.gmra.mxu1 %v6550_v16 }
 0x38a   : > { %v2617_v50 = vmul.f32 0.5, %v2546_v41  ;;  %3260 = vmatmul.bf16.gmra.mxu2 %v6545_v51  ;;  %v5321_v52 = vpop.eup %5320 }
 0x38b   : > { %3349 = vmatmul.bf16.gmra.mxu3 %v6550_v16  ;;  %v2808_v61 = vmul.f32 0.5, %v2744_v42  ;;  %v2743_v62 = vadd.f32 1.0, %v5321_v52 }
 0x38c   : > { %5322 = vtanh.f32 %v2617_v50 }
 0x38d   : > { %v2459_v6 = vpop.f32.mrf.mxu2  ;;  %v2283_v31 = vpop.f32.mrf.mxu0  ;;  %v6629_v44 = vpack.c.bf16 %v2808_v61, %v2806_v54  ;;  %5324 = vtanh.f32 %v2618_v24  ;;  %v2807_v30 = vmul.f32 0.5, %v2743_v62 }
 0x38e   : > { %v2460_v7 = vadd.f32 %v2459_v6, %v2371_v49  ;;  %v2548_v0 = vpop.f32.mrf.mxu3  ;;  %v2284_v3 = vadd.f32 %v2283_v31, %v6429_v55  ;;  %v2372_v33 = vpop.f32.mrf.mxu1 }
 0x38f   : > { %v2373_v34 = vadd.f32 %v2372_v33, %v6504_v46 }
 0x390   : > { %v2549_v51 = vadd.f32 %v2548_v0, %v2460_v7  ;;  %v2620_v13 = vmul.f32 0.5, %v2284_v3 }
 0x392   : > { %v5323_v16 = vpop.eup %5322  ;;  %5326 = vtanh.f32 %v2620_v13  ;;  %v2619_v17 = vmul.f32 0.5, %v2549_v51 }
 0x393   : > { %v2745_v56 = vadd.f32 1.0, %v5323_v16  ;;  %v5325_v14 = vpop.eup %5324 }
 0x394   : > { %v2746_v22 = vadd.f32 1.0, %v5325_v14  ;;  %5328 = vtanh.f32 %v2619_v17 }
 0x395   : > { %v2809_v57 = vmul.f32 0.5, %v2745_v56  ;;  %v2461_v12 = vpop.f32.mrf.mxu2  ;;  %v2286_v28 = vpop.f32.mrf.mxu0 }
 0x396   : > { %v2462_v38 = vadd.f32 %v2461_v12, %v2373_v34  ;;  %v2550_v48 = vpop.f32.mrf.mxu3  ;;  %v2287_v1 = vadd.f32 %v2286_v28, %v6439_v10  ;;  %v2375_v55 = vpop.f32.mrf.mxu1  ;;  %v2810_v29 = vmul.f32 0.5, %v2746_v22 }
 0x397   : > { %v6634_v37 = vpack.c.bf16 %v2809_v57, %v2807_v30  ;;  %v2376_v59 = vadd.f32 %v2375_v55, %v6504_v46 }
 0x398   : > { %v2551_v53 = vadd.f32 %v2550_v48, %v2462_v38  ;;  %v5327_v40 = vpop.eup %5326  ;;  %3087 = vmatmul.bf16.gmra.mxu0 %v6557_v39  ;;  %v2622_v32 = vmul.f32 0.5, %v2287_v1 }
 0x399   : > { %v2748_v21 = vadd.f32 1.0, %v5327_v40  ;;  %3176 = vmatmul.bf16.gmra.mxu1 %v6562_v36 }
 0x39a   : > { %v2621_v18 = vmul.f32 0.5, %v2551_v53  ;;  %3265 = vmatmul.bf16.gmra.mxu2 %v6557_v39  ;;  %v5329_v41 = vpop.eup %5328 }
 0x39b   : > { %3354 = vmatmul.bf16.gmra.mxu3 %v6562_v36  ;;  %v2812_v10 = vmul.f32 0.5, %v2748_v21  ;;  %v2747_v49 = vadd.f32 1.0, %v5329_v41 }
 0x39c   : > { %5330 = vtanh.f32 %v2621_v18 }
 0x39d   : > { %v2464_v47 = vpop.f32.mrf.mxu2  ;;  %v2288_v50 = vpop.f32.mrf.mxu0  ;;  %v6641_v24 = vpack.c.bf16 %v2812_v10, %v2810_v29  ;;  %5332 = vtanh.f32 %v2622_v32  ;;  %v2811_v3 = vmul.f32 0.5, %v2747_v49 }
 0x39e   : > { %v2465_v60 = vadd.f32 %v2464_v47, %v2376_v59  ;;  %v2553_v42 = vpop.f32.mrf.mxu3  ;;  %v2289_v54 = vadd.f32 %v2288_v50, %v6443_v58  ;;  %v2377_v61 = vpop.f32.mrf.mxu1 }
 0x39f   : > { %v2378_v0 = vadd.f32 %v2377_v61, %v6504_v46 }
 0x3a0   : > { %v2554_v39 = vadd.f32 %v2553_v42, %v2465_v60  ;;  %v2624_v6 = vmul.f32 0.5, %v2289_v54 }
 0x3a2   : > { %v5331_v36 = vpop.eup %5330  ;;  %5334 = vtanh.f32 %v2624_v6  ;;  %v2623_v7 = vmul.f32 0.5, %v2554_v39 }
 0x3a3   : > { %v2749_v52 = vadd.f32 1.0, %v5331_v36  ;;  %v5333_v31 = vpop.eup %5332 }
 0x3a4   : > { %v2750_v34 = vadd.f32 1.0, %v5333_v31  ;;  %5336 = vtanh.f32 %v2623_v7 }
 0x3a5   : > { %v2813_v33 = vmul.f32 0.5, %v2749_v52  ;;  %v2466_v51 = vpop.f32.mrf.mxu2  ;;  %v2291_v16 = vpop.f32.mrf.mxu0 }
 0x3a6   : > { %v2467_v62 = vadd.f32 %v2466_v51, %v2378_v0  ;;  %v2555_v13 = vpop.f32.mrf.mxu3  ;;  %v2292_v56 = vadd.f32 %v2291_v16, %v6453_v45  ;;  %v2380_v58 = vpop.f32.mrf.mxu1  ;;  %v2814_v48 = vmul.f32 0.5, %v2750_v34 }
 0x3a7   : > { %v6646_v17 = vpack.c.bf16 %v2813_v33, %v2811_v3  ;;  %v2381_v28 = vadd.f32 %v2380_v58, %v6504_v46 }
 0x3a8   : > { %v2556_v14 = vadd.f32 %v2555_v13, %v2467_v62  ;;  %v5335_v30 = vpop.eup %5334  ;;  %3092 = vmatmul.bf16.gmra.mxu0 %v6569_v27  ;;  %v2626_v38 = vmul.f32 0.5, %v2292_v56 }
 0x3a9   : > { %v2752_v57 = vadd.f32 1.0, %v5335_v30  ;;  %3181 = vmatmul.bf16.gmra.mxu1 %v6574_v9 }
 0x3aa   : > { %v2625_v12 = vmul.f32 0.5, %v2556_v14  ;;  %3270 = vmatmul.bf16.gmra.mxu2 %v6569_v27  ;;  %v5337_v55 = vpop.eup %5336 }
 0x3ab   : > { %3359 = vmatmul.bf16.gmra.mxu3 %v6574_v9  ;;  %v2816_v45 = vmul.f32 0.5, %v2752_v57  ;;  %v2751_v29 = vadd.f32 1.0, %v5337_v55 }
 0x3ac   : > { %5338 = vtanh.f32 %v2625_v12 }
 0x3ad   : > { %v2469_v1 = vpop.f32.mrf.mxu2  ;;  %v2293_v40 = vpop.f32.mrf.mxu0  ;;  %v6653_v21 = vpack.c.bf16 %v2816_v45, %v2814_v48  ;;  %5340 = vtanh.f32 %v2626_v38  ;;  %v2815_v42 = vmul.f32 0.5, %v2751_v29 }
 0x3ae   : > { %v2470_v22 = vadd.f32 %v2469_v1, %v2381_v28  ;;  %v2558_v53 = vpop.f32.mrf.mxu3  ;;  %v2294_v18 = vadd.f32 %v2293_v40, %v6457_v19  ;;  %v2382_v32 = vpop.f32.mrf.mxu1 }
 0x3af   : > { %v2383_v41 = vadd.f32 %v2382_v32, %v6504_v46 }
 0x3b0   : > { %v2559_v27 = vadd.f32 %v2558_v53, %v2470_v22  ;;  %v2628_v10 = vmul.f32 0.5, %v2294_v18 }
 0x3b2   : > { %v5339_v9 = vpop.eup %5338  ;;  %5342 = vtanh.f32 %v2628_v10  ;;  %v2627_v47 = vmul.f32 0.5, %v2559_v27 }
 0x3b3   : > { %v2753_v59 = vadd.f32 1.0, %v5339_v9  ;;  %v5341_v60 = vpop.eup %5340 }
 0x3b4   : > { %v2754_v52 = vadd.f32 1.0, %v5341_v60  ;;  %5344 = vtanh.f32 %v2627_v47 }
 0x3b5   : > { %v2817_v50 = vmul.f32 0.5, %v2753_v59  ;;  %v2471_v54 = vpop.f32.mrf.mxu2  ;;  %v2296_v49 = vpop.f32.mrf.mxu0 }
 0x3b6   : > { %v2472_v61 = vadd.f32 %v2471_v54, %v2383_v41  ;;  %v2560_v39 = vpop.f32.mrf.mxu3  ;;  %v2297_v6 = vadd.f32 %v2296_v49, %v6467_v2  ;;  %v2385_v19 = vpop.f32.mrf.mxu1  ;;  %v2818_v51 = vmul.f32 0.5, %v2754_v52  ;;  %v7029_v52 = vld [vmem:[#allocation23_spill] sm:$0xff] }
 0x3b7   : > { %v6658_v36 = vpack.c.bf16 %v2817_v50, %v2815_v42  ;;  %v2386_v62 = vadd.f32 %v2385_v19, %v6504_v46 }
 0x3b8   : > { %v2561_v7 = vadd.f32 %v2560_v39, %v2472_v61  ;;  %v5343_v0 = vpop.eup %5342  ;;  %3097 = vmatmul.bf16.gmra.mxu0 %v6581_v15  ;;  %v2630_v33 = vmul.f32 0.5, %v2297_v6 }
 0x3b9   : > { %v2756_v31 = vadd.f32 1.0, %v5343_v0  ;;  %3186 = vmatmul.bf16.gmra.mxu1 %v6586_v23 }
 0x3ba   : > { %v2629_v3 = vmul.f32 0.5, %v2561_v7  ;;  %3275 = vmatmul.bf16.gmra.mxu2 %v6581_v15  ;;  %v5345_v16 = vpop.eup %5344 }
 0x3bb   : > { %3364 = vmatmul.bf16.gmra.mxu3 %v6586_v23  ;;  %v2820_v2 = vmul.f32 0.5, %v2756_v31  ;;  %v2755_v12 = vadd.f32 1.0, %v5345_v16 }
 0x3bc   : > { %5346 = vtanh.f32 %v2629_v3 }
 0x3bd   : > { %v2474_v13 = vpop.f32.mrf.mxu2  ;;  %v2298_v34 = vpop.f32.mrf.mxu0  ;;  %v6665_v14 = vpack.c.bf16 %v2820_v2, %v2818_v51  ;;  %5348 = vtanh.f32 %v2630_v33  ;;  %v2819_v55 = vmul.f32 0.5, %v2755_v12 }
 0x3be   : > { %v2475_v56 = vadd.f32 %v2474_v13, %v2386_v62  ;;  %v2563_v58 = vpop.f32.mrf.mxu3  ;;  %v2299_v30 = vadd.f32 %v2298_v34, %v6471_v26  ;;  %v2387_v57 = vpop.f32.mrf.mxu1 }
 0x3bf   : > { %v2388_v28 = vadd.f32 %v2387_v57, %v6504_v46 }
 0x3c0   : > { %v2564_v15 = vadd.f32 %v2563_v58, %v2475_v56  ;;  %v2632_v38 = vmul.f32 0.5, %v2299_v30 }
 0x3c2   : > { %v5347_v23 = vpop.eup %5346  ;;  %5350 = vtanh.f32 %v2632_v38  ;;  %v2631_v45 = vmul.f32 0.5, %v2564_v15 }
 0x3c3   : > { %v2757_v48 = vadd.f32 1.0, %v5347_v23  ;;  %v5349_v1 = vpop.eup %5348 }
 0x3c4   : > { %v2758_v10 = vadd.f32 1.0, %v5349_v1  ;;  %5352 = vtanh.f32 %v2631_v45 }
 0x3c5   : > { %v2821_v22 = vmul.f32 0.5, %v2757_v48  ;;  %v2476_v53 = vpop.f32.mrf.mxu2  ;;  %v2301_v32 = vpop.f32.mrf.mxu0 }
 0x3c6   : > { %v2477_v40 = vadd.f32 %v2476_v53, %v2388_v28  ;;  %v2565_v18 = vpop.f32.mrf.mxu3  ;;  %v2302_v27 = vadd.f32 %v2301_v32, %v6481_v11  ;;  %v2390_v26 = vpop.f32.mrf.mxu1  ;;  %v2822_v42 = vmul.f32 0.5, %v2758_v10 }
 0x3c7   : > { %v6670_v29 = vpack.c.bf16 %v2821_v22, %v2819_v55  ;;  %v2391_v50 = vadd.f32 %v2390_v26, %v6504_v46 }
 0x3c8   : > { %v2566_v9 = vadd.f32 %v2565_v18, %v2477_v40  ;;  %v5351_v59 = vpop.eup %5350  ;;  %3102 = vmatmul.bf16.gmra.mxu0 %v6593_v4  ;;  %v2634_v60 = vmul.f32 0.5, %v2302_v27 }
 0x3c9   : > { %v2760_v47 = vadd.f32 1.0, %v5351_v59  ;;  %3191 = vmatmul.bf16.gmra.mxu1 %v6598_v43 }
 0x3ca   : > { %v2633_v41 = vmul.f32 0.5, %v2566_v9  ;;  %3280 = vmatmul.bf16.gmra.mxu2 %v6593_v4  ;;  %v5353_v61 = vpop.eup %5352 }
 0x3cb   : > { %3369 = vmatmul.bf16.gmra.mxu3 %v6598_v43  ;;  %v2824_v11 = vmul.f32 0.5, %v2760_v47  ;;  %v2759_v31 = vadd.f32 1.0, %v5353_v61 }
 0x3cc   : > { %5354 = vtanh.f32 %v2633_v41 }
 0x3cd   : > { %v2479_v54 = vpop.f32.mrf.mxu2  ;;  %v2303_v6 = vpop.f32.mrf.mxu0  ;;  %v6677_v19 = vpack.c.bf16 %v2824_v11, %v2822_v42  ;;  %5356 = vtanh.f32 %v2634_v60  ;;  %v2823_v62 = vmul.f32 0.5, %v2759_v31 }
 0x3ce   : > { %v2480_v39 = vadd.f32 %v2479_v54, %v2391_v50  ;;  %v2568_v49 = vpop.f32.mrf.mxu3  ;;  %v2304_v7 = vadd.f32 %v2303_v6, %v7029_v52  ;;  %v2392_v0 = vpop.f32.mrf.mxu1 }
 0x3cf   : > { %v2393_v51 = vadd.f32 %v2392_v0, %v6504_v46 }
 0x3d0   : > { %v2569_v4 = vadd.f32 %v2568_v49, %v2480_v39  ;;  %v2636_v3 = vmul.f32 0.5, %v2304_v7 }
 0x3d2   : > { %v5355_v43 = vpop.eup %5354  ;;  %5358 = vtanh.f32 %v2636_v3  ;;  %v2635_v16 = vmul.f32 0.5, %v2569_v4 }
 0x3d3   : > { %v2761_v33 = vadd.f32 1.0, %v5355_v43  ;;  %v5357_v2 = vpop.eup %5356 }
 0x3d4   : > { %v2762_v38 = vadd.f32 1.0, %v5357_v2  ;;  %5360 = vtanh.f32 %v2635_v16 }
 0x3d5   : > { %v2825_v13 = vmul.f32 0.5, %v2761_v33  ;;  %v2481_v56 = vpop.f32.mrf.mxu2  ;;  %v2306_v30 = vpop.f32.mrf.mxu0 }
 0x3d6   : > { %v2482_v58 = vadd.f32 %v2481_v56, %v2393_v51  ;;  %v2570_v34 = vpop.f32.mrf.mxu3  ;;  %v2307_v57 = vadd.f32 %v2306_v30, %v6495_v8  ;;  %v2395_v15 = vpop.f32.mrf.mxu1  ;;  %v2826_v55 = vmul.f32 0.5, %v2762_v38 }
 0x3d7   : > { %v6682_v12 = vpack.c.bf16 %v2825_v13, %v2823_v62  ;;  %v2396_v22 = vadd.f32 %v2395_v15, %v6504_v46 }
 0x3d8   : > { %v2571_v23 = vadd.f32 %v2570_v34, %v2482_v58  ;;  %v5359_v48 = vpop.eup %5358  ;;  %3107 = vmatmul.bf16.gmra.mxu0 %v6605_v63  ;;  %v2638_v1 = vmul.f32 0.5, %v2307_v57 }
 0x3d9   : > { %v2764_v45 = vadd.f32 1.0, %v5359_v48  ;;  %3196 = vmatmul.bf16.gmra.mxu1 %v6610_v35 }
 0x3da   : > { %v2637_v28 = vmul.f32 0.5, %v2571_v23  ;;  %3285 = vmatmul.bf16.gmra.mxu2 %v6605_v63  ;;  %v5361_v26 = vpop.eup %5360 }
 0x3db   : > { %3374 = vmatmul.bf16.gmra.mxu3 %v6610_v35  ;;  %v2828_v8 = vmul.f32 0.5, %v2764_v45  ;;  %v2763_v35 = vadd.f32 1.0, %v5361_v26 }
 0x3dc   : > { %5362 = vtanh.f32 %v2637_v28 }
 0x3dd   : > { %v2484_v53 = vpop.f32.mrf.mxu2  ;;  %v2308_v32 = vpop.f32.mrf.mxu0  ;;  %v6689_v27 = vpack.c.bf16 %v2828_v8, %v2826_v55  ;;  %5364 = vtanh.f32 %v2638_v1  ;;  %v2827_v61 = vmul.f32 0.5, %v2763_v35 }
 0x3de   : > { %v2485_v40 = vadd.f32 %v2484_v53, %v2396_v22  ;;  %v2573_v18 = vpop.f32.mrf.mxu3  ;;  %v2309_v10 = vadd.f32 %v2308_v32, %v6499_v25  ;;  %v2397_v9 = vpop.f32.mrf.mxu1  ;;  %v2898_v25 = vld [vmem:[%s6962_s7] sm:$0x3] }
 0x3df   : > { %v2398_v42 = vadd.f32 %v2397_v9, %v6504_v46  ;;  %v6699_v43 = vperm.slane %v2898_v25, 0  ;;  %v6704_v2 = vperm.slane %v2898_v25, 1 }
 0x3e0   : > { %v2574_v63 = vadd.f32 %v2573_v18, %v2485_v40  ;;  %v2640_v59 = vmul.f32 0.5, %v2309_v10 }
 0x3e2   : > { %v5363_v47 = vpop.eup %5362  ;;  %5366 = vtanh.f32 %v2640_v59  ;;  %v2639_v60 = vmul.f32 0.5, %v2574_v63 }
 0x3e3   : > { %v2765_v41 = vadd.f32 1.0, %v5363_v47  ;;  %v5365_v11 = vpop.eup %5364 }
 0x3e4   : > { %v2766_v7 = vadd.f32 1.0, %v5365_v11  ;;  %5368 = vtanh.f32 %v2639_v60 }
 0x3e5   : > { %v2829_v50 = vmul.f32 0.5, %v2765_v41  ;;  %v2486_v54 = vpop.f32.mrf.mxu2  ;;  %v3073_v6 = vpop.f32.mrf.mxu0 }
 0x3e6   : > { %v2487_v39 = vadd.f32 %v2486_v54, %v2398_v42  ;;  %v2575_v49 = vpop.f32.mrf.mxu3  ;;  %v3162_v52 = vpop.f32.mrf.mxu1  ;;  %v2830_v33 = vmul.f32 0.5, %v2766_v7  ;;  %v3074_v16 = vadd.f32 %v3073_v6, %v6699_v43 }
 0x3e7   : > { %v6696_v4 = vpack.c.bf16 %v2829_v50, %v2827_v61 }
 0x3e8   : > { %v2576_v0 = vadd.f32 %v2575_v49, %v2487_v39  ;;  %v5367_v31 = vpop.eup %5366  ;;  %3112 = vmatmul.bf16.gmra.mxu0 %v6617_v5  ;;  %v3163_v23 = vadd.f32 %v3162_v52, %v3074_v16 }
 0x3e9   : > { %v2768_v46 = vadd.f32 1.0, %v5367_v31  ;;  %3201 = vmatmul.bf16.gmra.mxu1 %v6622_v20 }
 0x3ea   : > { %v2641_v3 = vmul.f32 0.5, %v2576_v0  ;;  %3290 = vmatmul.bf16.gmra.mxu2 %v6617_v5  ;;  %v5369_v13 = vpop.eup %5368 }
 0x3eb   : > { %3379 = vmatmul.bf16.gmra.mxu3 %v6622_v20  ;;  %v2832_v51 = vmul.f32 0.5, %v2768_v46  ;;  %v2767_v5 = vadd.f32 1.0, %v5369_v13  ;;  %v4021_v46 = vld [vmem:[%s6726_s27] sm:$0xff] }
 0x3ec   : > { %5370 = vtanh.f32 %v2641_v3 }
 0x3ed   : > { %v3251_v62 = vpop.f32.mrf.mxu2  ;;  %v3075_v58 = vpop.f32.mrf.mxu0  ;;  %v6707_v34 = vpack.c.bf16 %v2832_v51, %v2830_v33  ;;  %v2831_v45 = vmul.f32 0.5, %v2767_v5 }
 0x3ee   : > { %v3340_v56 = vpop.f32.mrf.mxu3  ;;  %v3076_v30 = vadd.f32 %v3075_v58, %v6699_v43  ;;  %v3164_v57 = vpop.f32.mrf.mxu1  ;;  %v3252_v20 = vadd.f32 %v3251_v62, %v6704_v2 }
 0x3f0   : > { %v3165_v15 = vadd.f32 %v3164_v57, %v3076_v30  ;;  %v3341_v1 = vadd.f32 %v3340_v56, %v3252_v20 }
 0x3f2   : > { %v5371_v38 = vpop.eup %5370  ;;  %5372 = vtanh.f32 %v3165_v15 }
 0x3f3   : > { %v2769_v48 = vadd.f32 1.0, %v5371_v38  ;;  %5374 = vtanh.f32 %v3163_v23 }
 0x3f4   : > { %5376 = vtanh.f32 %v3341_v1  ;;  %v4024_v1 = vld [vmem:[%s6726_s27 + $0x8] sm:$0xff] }
 0x3f5   : > { %v2833_v28 = vmul.f32 0.5, %v2769_v48  ;;  %v3253_v55 = vpop.f32.mrf.mxu2  ;;  %v3078_v53 = vpop.f32.mrf.mxu0 }
 0x3f6   : > { %v3254_v8 = vadd.f32 %v3253_v55, %v6704_v2  ;;  %v3342_v22 = vpop.f32.mrf.mxu3  ;;  %v3079_v40 = vadd.f32 %v3078_v53, %v6699_v43  ;;  %v3167_v18 = vpop.f32.mrf.mxu1 }
 0x3f7   : > { %v6714_v32 = vpack.c.bf16 %v2833_v28, %v2831_v45 }
 0x3f8   : > { %v3343_v26 = vadd.f32 %v3342_v22, %v3254_v8  ;;  %v3168_v10 = vadd.f32 %v3167_v18, %v3079_v40  ;;  %3117 = vmatmul.bf16.gmra.mxu0 %v6629_v44  ;;  %v5373_v9 = vpop.eup %5372 }
 0x3f9   : > { %3206 = vmatmul.bf16.gmra.mxu1 %v6634_v37  ;;  %v5375_v63 = vpop.eup %5374 }
 0x3fa   : > { %5378 = vtanh.f32 %v3343_v26  ;;  %3295 = vmatmul.bf16.gmra.mxu2 %v6629_v44  ;;  %v3580_v59 = vmax.f32 %v5375_v63, %v5373_v9  ;;  %v5377_v42 = vpop.eup %5376 }
 0x3fb   : > { %3384 = vmatmul.bf16.gmra.mxu3 %v6634_v37  ;;  %5380 = vtanh.f32 %v3168_v10 }
 0x3fc   : > { %v3797_v37 = vrot.slane %v3580_v59, 1 }
 0x3fd   : > { %v3256_v47 = vpop.f32.mrf.mxu2  ;;  %v3080_v60 = vpop.f32.mrf.mxu0 }
 0x3fe   : > { %v3257_v35 = vadd.f32 %v3256_v47, %v6704_v2  ;;  %v3345_v41 = vpop.f32.mrf.mxu3  ;;  %v3081_v11 = vadd.f32 %v3080_v60, %v6699_v43  ;;  %v3169_v50 = vpop.f32.mrf.mxu1  ;;  %v3921_v25 = vmax.f32 %v3580_v59, %v3797_v37 }
 0x400   : > { %v5379_v54 = vpop.eup %5378  ;;  %v3346_v44 = vadd.f32 %v3345_v41, %v3257_v35  ;;  %v3170_v39 = vadd.f32 %v3169_v50, %v3081_v11  ;;  %v4027_v11 = vld [vmem:[%s6726_s27 + $0x10] sm:$0xff] }
 0x401   : > { %v3581_v61 = vmax.f32 %v5377_v42, %v5379_v54  ;;  %v5381_v49 = vpop.eup %5380 }
 0x402   : > { %5382 = vtanh.f32 %v3346_v44  ;;  %v3582_v7 = vmax.f32 %v5373_v9, %v5381_v49 }
 0x403   : > { %v3798_v6 = vrot.slane %v3581_v61, 1  ;;  %5384 = vtanh.f32 %v3170_v39 }
 0x404   : > { %v3799_v57 = vrot.slane %v3582_v7, 1 }
 0x405   : > { %v3922_v52 = vmax.f32 %v3581_v61, %v3798_v6  ;;  %v3258_v0 = vpop.f32.mrf.mxu2  ;;  %v3083_v51 = vpop.f32.mrf.mxu0 }
 0x406   : > { %v3259_v3 = vadd.f32 %v3258_v0, %v6704_v2  ;;  %v3347_v33 = vpop.f32.mrf.mxu3  ;;  %v3084_v13 = vadd.f32 %v3083_v51, %v6699_v43  ;;  %v3172_v16 = vpop.f32.mrf.mxu1  ;;  %v3923_v23 = vmax.f32 %v3582_v7, %v3799_v57 }
 0x407   : > { %v3983_v62 = vpack.c.bf16 %v3922_v52, %v3921_v25 }
 0x408   : > { %v5383_v56 = vpop.eup %5382  ;;  %v3348_v58 = vadd.f32 %v3347_v33, %v3259_v3  ;;  %v3173_v20 = vadd.f32 %v3172_v16, %v3084_v13  ;;  %3122 = vmatmul.bf16.gmra.mxu0 %v6641_v24  ;;  %v4030_v16 = vld [vmem:[%s6726_s27 + $0x18] sm:$0xff] }
 0x409   : > { %v4022_v30 = vsel %vm6728_vm6, %v3983_v62, %v4021_v46  ;;  %v3583_v5 = vmax.f32 %v5379_v54, %v5383_v56  ;;  %v5385_v15 = vpop.eup %5384  ;;  %3211 = vmatmul.bf16.gmra.mxu1 %v6646_v17 }
 0x40a   : > { %4023 = vst [vmem:[%s6726_s27] sm:$0xff] %v4022_v30  ;;  %5386 = vtanh.f32 %v3348_v58  ;;  %3300 = vmatmul.bf16.gmra.mxu2 %v6641_v24  ;;  %v3584_v45 = vmax.f32 %v5381_v49, %v5385_v15 }
 0x40b   : > { %v3800_v38 = vrot.slane %v3583_v5, 1  ;;  %3389 = vmatmul.bf16.gmra.mxu3 %v6646_v17  ;;  %5388 = vtanh.f32 %v3173_v20 }
 0x40c   : > { %v3801_v10 = vrot.slane %v3584_v45, 1 }
 0x40d   : > { %v3924_v48 = vmax.f32 %v3583_v5, %v3800_v38  ;;  %v3261_v28 = vpop.f32.mrf.mxu2  ;;  %v3085_v22 = vpop.f32.mrf.mxu0 }
 0x40e   : > { %v3262_v55 = vadd.f32 %v3261_v28, %v6704_v2  ;;  %v3350_v8 = vpop.f32.mrf.mxu3  ;;  %v3086_v40 = vadd.f32 %v3085_v22, %v6699_v43  ;;  %v3174_v18 = vpop.f32.mrf.mxu1  ;;  %v3925_v35 = vmax.f32 %v3584_v45, %v3801_v10 }
 0x40f   : > { %v3984_v53 = vpack.c.bf16 %v3924_v48, %v3923_v23 }
 0x410   : > { %v5387_v24 = vpop.eup %5386  ;;  %v3351_v26 = vadd.f32 %v3350_v8, %v3262_v55  ;;  %v3175_v63 = vadd.f32 %v3174_v18, %v3086_v40 }
 0x411   : > { %v4025_v17 = vsel %vm6728_vm6, %v3984_v53, %v4024_v1  ;;  %v3585_v9 = vmax.f32 %v5383_v56, %v5387_v24  ;;  %v5389_v59 = vpop.eup %5388  ;;  %v4033_v53 = vld [vmem:[%s6726_s27 + $0x20] sm:$0xff] }
 0x412   : > { %4026 = vst [vmem:[%s6726_s27 + $0x8] sm:$0xff] %v4025_v17  ;;  %5390 = vtanh.f32 %v3351_v26  ;;  %v3586_v60 = vmax.f32 %v5385_v15, %v5389_v59 }
 0x413   : > { %v3802_v47 = vrot.slane %v3585_v9, 1  ;;  %5392 = vtanh.f32 %v3175_v63 }
 0x414   : > { %v3803_v52 = vrot.slane %v3586_v60, 1 }
 0x415   : > { %v3926_v41 = vmax.f32 %v3585_v9, %v3802_v47  ;;  %v3263_v42 = vpop.f32.mrf.mxu2  ;;  %v3088_v44 = vpop.f32.mrf.mxu0 }
 0x416   : > { %v3264_v50 = vadd.f32 %v3263_v42, %v6704_v2  ;;  %v3352_v54 = vpop.f32.mrf.mxu3  ;;  %v3089_v61 = vadd.f32 %v3088_v44, %v6699_v43  ;;  %v3177_v39 = vpop.f32.mrf.mxu1  ;;  %v3927_v33 = vmax.f32 %v3586_v60, %v3803_v52 }
 0x417   : > { %v3985_v37 = vpack.c.bf16 %v3926_v41, %v3925_v35 }
 0x418   : > { %v5391_v49 = vpop.eup %5390  ;;  %v3353_v6 = vadd.f32 %v3352_v54, %v3264_v50  ;;  %v3178_v0 = vadd.f32 %v3177_v39, %v3089_v61  ;;  %3127 = vmatmul.bf16.gmra.mxu0 %v6653_v21 }
 0x419   : > { %v4028_v25 = vsel %vm6728_vm6, %v3985_v37, %v4027_v11  ;;  %v3587_v7 = vmax.f32 %v5387_v24, %v5391_v49  ;;  %v5393_v46 = vpop.eup %5392  ;;  %3216 = vmatmul.bf16.gmra.mxu1 %v6658_v36  ;;  %v4036_v37 = vld [vmem:[%s6726_s27 + $0x28] sm:$0xff] }
 0x41a   : > { %4029 = vst [vmem:[%s6726_s27 + $0x10] sm:$0xff] %v4028_v25  ;;  %5394 = vtanh.f32 %v3353_v6  ;;  %3305 = vmatmul.bf16.gmra.mxu2 %v6653_v21  ;;  %v3588_v62 = vmax.f32 %v5389_v59, %v5393_v46 }
 0x41b   : > { %v3804_v3 = vrot.slane %v3587_v7, 1  ;;  %3394 = vmatmul.bf16.gmra.mxu3 %v6658_v36  ;;  %5396 = vtanh.f32 %v3178_v0 }
 0x41c   : > { %v3805_v38 = vrot.slane %v3588_v62, 1 }
 0x41d   : > { %v3928_v51 = vmax.f32 %v3587_v7, %v3804_v3  ;;  %v3266_v13 = vpop.f32.mrf.mxu2  ;;  %v3090_v30 = vpop.f32.mrf.mxu0 }
 0x41e   : > { %v3267_v56 = vadd.f32 %v3266_v13, %v6704_v2  ;;  %v3355_v58 = vpop.f32.mrf.mxu3  ;;  %v3091_v5 = vadd.f32 %v3090_v30, %v6699_v43  ;;  %v3179_v20 = vpop.f32.mrf.mxu1  ;;  %v3929_v1 = vmax.f32 %v3588_v62, %v3805_v38 }
 0x41f   : > { %v3986_v57 = vpack.c.bf16 %v3928_v51, %v3927_v33 }
 0x420   : > { %v5395_v21 = vpop.eup %5394  ;;  %v3356_v15 = vadd.f32 %v3355_v58, %v3267_v56  ;;  %v3180_v48 = vadd.f32 %v3179_v20, %v3091_v5  ;;  %v4039_v58 = vld [vmem:[%s6726_s27 + $0x30] sm:$0xff] }
 0x421   : > { %v4031_v36 = vsel %vm6728_vm6, %v3986_v57, %v4030_v16  ;;  %v3589_v23 = vmax.f32 %v5391_v49, %v5395_v21  ;;  %v5397_v45 = vpop.eup %5396 }
 0x422   : > { %4032 = vst [vmem:[%s6726_s27 + $0x18] sm:$0xff] %v4031_v36  ;;  %5398 = vtanh.f32 %v3356_v15  ;;  %v3590_v8 = vmax.f32 %v5393_v46, %v5397_v45 }
 0x423   : > { %v3806_v28 = vrot.slane %v3589_v23, 1  ;;  %5400 = vtanh.f32 %v3180_v48 }
 0x424   : > { %v3807_v47 = vrot.slane %v3590_v8, 1 }
 0x425   : > { %v3930_v55 = vmax.f32 %v3589_v23, %v3806_v28  ;;  %v3268_v22 = vpop.f32.mrf.mxu2  ;;  %v3093_v24 = vpop.f32.mrf.mxu0 }
 0x426   : > { %v3269_v40 = vadd.f32 %v3268_v22, %v6704_v2  ;;  %v3357_v18 = vpop.f32.mrf.mxu3  ;;  %v3094_v17 = vadd.f32 %v3093_v24, %v6699_v43  ;;  %v3182_v10 = vpop.f32.mrf.mxu1  ;;  %v3931_v11 = vmax.f32 %v3590_v8, %v3807_v47 }
 0x427   : > { %v3987_v26 = vpack.c.bf16 %v3930_v55, %v3929_v1 }
 0x428   : > { %v5399_v9 = vpop.eup %5398  ;;  %v3358_v63 = vadd.f32 %v3357_v18, %v3269_v40  ;;  %v3183_v41 = vadd.f32 %v3182_v10, %v3094_v17  ;;  %3132 = vmatmul.bf16.gmra.mxu0 %v6665_v14  ;;  %v4042_v18 = vld [vmem:[%s6726_s27 + $0x38] sm:$0xff] }
 0x429   : > { %v4034_v59 = vsel %vm6728_vm6, %v3987_v26, %v4033_v53  ;;  %v3591_v35 = vmax.f32 %v5395_v21, %v5399_v9  ;;  %v5401_v60 = vpop.eup %5400  ;;  %3221 = vmatmul.bf16.gmra.mxu1 %v6670_v29 }
 0x42a   : > { %4035 = vst [vmem:[%s6726_s27 + $0x20] sm:$0xff] %v4034_v59  ;;  %5402 = vtanh.f32 %v3358_v63  ;;  %3310 = vmatmul.bf16.gmra.mxu2 %v6665_v14  ;;  %v3592_v54 = vmax.f32 %v5397_v45, %v5401_v60 }
 0x42b   : > { %v3808_v42 = vrot.slane %v3591_v35, 1  ;;  %3399 = vmatmul.bf16.gmra.mxu3 %v6670_v29  ;;  %5404 = vtanh.f32 %v3183_v41 }
 0x42c   : > { %v3809_v0 = vrot.slane %v3592_v54, 1 }
 0x42d   : > { %v3932_v50 = vmax.f32 %v3591_v35, %v3808_v42  ;;  %v3271_v44 = vpop.f32.mrf.mxu2  ;;  %v3095_v49 = vpop.f32.mrf.mxu0 }
 0x42e   : > { %v3272_v61 = vadd.f32 %v3271_v44, %v6704_v2  ;;  %v3360_v39 = vpop.f32.mrf.mxu3  ;;  %v3096_v25 = vadd.f32 %v3095_v49, %v6699_v43  ;;  %v3184_v52 = vpop.f32.mrf.mxu1  ;;  %v3933_v62 = vmax.f32 %v3592_v54, %v3809_v0 }
 0x42f   : > { %v3988_v6 = vpack.c.bf16 %v3932_v50, %v3931_v11 }
 0x430   : > { %v5403_v14 = vpop.eup %5402  ;;  %v3361_v7 = vadd.f32 %v3360_v39, %v3272_v61  ;;  %v3185_v3 = vadd.f32 %v3184_v52, %v3096_v25 }
 0x431   : > { %v4037_v29 = vsel %vm6728_vm6, %v3988_v6, %v4036_v37  ;;  %v3593_v46 = vmax.f32 %v5399_v9, %v5403_v14  ;;  %v5405_v33 = vpop.eup %5404  ;;  %v4045_v37 = vld [vmem:[%s6726_s27 + $0x40] sm:$0xff] }
 0x432   : > { %4038 = vst [vmem:[%s6726_s27 + $0x28] sm:$0xff] %v4037_v29  ;;  %5406 = vtanh.f32 %v3361_v7  ;;  %v3594_v16 = vmax.f32 %v5401_v60, %v5405_v33 }
 0x433   : > { %v3810_v51 = vrot.slane %v3593_v46, 1  ;;  %5408 = vtanh.f32 %v3185_v3 }
 0x434   : > { %v3811_v48 = vrot.slane %v3594_v16, 1 }
 0x435   : > { %v3934_v13 = vmax.f32 %v3593_v46, %v3810_v51  ;;  %v3273_v56 = vpop.f32.mrf.mxu2  ;;  %v3098_v5 = vpop.f32.mrf.mxu0 }
 0x436   : > { %v3274_v30 = vadd.f32 %v3273_v56, %v6704_v2  ;;  %v3362_v57 = vpop.f32.mrf.mxu3  ;;  %v3099_v21 = vadd.f32 %v3098_v5, %v6699_v43  ;;  %v3187_v15 = vpop.f32.mrf.mxu1  ;;  %v3935_v8 = vmax.f32 %v3594_v16, %v3811_v48 }
 0x437   : > { %v3989_v20 = vpack.c.bf16 %v3934_v13, %v3933_v62 }
 0x438   : > { %v5407_v36 = vpop.eup %5406  ;;  %v3363_v38 = vadd.f32 %v3362_v57, %v3274_v30  ;;  %v3188_v28 = vadd.f32 %v3187_v15, %v3099_v21  ;;  %3137 = vmatmul.bf16.gmra.mxu0 %v6677_v19 }
 0x439   : > { %v4040_v23 = vsel %vm6728_vm6, %v3989_v20, %v4039_v58  ;;  %v3595_v45 = vmax.f32 %v5403_v14, %v5407_v36  ;;  %v5409_v1 = vpop.eup %5408  ;;  %3226 = vmatmul.bf16.gmra.mxu1 %v6682_v12  ;;  %v4048_v58 = vld [vmem:[%s6726_s27 + $0x48] sm:$0xff] }
 0x43a   : > { %4041 = vst [vmem:[%s6726_s27 + $0x30] sm:$0xff] %v4040_v23  ;;  %5410 = vtanh.f32 %v3363_v38  ;;  %3315 = vmatmul.bf16.gmra.mxu2 %v6677_v19  ;;  %v3596_v53 = vmax.f32 %v5405_v33, %v5409_v1 }
 0x43b   : > { %v3812_v55 = vrot.slane %v3595_v45, 1  ;;  %3404 = vmatmul.bf16.gmra.mxu3 %v6682_v12  ;;  %5412 = vtanh.f32 %v3188_v28 }
 0x43c   : > { %v3813_v47 = vrot.slane %v3596_v53, 1 }
 0x43d   : > { %v3936_v22 = vmax.f32 %v3595_v45, %v3812_v55  ;;  %v3276_v40 = vpop.f32.mrf.mxu2  ;;  %v3100_v17 = vpop.f32.mrf.mxu0 }
 0x43e   : > { %v3277_v24 = vadd.f32 %v3276_v40, %v6704_v2  ;;  %v3365_v26 = vpop.f32.mrf.mxu3  ;;  %v3101_v9 = vadd.f32 %v3100_v17, %v6699_v43  ;;  %v3189_v63 = vpop.f32.mrf.mxu1  ;;  %v3937_v11 = vmax.f32 %v3596_v53, %v3813_v47  ;;  %v4051_v53 = vld [vmem:[%s6726_s27 + $0x50] sm:$0xff] }
 0x43f   : > { %v3990_v10 = vpack.c.bf16 %v3936_v22, %v3935_v8 }
 0x440   : > { %v5411_v19 = vpop.eup %5410  ;;  %v3366_v59 = vadd.f32 %v3365_v26, %v3277_v24  ;;  %v3190_v41 = vadd.f32 %v3189_v63, %v3101_v9 }
 0x441   : > { %v4043_v12 = vsel %vm6728_vm6, %v3990_v10, %v4042_v18  ;;  %v3597_v35 = vmax.f32 %v5407_v36, %v5411_v19  ;;  %v5413_v60 = vpop.eup %5412 }
 0x442   : > { %4044 = vst [vmem:[%s6726_s27 + $0x38] sm:$0xff] %v4043_v12  ;;  %5414 = vtanh.f32 %v3366_v59  ;;  %v3598_v54 = vmax.f32 %v5409_v1, %v5413_v60 }
 0x443   : > { %v3814_v42 = vrot.slane %v3597_v35, 1  ;;  %5416 = vtanh.f32 %v3190_v41 }
 0x444   : > { %v3815_v0 = vrot.slane %v3598_v54, 1 }
 0x445   : > { %v3938_v50 = vmax.f32 %v3597_v35, %v3814_v42  ;;  %v3278_v44 = vpop.f32.mrf.mxu2  ;;  %v3103_v49 = vpop.f32.mrf.mxu0 }
 0x446   : > { %v3279_v61 = vadd.f32 %v3278_v44, %v6704_v2  ;;  %v3367_v39 = vpop.f32.mrf.mxu3  ;;  %v3104_v25 = vadd.f32 %v3103_v49, %v6699_v43  ;;  %v3192_v52 = vpop.f32.mrf.mxu1  ;;  %v3939_v62 = vmax.f32 %v3598_v54, %v3815_v0  ;;  %v4054_v54 = vld [vmem:[%s6726_s27 + $0x58] sm:$0xff] }
 0x447   : > { %v3991_v6 = vpack.c.bf16 %v3938_v50, %v3937_v11 }
 0x448   : > { %v5415_v14 = vpop.eup %5414  ;;  %v3368_v7 = vadd.f32 %v3367_v39, %v3279_v61  ;;  %v3193_v3 = vadd.f32 %v3192_v52, %v3104_v25  ;;  %3142 = vmatmul.bf16.gmra.mxu0 %v6689_v27 }
 0x449   : > { %v4046_v29 = vsel %vm6728_vm6, %v3991_v6, %v4045_v37  ;;  %v3599_v46 = vmax.f32 %v5411_v19, %v5415_v14  ;;  %v5417_v33 = vpop.eup %5416  ;;  %3231 = vmatmul.bf16.gmra.mxu1 %v6696_v4 }
 0x44a   : > { %4047 = vst [vmem:[%s6726_s27 + $0x40] sm:$0xff] %v4046_v29  ;;  %5418 = vtanh.f32 %v3368_v7  ;;  %3320 = vmatmul.bf16.gmra.mxu2 %v6689_v27  ;;  %v3600_v16 = vmax.f32 %v5413_v60, %v5417_v33 }
 0x44b   : > { %v3816_v51 = vrot.slane %v3599_v46, 1  ;;  %3409 = vmatmul.bf16.gmra.mxu3 %v6696_v4  ;;  %5420 = vtanh.f32 %v3193_v3 }
 0x44c   : > { %v3817_v38 = vrot.slane %v3600_v16, 1 }
 0x44d   : > { %v3940_v13 = vmax.f32 %v3599_v46, %v3816_v51  ;;  %v3281_v56 = vpop.f32.mrf.mxu2  ;;  %v3105_v5 = vpop.f32.mrf.mxu0 }
 0x44e   : > { %v3282_v30 = vadd.f32 %v3281_v56, %v6704_v2  ;;  %v3370_v57 = vpop.f32.mrf.mxu3  ;;  %v3106_v21 = vadd.f32 %v3105_v5, %v6699_v43  ;;  %v3194_v15 = vpop.f32.mrf.mxu1  ;;  %v3941_v1 = vmax.f32 %v3600_v16, %v3817_v38 }
 0x44f   : > { %v3992_v20 = vpack.c.bf16 %v3940_v13, %v3939_v62  ;;  %v4057_v62 = vld [vmem:[%s6726_s27 + $0x60] sm:$0xff] }
 0x450   : > { %v5419_v27 = vpop.eup %5418  ;;  %v3371_v36 = vadd.f32 %v3370_v57, %v3282_v30  ;;  %v3195_v48 = vadd.f32 %v3194_v15, %v3106_v21 }
 0x451   : > { %v4049_v4 = vsel %vm6728_vm6, %v3992_v20, %v4048_v58  ;;  %v3601_v23 = vmax.f32 %v5415_v14, %v5419_v27  ;;  %v5421_v45 = vpop.eup %5420 }
 0x452   : > { %4050 = vst [vmem:[%s6726_s27 + $0x48] sm:$0xff] %v4049_v4  ;;  %5422 = vtanh.f32 %v3371_v36  ;;  %v3602_v8 = vmax.f32 %v5417_v33, %v5421_v45 }
 0x453   : > { %v3818_v28 = vrot.slane %v3601_v23, 1  ;;  %5424 = vtanh.f32 %v3195_v48 }
 0x454   : > { %v3819_v59 = vrot.slane %v3602_v8, 1 }
 0x455   : > { %v3942_v55 = vmax.f32 %v3601_v23, %v3818_v28  ;;  %v3283_v22 = vpop.f32.mrf.mxu2  ;;  %v3108_v24 = vpop.f32.mrf.mxu0 }
 0x456   : > { %v3284_v40 = vadd.f32 %v3283_v22, %v6704_v2  ;;  %v3372_v18 = vpop.f32.mrf.mxu3  ;;  %v3109_v17 = vadd.f32 %v3108_v24, %v6699_v43  ;;  %v3197_v10 = vpop.f32.mrf.mxu1  ;;  %v3943_v60 = vmax.f32 %v3602_v8, %v3819_v59 }
 0x457   : > { %v3993_v26 = vpack.c.bf16 %v3942_v55, %v3941_v1  ;;  %v4060_v1 = vld [vmem:[%s6726_s27 + $0x68] sm:$0xff] }
 0x458   : > { %v5423_v9 = vpop.eup %5422  ;;  %v3373_v63 = vadd.f32 %v3372_v18, %v3284_v40  ;;  %v3198_v47 = vadd.f32 %v3197_v10, %v3109_v17  ;;  %3147 = vmatmul.bf16.gmra.mxu0 %v6707_v34 }
 0x459   : > { %v4052_v19 = vsel %vm6728_vm6, %v3993_v26, %v4051_v53  ;;  %v3603_v12 = vmax.f32 %v5419_v27, %v5423_v9  ;;  %v5425_v35 = vpop.eup %5424  ;;  %3236 = vmatmul.bf16.gmra.mxu1 %v6714_v32 }
 0x45a   : > { %4053 = vst [vmem:[%s6726_s27 + $0x50] sm:$0xff] %v4052_v19  ;;  %5426 = vtanh.f32 %v3373_v63  ;;  %3325 = vmatmul.bf16.gmra.mxu2 %v6707_v34  ;;  %v3604_v11 = vmax.f32 %v5421_v45, %v5425_v35 }
 0x45b   : > { %v3820_v41 = vrot.slane %v3603_v12, 1  ;;  %3414 = vmatmul.bf16.gmra.mxu3 %v6714_v32  ;;  %5428 = vtanh.f32 %v3198_v47 }
 0x45c   : > { %v3821_v52 = vrot.slane %v3604_v11, 1 }
 0x45d   : > { %v3944_v42 = vmax.f32 %v3603_v12, %v3820_v41  ;;  %v3286_v50 = vpop.f32.mrf.mxu2  ;;  %v3110_v61 = vpop.f32.mrf.mxu0 }
 0x45e   : > { %v3287_v44 = vadd.f32 %v3286_v50, %v6704_v2  ;;  %v3375_v37 = vpop.f32.mrf.mxu3  ;;  %v3111_v49 = vadd.f32 %v3110_v61, %v6699_v43  ;;  %v3199_v6 = vpop.f32.mrf.mxu1  ;;  %v3945_v46 = vmax.f32 %v3604_v11, %v3821_v52 }
 0x45f   : > { %v3994_v39 = vpack.c.bf16 %v3944_v42, %v3943_v60  ;;  %v4063_v60 = vld [vmem:[%s6726_s27 + $0x70] sm:$0xff] }
 0x460   : > { %v5427_v34 = vpop.eup %5426  ;;  %v3376_v25 = vadd.f32 %v3375_v37, %v3287_v44  ;;  %v3200_v7 = vadd.f32 %v3199_v6, %v3111_v49 }
 0x461   : > { %v4055_v32 = vsel %vm6728_vm6, %v3994_v39, %v4054_v54  ;;  %v3605_v14 = vmax.f32 %v5423_v9, %v5427_v34  ;;  %v5429_v29 = vpop.eup %5428 }
 0x462   : > { %4056 = vst [vmem:[%s6726_s27 + $0x58] sm:$0xff] %v4055_v32  ;;  %5430 = vtanh.f32 %v3376_v25  ;;  %v3606_v33 = vmax.f32 %v5425_v35, %v5429_v29 }
 0x463   : > { %v3822_v0 = vrot.slane %v3605_v14, 1  ;;  %5432 = vtanh.f32 %v3200_v7 }
 0x464   : > { %v3823_v15 = vrot.slane %v3606_v33, 1 }
 0x465   : > { %v3946_v3 = vmax.f32 %v3605_v14, %v3822_v0  ;;  %v3288_v51 = vpop.f32.mrf.mxu2  ;;  %v3113_v56 = vpop.f32.mrf.mxu0 }
 0x466   : > { %v3289_v13 = vadd.f32 %v3288_v51, %v6704_v2  ;;  %v3377_v16 = vpop.f32.mrf.mxu3  ;;  %v3114_v30 = vadd.f32 %v3113_v56, %v6699_v43  ;;  %v3202_v57 = vpop.f32.mrf.mxu1  ;;  %v3947_v23 = vmax.f32 %v3606_v33, %v3823_v15 }
 0x467   : > { %v3995_v58 = vpack.c.bf16 %v3946_v3, %v3945_v46  ;;  %v4066_v46 = vld [vmem:[%s6726_s27 + $0x78] sm:$0xff] }
 0x468   : > { %v5431_v5 = vpop.eup %5430  ;;  %v3378_v20 = vadd.f32 %v3377_v16, %v3289_v13  ;;  %v3203_v36 = vadd.f32 %v3202_v57, %v3114_v30 }
 0x469   : > { %v4058_v21 = vsel %vm6728_vm6, %v3995_v58, %v4057_v62  ;;  %v3607_v27 = vmax.f32 %v5427_v34, %v5431_v5  ;;  %v5433_v4 = vpop.eup %5432 }
 0x46a   : > { %4059 = vst [vmem:[%s6726_s27 + $0x60] sm:$0xff] %v4058_v21  ;;  %5434 = vtanh.f32 %v3378_v20  ;;  %v3608_v45 = vmax.f32 %v5429_v29, %v5433_v4 }
 0x46b   : > { %v3824_v38 = vrot.slane %v3607_v27, 1  ;;  %5436 = vtanh.f32 %v3203_v36 }
 0x46c   : > { %v3825_v10 = vrot.slane %v3608_v45, 1 }
 0x46d   : > { %v3948_v48 = vmax.f32 %v3607_v27, %v3824_v38  ;;  %v3291_v28 = vpop.f32.mrf.mxu2  ;;  %v3115_v22 = vpop.f32.mrf.mxu0 }
 0x46e   : > { %v3292_v55 = vadd.f32 %v3291_v28, %v6704_v2  ;;  %v3380_v8 = vpop.f32.mrf.mxu3  ;;  %v3116_v40 = vadd.f32 %v3115_v22, %v6699_v43  ;;  %v3204_v18 = vpop.f32.mrf.mxu1  ;;  %v3949_v12 = vmax.f32 %v3608_v45, %v3825_v10 }
 0x46f   : > { %v3996_v53 = vpack.c.bf16 %v3948_v48, %v3947_v23  ;;  %v4069_v23 = vld [vmem:[%s6726_s27 + $0x80] sm:$0xff] }
 0x470   : > { %v5435_v24 = vpop.eup %5434  ;;  %v3381_v26 = vadd.f32 %v3380_v8, %v3292_v55  ;;  %v3205_v63 = vadd.f32 %v3204_v18, %v3116_v40 }
 0x471   : > { %v4061_v17 = vsel %vm6728_vm6, %v3996_v53, %v4060_v1  ;;  %v3609_v9 = vmax.f32 %v5431_v5, %v5435_v24  ;;  %v5437_v19 = vpop.eup %5436 }
 0x472   : > { %4062 = vst [vmem:[%s6726_s27 + $0x68] sm:$0xff] %v4061_v17  ;;  %5438 = vtanh.f32 %v3381_v26  ;;  %v3610_v35 = vmax.f32 %v5433_v4, %v5437_v19 }
 0x473   : > { %v3826_v59 = vrot.slane %v3609_v9, 1  ;;  %5440 = vtanh.f32 %v3205_v63 }
 0x474   : > { %v3827_v6 = vrot.slane %v3610_v35, 1 }
 0x475   : > { %v3950_v47 = vmax.f32 %v3609_v9, %v3826_v59  ;;  %v3293_v41 = vpop.f32.mrf.mxu2  ;;  %v3118_v50 = vpop.f32.mrf.mxu0 }
 0x476   : > { %v3294_v42 = vadd.f32 %v3293_v41, %v6704_v2  ;;  %v3382_v11 = vpop.f32.mrf.mxu3  ;;  %v3119_v44 = vadd.f32 %v3118_v50, %v6699_v43  ;;  %v3207_v37 = vpop.f32.mrf.mxu1  ;;  %v3951_v14 = vmax.f32 %v3610_v35, %v3827_v6 }
 0x477   : > { %v3997_v54 = vpack.c.bf16 %v3950_v47, %v3949_v12  ;;  %v4072_v12 = vld [vmem:[%s6726_s27 + $0x88] sm:$0xff] }
 0x478   : > { %v5439_v61 = vpop.eup %5438  ;;  %v3383_v39 = vadd.f32 %v3382_v11, %v3294_v42  ;;  %v3208_v25 = vadd.f32 %v3207_v37, %v3119_v44 }
 0x479   : > { %v4064_v49 = vsel %vm6728_vm6, %v3997_v54, %v4063_v60  ;;  %v3611_v34 = vmax.f32 %v5435_v24, %v5439_v61  ;;  %v5441_v32 = vpop.eup %5440 }
 0x47a   : > { %4065 = vst [vmem:[%s6726_s27 + $0x70] sm:$0xff] %v4064_v49  ;;  %5442 = vtanh.f32 %v3383_v39  ;;  %v3612_v29 = vmax.f32 %v5437_v19, %v5441_v32 }
 0x47b   : > { %v3828_v52 = vrot.slane %v3611_v34, 1  ;;  %5444 = vtanh.f32 %v3208_v25 }
 0x47c   : > { %v3829_v57 = vrot.slane %v3612_v29, 1 }
 0x47d   : > { %v3952_v7 = vmax.f32 %v3611_v34, %v3828_v52  ;;  %v3296_v0 = vpop.f32.mrf.mxu2  ;;  %v3120_v51 = vpop.f32.mrf.mxu0 }
 0x47e   : > { %v3297_v3 = vadd.f32 %v3296_v0, %v6704_v2  ;;  %v3385_v33 = vpop.f32.mrf.mxu3  ;;  %v3121_v13 = vadd.f32 %v3120_v51, %v6699_v43  ;;  %v3209_v16 = vpop.f32.mrf.mxu1  ;;  %v3953_v27 = vmax.f32 %v3612_v29, %v3829_v57 }
 0x47f   : > { %v3998_v62 = vpack.c.bf16 %v3952_v7, %v3951_v14  ;;  %v4075_v14 = vld [vmem:[%s6726_s27 + $0x90] sm:$0xff] }
 0x480   : > { %v5443_v56 = vpop.eup %5442  ;;  %v3386_v58 = vadd.f32 %v3385_v33, %v3297_v3  ;;  %v3210_v20 = vadd.f32 %v3209_v16, %v3121_v13 }
 0x481   : > { %v4067_v30 = vsel %vm6728_vm6, %v3998_v62, %v4066_v46  ;;  %v3613_v5 = vmax.f32 %v5439_v61, %v5443_v56  ;;  %v5445_v21 = vpop.eup %5444 }
 0x482   : > { %4068 = vst [vmem:[%s6726_s27 + $0x78] sm:$0xff] %v4067_v30  ;;  %5446 = vtanh.f32 %v3386_v58  ;;  %v3614_v4 = vmax.f32 %v5441_v32, %v5445_v21 }
 0x483   : > { %v3830_v15 = vrot.slane %v3613_v5, 1  ;;  %5448 = vtanh.f32 %v3210_v20 }
 0x484   : > { %v3831_v18 = vrot.slane %v3614_v4, 1 }
 0x485   : > { %v3954_v36 = vmax.f32 %v3613_v5, %v3830_v15  ;;  %v3298_v38 = vpop.f32.mrf.mxu2  ;;  %v3123_v28 = vpop.f32.mrf.mxu0 }
 0x486   : > { %v3299_v48 = vadd.f32 %v3298_v38, %v6704_v2  ;;  %v3387_v45 = vpop.f32.mrf.mxu3  ;;  %v3124_v55 = vadd.f32 %v3123_v28, %v6699_v43  ;;  %v3212_v8 = vpop.f32.mrf.mxu1  ;;  %v3955_v9 = vmax.f32 %v3614_v4, %v3831_v18 }
 0x487   : > { %v3999_v1 = vpack.c.bf16 %v3954_v36, %v3953_v27  ;;  %v4078_v27 = vld [vmem:[%s6726_s27 + $0x98] sm:$0xff] }
 0x488   : > { %v5447_v22 = vpop.eup %5446  ;;  %v3388_v53 = vadd.f32 %v3387_v45, %v3299_v48  ;;  %v3213_v26 = vadd.f32 %v3212_v8, %v3124_v55 }
 0x489   : > { %v4070_v40 = vsel %vm6728_vm6, %v3999_v1, %v4069_v23  ;;  %v3615_v24 = vmax.f32 %v5443_v56, %v5447_v22  ;;  %v5449_v17 = vpop.eup %5448 }
 0x48a   : > { %4071 = vst [vmem:[%s6726_s27 + $0x80] sm:$0xff] %v4070_v40  ;;  %5450 = vtanh.f32 %v3388_v53  ;;  %v3616_v19 = vmax.f32 %v5445_v21, %v5449_v17 }
 0x48b   : > { %v3832_v10 = vrot.slane %v3615_v24, 1  ;;  %5452 = vtanh.f32 %v3213_v26 }
 0x48c   : > { %v3833_v37 = vrot.slane %v3616_v19, 1 }
 0x48d   : > { %v3956_v63 = vmax.f32 %v3615_v24, %v3832_v10  ;;  %v3301_v59 = vpop.f32.mrf.mxu2  ;;  %v3125_v41 = vpop.f32.mrf.mxu0 }
 0x48e   : > { %v3302_v47 = vadd.f32 %v3301_v59, %v6704_v2  ;;  %v3390_v35 = vpop.f32.mrf.mxu3  ;;  %v3126_v42 = vadd.f32 %v3125_v41, %v6699_v43  ;;  %v3214_v11 = vpop.f32.mrf.mxu1  ;;  %v3957_v34 = vmax.f32 %v3616_v19, %v3833_v37 }
 0x48f   : > { %v4000_v60 = vpack.c.bf16 %v3956_v63, %v3955_v9  ;;  %v4081_v9 = vld [vmem:[%s6726_s27 + $0xa0] sm:$0xff] }
 0x490   : > { %v5451_v50 = vpop.eup %5450  ;;  %v3391_v54 = vadd.f32 %v3390_v35, %v3302_v47  ;;  %v3215_v39 = vadd.f32 %v3214_v11, %v3126_v42 }
 0x491   : > { %v4073_v44 = vsel %vm6728_vm6, %v4000_v60, %v4072_v12  ;;  %v3617_v61 = vmax.f32 %v5447_v22, %v5451_v50  ;;  %v5453_v49 = vpop.eup %5452 }
 0x492   : > { %4074 = vst [vmem:[%s6726_s27 + $0x88] sm:$0xff] %v4073_v44  ;;  %5454 = vtanh.f32 %v3391_v54  ;;  %v3618_v32 = vmax.f32 %v5449_v17, %v5453_v49 }
 0x493   : > { %v3834_v6 = vrot.slane %v3617_v61, 1  ;;  %5456 = vtanh.f32 %v3215_v39 }
 0x494   : > { %v3835_v16 = vrot.slane %v3618_v32, 1 }
 0x495   : > { %v3958_v25 = vmax.f32 %v3617_v61, %v3834_v6  ;;  %v3303_v52 = vpop.f32.mrf.mxu2  ;;  %v3128_v0 = vpop.f32.mrf.mxu0 }
 0x496   : > { %v3304_v7 = vadd.f32 %v3303_v52, %v6704_v2  ;;  %v3392_v29 = vpop.f32.mrf.mxu3  ;;  %v3129_v3 = vadd.f32 %v3128_v0, %v6699_v43  ;;  %v3217_v33 = vpop.f32.mrf.mxu1  ;;  %v3959_v5 = vmax.f32 %v3618_v32, %v3835_v16 }
 0x497   : > { %v4001_v46 = vpack.c.bf16 %v3958_v25, %v3957_v34  ;;  %v4084_v34 = vld [vmem:[%s6726_s27 + $0xa8] sm:$0xff] }
 0x498   : > { %v5455_v51 = vpop.eup %5454  ;;  %v3393_v62 = vadd.f32 %v3392_v29, %v3304_v7  ;;  %v3218_v58 = vadd.f32 %v3217_v33, %v3129_v3 }
 0x499   : > { %v4076_v13 = vsel %vm6728_vm6, %v4001_v46, %v4075_v14  ;;  %v3619_v56 = vmax.f32 %v5451_v50, %v5455_v51  ;;  %v5457_v30 = vpop.eup %5456 }
 0x49a   : > { %4077 = vst [vmem:[%s6726_s27 + $0x90] sm:$0xff] %v4076_v13  ;;  %5458 = vtanh.f32 %v3393_v62  ;;  %v3620_v21 = vmax.f32 %v5453_v49, %v5457_v30 }
 0x49b   : > { %v3836_v57 = vrot.slane %v3619_v56, 1  ;;  %5460 = vtanh.f32 %v3218_v58 }
 0x49c   : > { %v3837_v8 = vrot.slane %v3620_v21, 1 }
 0x49d   : > { %v3960_v20 = vmax.f32 %v3619_v56, %v3836_v57  ;;  %v3306_v15 = vpop.f32.mrf.mxu2  ;;  %v3130_v38 = vpop.f32.mrf.mxu0 }
 0x49e   : > { %v3307_v36 = vadd.f32 %v3306_v15, %v6704_v2  ;;  %v3395_v4 = vpop.f32.mrf.mxu3  ;;  %v3131_v48 = vadd.f32 %v3130_v38, %v6699_v43  ;;  %v3219_v45 = vpop.f32.mrf.mxu1  ;;  %v3961_v24 = vmax.f32 %v3620_v21, %v3837_v8 }
 0x49f   : > { %v4002_v23 = vpack.c.bf16 %v3960_v20, %v3959_v5  ;;  %v4087_v5 = vld [vmem:[%s6726_s27 + $0xb0] sm:$0xff] }
 0x4a0   : > { %v5459_v28 = vpop.eup %5458  ;;  %v3396_v1 = vadd.f32 %v3395_v4, %v3307_v36  ;;  %v3220_v53 = vadd.f32 %v3219_v45, %v3131_v48 }
 0x4a1   : > { %v4079_v55 = vsel %vm6728_vm6, %v4002_v23, %v4078_v27  ;;  %v3621_v22 = vmax.f32 %v5455_v51, %v5459_v28  ;;  %v5461_v40 = vpop.eup %5460 }
 0x4a2   : > { %4080 = vst [vmem:[%s6726_s27 + $0x98] sm:$0xff] %v4079_v55  ;;  %5462 = vtanh.f32 %v3396_v1  ;;  %v3622_v17 = vmax.f32 %v5457_v30, %v5461_v40 }
 0x4a3   : > { %v3838_v18 = vrot.slane %v3621_v22, 1  ;;  %5464 = vtanh.f32 %v3220_v53 }
 0x4a4   : > { %v3839_v11 = vrot.slane %v3622_v17, 1 }
 0x4a5   : > { %v3962_v26 = vmax.f32 %v3621_v22, %v3838_v18  ;;  %v3308_v10 = vpop.f32.mrf.mxu2  ;;  %v3133_v59 = vpop.f32.mrf.mxu0 }
 0x4a6   : > { %v3309_v63 = vadd.f32 %v3308_v10, %v6704_v2  ;;  %v3397_v19 = vpop.f32.mrf.mxu3  ;;  %v3134_v47 = vadd.f32 %v3133_v59, %v6699_v43  ;;  %v3222_v35 = vpop.f32.mrf.mxu1  ;;  %v3963_v61 = vmax.f32 %v3622_v17, %v3839_v11 }
 0x4a7   : > { %v4003_v12 = vpack.c.bf16 %v3962_v26, %v3961_v24  ;;  %v4090_v24 = vld [vmem:[%s6726_s27 + $0xb8] sm:$0xff] }
 0x4a8   : > { %v5463_v41 = vpop.eup %5462  ;;  %v3398_v60 = vadd.f32 %v3397_v19, %v3309_v63  ;;  %v3223_v54 = vadd.f32 %v3222_v35, %v3134_v47 }
 0x4a9   : > { %v4082_v42 = vsel %vm6728_vm6, %v4003_v12, %v4081_v9  ;;  %v3623_v50 = vmax.f32 %v5459_v28, %v5463_v41  ;;  %v5465_v44 = vpop.eup %5464 }
 0x4aa   : > { %4083 = vst [vmem:[%s6726_s27 + $0xa0] sm:$0xff] %v4082_v42  ;;  %5466 = vtanh.f32 %v3398_v60  ;;  %v3624_v49 = vmax.f32 %v5461_v40, %v5465_v44 }
 0x4ab   : > { %v3840_v37 = vrot.slane %v3623_v50, 1  ;;  %5468 = vtanh.f32 %v3223_v54 }
 0x4ac   : > { %v3841_v33 = vrot.slane %v3624_v49, 1 }
 0x4ad   : > { %v3964_v39 = vmax.f32 %v3623_v50, %v3840_v37  ;;  %v3311_v6 = vpop.f32.mrf.mxu2  ;;  %v3135_v52 = vpop.f32.mrf.mxu0 }
 0x4ae   : > { %v3312_v25 = vadd.f32 %v3311_v6, %v6704_v2  ;;  %v3400_v32 = vpop.f32.mrf.mxu3  ;;  %v3136_v7 = vadd.f32 %v3135_v52, %v6699_v43  ;;  %v3224_v29 = vpop.f32.mrf.mxu1  ;;  %v3965_v56 = vmax.f32 %v3624_v49, %v3841_v33 }
 0x4af   : > { %v4004_v14 = vpack.c.bf16 %v3964_v39, %v3963_v61  ;;  %v4093_v61 = vld [vmem:[%s6726_s27 + $0xc0] sm:$0xff] }
 0x4b0   : > { %v5467_v0 = vpop.eup %5466  ;;  %v3401_v46 = vadd.f32 %v3400_v32, %v3312_v25  ;;  %v3225_v62 = vadd.f32 %v3224_v29, %v3136_v7 }
 0x4b1   : > { %v4085_v3 = vsel %vm6728_vm6, %v4004_v14, %v4084_v34  ;;  %v3625_v51 = vmax.f32 %v5463_v41, %v5467_v0  ;;  %v5469_v13 = vpop.eup %5468 }
 0x4b2   : > { %4086 = vst [vmem:[%s6726_s27 + $0xa8] sm:$0xff] %v4085_v3  ;;  %5470 = vtanh.f32 %v3401_v46  ;;  %v3626_v30 = vmax.f32 %v5465_v44, %v5469_v13 }
 0x4b3   : > { %v3842_v16 = vrot.slane %v3625_v51, 1  ;;  %5472 = vtanh.f32 %v3225_v62 }
 0x4b4   : > { %v3843_v45 = vrot.slane %v3626_v30, 1 }
 0x4b5   : > { %v3966_v58 = vmax.f32 %v3625_v51, %v3842_v16  ;;  %v3313_v57 = vpop.f32.mrf.mxu2  ;;  %v3138_v15 = vpop.f32.mrf.mxu0 }
 0x4b6   : > { %v3314_v20 = vadd.f32 %v3313_v57, %v6704_v2  ;;  %v3402_v21 = vpop.f32.mrf.mxu3  ;;  %v3139_v36 = vadd.f32 %v3138_v15, %v6699_v43  ;;  %v3227_v4 = vpop.f32.mrf.mxu1  ;;  %v3967_v22 = vmax.f32 %v3626_v30, %v3843_v45 }
 0x4b7   : > { %v4005_v27 = vpack.c.bf16 %v3966_v58, %v3965_v56  ;;  %v4096_v56 = vld [vmem:[%s6726_s27 + $0xc8] sm:$0xff] }
 0x4b8   : > { %v5471_v38 = vpop.eup %5470  ;;  %v3403_v23 = vadd.f32 %v3402_v21, %v3314_v20  ;;  %v3228_v1 = vadd.f32 %v3227_v4, %v3139_v36 }
 0x4b9   : > { %v4088_v48 = vsel %vm6728_vm6, %v4005_v27, %v4087_v5  ;;  %v3627_v28 = vmax.f32 %v5467_v0, %v5471_v38  ;;  %v5473_v55 = vpop.eup %5472 }
 0x4ba   : > { %4089 = vst [vmem:[%s6726_s27 + $0xb0] sm:$0xff] %v4088_v48  ;;  %5474 = vtanh.f32 %v3403_v23  ;;  %v3628_v40 = vmax.f32 %v5469_v13, %v5473_v55 }
 0x4bb   : > { %v3844_v8 = vrot.slane %v3627_v28, 1  ;;  %5476 = vtanh.f32 %v3228_v1 }
 0x4bc   : > { %v3845_v35 = vrot.slane %v3628_v40, 1 }
 0x4bd   : > { %v3968_v53 = vmax.f32 %v3627_v28, %v3844_v8  ;;  %v3316_v18 = vpop.f32.mrf.mxu2  ;;  %v3140_v10 = vpop.f32.mrf.mxu0 }
 0x4be   : > { %v3317_v26 = vadd.f32 %v3316_v18, %v6704_v2  ;;  %v3405_v17 = vpop.f32.mrf.mxu3  ;;  %v3141_v63 = vadd.f32 %v3140_v10, %v6699_v43  ;;  %v3229_v19 = vpop.f32.mrf.mxu1  ;;  %v3969_v50 = vmax.f32 %v3628_v40, %v3845_v35 }
 0x4bf   : > { %v4006_v9 = vpack.c.bf16 %v3968_v53, %v3967_v22  ;;  %v4099_v22 = vld [vmem:[%s6726_s27 + $0xd0] sm:$0xff] }
 0x4c0   : > { %v5475_v59 = vpop.eup %5474  ;;  %v3406_v12 = vadd.f32 %v3405_v17, %v3317_v26  ;;  %v3230_v60 = vadd.f32 %v3229_v19, %v3141_v63 }
 0x4c1   : > { %v4091_v47 = vsel %vm6728_vm6, %v4006_v9, %v4090_v24  ;;  %v3629_v41 = vmax.f32 %v5471_v38, %v5475_v59  ;;  %v5477_v42 = vpop.eup %5476 }
 0x4c2   : > { %4092 = vst [vmem:[%s6726_s27 + $0xb8] sm:$0xff] %v4091_v47  ;;  %5478 = vtanh.f32 %v3406_v12  ;;  %v3630_v44 = vmax.f32 %v5473_v55, %v5477_v42 }
 0x4c3   : > { %v3846_v11 = vrot.slane %v3629_v41, 1  ;;  %5480 = vtanh.f32 %v3230_v60 }
 0x4c4   : > { %v3847_v29 = vrot.slane %v3630_v44, 1 }
 0x4c5   : > { %v3970_v54 = vmax.f32 %v3629_v41, %v3846_v11  ;;  %v3318_v37 = vpop.f32.mrf.mxu2  ;;  %v3143_v6 = vpop.f32.mrf.mxu0 }
 0x4c6   : > { %v3319_v39 = vadd.f32 %v3318_v37, %v6704_v2  ;;  %v3407_v49 = vpop.f32.mrf.mxu3  ;;  %v3144_v25 = vadd.f32 %v3143_v6, %v6699_v43  ;;  %v3232_v32 = vpop.f32.mrf.mxu1  ;;  %v3971_v51 = vmax.f32 %v3630_v44, %v3847_v29 }
 0x4c7   : > { %v4007_v34 = vpack.c.bf16 %v3970_v54, %v3969_v50  ;;  %v4102_v50 = vld [vmem:[%s6726_s27 + $0xd8] sm:$0xff] }
 0x4c8   : > { %v5479_v52 = vpop.eup %5478  ;;  %v3408_v14 = vadd.f32 %v3407_v49, %v3319_v39  ;;  %v3233_v46 = vadd.f32 %v3232_v32, %v3144_v25 }
 0x4c9   : > { %v4094_v7 = vsel %vm6728_vm6, %v4007_v34, %v4093_v61  ;;  %v3631_v0 = vmax.f32 %v5475_v59, %v5479_v52  ;;  %v5481_v3 = vpop.eup %5480 }
 0x4ca   : > { %4095 = vst [vmem:[%s6726_s27 + $0xc0] sm:$0xff] %v4094_v7  ;;  %5482 = vtanh.f32 %v3408_v14  ;;  %v3632_v13 = vmax.f32 %v5477_v42, %v5481_v3 }
 0x4cb   : > { %v3848_v33 = vrot.slane %v3631_v0, 1  ;;  %5484 = vtanh.f32 %v3233_v46 }
 0x4cc   : > { %v3849_v4 = vrot.slane %v3632_v13, 1 }
 0x4cd   : > { %v3972_v62 = vmax.f32 %v3631_v0, %v3848_v33  ;;  %v3321_v16 = vpop.f32.mrf.mxu2  ;;  %v3145_v57 = vpop.f32.mrf.mxu0  ;;  %v4105_v33 = vld [vmem:[%s6726_s27 + $0xe0] sm:$0xff] }
 0x4ce   : > { %v3322_v58 = vadd.f32 %v3321_v16, %v6704_v2  ;;  %v3410_v30 = vpop.f32.mrf.mxu3  ;;  %v3146_v20 = vadd.f32 %v3145_v57, %v6699_v43  ;;  %v3234_v21 = vpop.f32.mrf.mxu1  ;;  %v3973_v28 = vmax.f32 %v3632_v13, %v3849_v4 }
 0x4cf   : > { %v4008_v5 = vpack.c.bf16 %v3972_v62, %v3971_v51 }
 0x4d0   : > { %v5483_v15 = vpop.eup %5482  ;;  %v3411_v27 = vadd.f32 %v3410_v30, %v3322_v58  ;;  %v3235_v23 = vadd.f32 %v3234_v21, %v3146_v20 }
 0x4d1   : > { %v4097_v36 = vsel %vm6728_vm6, %v4008_v5, %v4096_v56  ;;  %v3633_v38 = vmax.f32 %v5479_v52, %v5483_v15  ;;  %v5485_v48 = vpop.eup %5484 }
 0x4d2   : > { %4098 = vst [vmem:[%s6726_s27 + $0xc8] sm:$0xff] %v4097_v36  ;;  %5486 = vtanh.f32 %v3411_v27  ;;  %v3634_v55 = vmax.f32 %v5481_v3, %v5485_v48 }
 0x4d3   : > { %v3850_v45 = vrot.slane %v3633_v38, 1  ;;  %5488 = vtanh.f32 %v3235_v23 }
 0x4d4   : > { %v3851_v19 = vrot.slane %v3634_v55, 1 }
 0x4d5   : > { %v3974_v1 = vmax.f32 %v3633_v38, %v3850_v45  ;;  %v3323_v8 = vpop.f32.mrf.mxu2  ;;  %v3148_v18 = vpop.f32.mrf.mxu0 }
 0x4d6   : > { %v3324_v53 = vadd.f32 %v3323_v8, %v6704_v2  ;;  %v3412_v40 = vpop.f32.mrf.mxu3  ;;  %v3149_v26 = vadd.f32 %v3148_v18, %v6699_v43  ;;  %v3237_v17 = vpop.f32.mrf.mxu1  ;;  %v3975_v41 = vmax.f32 %v3634_v55, %v3851_v19  ;;  %v4111_v55 = vld [vmem:[%s6726_s27 + $0xf0] sm:$0xff] }
 0x4d7   : > { %v4009_v24 = vpack.c.bf16 %v3974_v1, %v3973_v28 }
 0x4d8   : > { %v5487_v10 = vpop.eup %5486  ;;  %v3413_v9 = vadd.f32 %v3412_v40, %v3324_v53  ;;  %v3238_v12 = vadd.f32 %v3237_v17, %v3149_v26 }
 0x4d9   : > { %v4100_v63 = vsel %vm6728_vm6, %v4009_v24, %v4099_v22  ;;  %v3635_v59 = vmax.f32 %v5483_v15, %v5487_v10  ;;  %v5489_v47 = vpop.eup %5488 }
 0x4da   : > { %4101 = vst [vmem:[%s6726_s27 + $0xd0] sm:$0xff] %v4100_v63  ;;  %5490 = vtanh.f32 %v3413_v9  ;;  %v3636_v42 = vmax.f32 %v5485_v48, %v5489_v47 }
 0x4db   : > { %v3852_v35 = vrot.slane %v3635_v59, 1  ;;  %5492 = vtanh.f32 %v3238_v12 }
 0x4dc   : > { %v3853_v32 = vrot.slane %v3636_v42, 1 }
 0x4dd   : > { %v3976_v60 = vmax.f32 %v3635_v59, %v3852_v35  ;;  %v3326_v11 = vpop.f32.mrf.mxu2  ;;  %v3150_v37 = vpop.f32.mrf.mxu0 }
 0x4de   : > { %v3327_v54 = vadd.f32 %v3326_v11, %v6704_v2  ;;  %v3415_v44 = vpop.f32.mrf.mxu3  ;;  %v3151_v39 = vadd.f32 %v3150_v37, %v6699_v43  ;;  %v3239_v34 = vpop.f32.mrf.mxu1  ;;  %v3977_v0 = vmax.f32 %v3636_v42, %v3853_v32 }
 0x4df   : > { %v4010_v61 = vpack.c.bf16 %v3976_v60, %v3975_v41 }
 0x4e0   : > { %v5491_v49 = vpop.eup %5490  ;;  %v3416_v6 = vadd.f32 %v3415_v44, %v3327_v54  ;;  %v3240_v14 = vadd.f32 %v3239_v34, %v3151_v39 }
 0x4e1   : > { %v4103_v25 = vsel %vm6728_vm6, %v4010_v61, %v4102_v50  ;;  %v3637_v52 = vmax.f32 %v5487_v10, %v5491_v49  ;;  %v5493_v7 = vpop.eup %5492 }
 0x4e2   : > { %4104 = vst [vmem:[%s6726_s27 + $0xd8] sm:$0xff] %v4103_v25  ;;  %5494 = vtanh.f32 %v3416_v6  ;;  %v3638_v3 = vmax.f32 %v5489_v47, %v5493_v7 }
 0x4e3   : > { %v3854_v29 = vrot.slane %v3637_v52, 1  ;;  %5496 = vtanh.f32 %v3240_v14 }
 0x4e4   : > { %v3855_v30 = vrot.slane %v3638_v3, 1 }
 0x4e5   : > { %v3978_v46 = vmax.f32 %v3637_v52, %v3854_v29  ;;  %v3328_v43 = vpop.f32.mrf.mxu2 }
 0x4e6   : > { %v3329_v51 = vadd.f32 %v3328_v43, %v6704_v2  ;;  %v3417_v13 = vpop.f32.mrf.mxu3  ;;  %v3979_v21 = vmax.f32 %v3638_v3, %v3855_v30  ;;  %v4108_v2 = vld [vmem:[%s6726_s27 + $0xe8] sm:$0xff] }
 0x4e7   : > { %v4011_v62 = vpack.c.bf16 %v3978_v46, %v3977_v0 }
 0x4e8   : > { %v5495_v16 = vpop.eup %5494  ;;  %v3418_v56 = vadd.f32 %v3417_v13, %v3329_v51 }
 0x4e9   : > { %v4106_v58 = vsel %vm6728_vm6, %v4011_v62, %v4105_v33  ;;  %v3639_v57 = vmax.f32 %v5491_v49, %v5495_v16  ;;  %v5497_v5 = vpop.eup %5496 }
 0x4ea   : > { %4107 = vst [vmem:[%s6726_s27 + $0xe0] sm:$0xff] %v4106_v58  ;;  %5498 = vtanh.f32 %v3418_v56  ;;  %v3640_v27 = vmax.f32 %v5493_v7, %v5497_v5 }
 0x4eb   : > { %v3856_v20 = vrot.slane %v3639_v57, 1 }
 0x4ec   : > { %v3857_v23 = vrot.slane %v3640_v27, 1 }
 0x4ed   : > { %v3980_v15 = vmax.f32 %v3639_v57, %v3856_v20 }
 0x4ee   : > { %v3981_v28 = vmax.f32 %v3640_v27, %v3857_v23 }
 0x4ef   : > { %v4012_v36 = vpack.c.bf16 %v3980_v15, %v3979_v21 }
 0x4f0   : > { %v5499_v4 = vpop.eup %5498 }
 0x4f1   : > { %v4109_v38 = vsel %vm6728_vm6, %v4012_v36, %v4108_v2  ;;  %v3641_v48 = vmax.f32 %v5495_v16, %v5499_v4 }
 0x4f2   : > { %4110 = vst [vmem:[%s6726_s27 + $0xe8] sm:$0xff] %v4109_v38 }
 0x4f3   : > { %v3858_v45 = vrot.slane %v3641_v48, 1 }
 0x4f5   : > { %v3982_v1 = vmax.f32 %v3641_v48, %v3858_v45 }
 0x4f7   : > { %v4013_v8 = vpack.c.bf16 %v3982_v1, %v3981_v28 }
 0x4f9   : > { %v4112_v22 = vsel %vm6728_vm6, %v4013_v8, %v4111_v55 }
 0x4fa   : > { %4113 = vst [vmem:[%s6726_s27 + $0xf0] sm:$0xff] %v4112_v22 }
 0x4fb PF: > { %s26_s10 = sadd.s32 1, %s5748_s10   ;;  %s7032_s30 = sld [smem:[#allocation18_spill]] }
 0x4fc   : > { %p23_p2 = scmp.ge.s32.totalorder %s26_s10, 4   ;;  %s7033_s9 = sld [smem:[#allocation19_spill]] }
 0x4fd   : > { %s7034_s27 = smov %s5732_s28  ;;  %s7035_s28 = smov %s5736_s29 }
 0x4fe   : > { %s7036_s29 = smov %s5902_s19  ;;  %25 = sbr.rel (!%p23_p2) target bundleno = 13 (0xd), region = 121 }
 0x503   :  { %4146 = vsyncpa [#allocation4], 1 }
 0x504   :  { %4148 = vsyncpa [#allocation4 + $0x1], 1 }
 0x505   :  { %4149 = vsyncpa [#allocation6], 1 }
 0x506   :  { %4151 = vsyncpa [#allocation6 + $0x1], 1 }
 0x507   :  { %4152 = vsyncpa [#allocation9], 1 }
 0x508   :  { %4153 = vsyncpa [#allocation12], 1 }

</bundles_post_ra>
